<compile_context>
chip_gen: v7x
topology: tpu7x:2x2x1
jax: 0.10.0
libtpu: 0.0.40
codegen_flags: <defaults>
</compile_context>

<pallas_src>
import functools

import numpy as np

import jax
import jax.numpy as jnp
from jax.experimental import pallas as pl
from jax.experimental.pallas import tpu as pltpu


def _full_spec(shape):
    """Whole-array block for a grid=(1,) pallas_call."""
    nd = len(shape)
    return pl.BlockSpec(shape, lambda *_: (0,) * nd)


# --------------------------------------------------------------------------
# Attention module: single kernel, batched matmuls, lane-dense outputs
# --------------------------------------------------------------------------
def _make_attn_kernel(B, P, C, L):
    def kernel(tT_ref, ctx_ref, wc_ref, mask_ref, hc_ref, attn_ref):
        tT = tT_ref[...]                              # (B, P, C) f32, passthrough
        tT_bf = tT.astype(jnp.bfloat16)               # cast once (loop-invariant)
        ctx = ctx_ref[...]                            # (B, nef, L) bf16
        wc = jnp.broadcast_to(wc_ref[...], (B,) + tuple(wc_ref.shape))  # (B,C,nef)

        # Conv1x1(context): sourceT[b] = wc @ ctx[b] -> (B, C, L)  (batched dot)
        src = jnp.einsum("bcn,bnl->bcl", wc, ctx,
                         preferred_element_type=jnp.float32)
        src_bf = src.astype(jnp.bfloat16)

        # Logits emitted already transposed as (B, L, P): P=H*W on lanes (lane-dense
        # output); softmax runs over the word dim L (sublanes).
        logits = jnp.einsum("bcl,bpc->blp", src_bf, tT_bf,
                            preferred_element_type=jnp.float32)

        # torch quirk reproduced bug-for-bug: flat attention row i = b*P + p is
        # masked with mask row (i % B).  Hoisted: B wheres total, no per-b loop.
        b_idx = jax.lax.broadcasted_iota(jnp.int32, (B, 1, P), 0)
        p_idx = jax.lax.broadcasted_iota(jnp.int32, (B, 1, P), 2)
        row_mod = (b_idx * P + p_idx) % B             # (B, 1, P)
        m = mask_ref[...]                             # (B, L, 1) f32, 1.0 = masked
        for bb in range(B):
            hit = (row_mod == bb) & (m[bb] > 0.5)     # -> (B, L, P)
            # -1e30 instead of -inf: identical result when >=1 word is unmasked
            # (exp underflows to 0 exactly) and no NaN if a row is fully masked.
            logits = jnp.where(hit, -1e30, logits)

        # softmax over L (f32, EUP exp + approx reciprocal)
        mx = jnp.max(logits, axis=1, keepdims=True)
        e = jnp.exp(logits - mx)
        s = jnp.sum(e, axis=1, keepdims=True)
        attn = e * pl.reciprocal(s, approx=True)      # (B, L, P)
        attn_ref[...] = attn

        # weight / c_code: c[b,p,c] = sum_l src[b,c,l] * attn[b,l,p]
        c_code = jnp.einsum("blp,bcl->bpc", attn.astype(jnp.bfloat16), src_bf,
                            preferred_element_type=jnp.float32)

        # h_code || c_code emitted pre-concatenated with ONE store; its HBM bytes
        # are already the (B*H, W*2C) lane-dense slab the first conv consumes.
        hc_ref[...] = jnp.concatenate([tT, c_code], axis=-1)

    return kernel


def attention_module(h_code, word_emb, w_ctx, mask):
    B, C, H, W = h_code.shape                  # C == ngf (idf)
    nef, L = word_emb.shape[1], word_emb.shape[2]
    P = H * W

    # NCHW -> (B, P, C) (== NHWC flat): the single unavoidable input relayout.
    targetT = jnp.transpose(h_code.reshape(B, C, P), (0, 2, 1)).astype(jnp.float32)
    ctx_bf = word_emb.astype(jnp.bfloat16)
    wc_bf = w_ctx.astype(jnp.bfloat16)
    mask3 = mask.astype(jnp.float32)[:, :, None]        # (B, L, 1), no (B,P,L) bias

    hc, attn = pl.pallas_call(
        _make_attn_kernel(B, P, C, L),
        grid=(1,),
        in_specs=[
            _full_spec((B, P, C)),
            _full_spec((B, nef, L)),
            _full_spec((C, nef)),
            _full_spec((B, L, 1)),
        ],
        out_specs=[
            _full_spec((B, P, 2 * C)),
            _full_spec((B, L, P)),
        ],
        out_shape=[
            jax.ShapeDtypeStruct((B, P, 2 * C), jnp.float32),
            jax.ShapeDtypeStruct((B, L, P), jnp.float32),
        ],
        compiler_params=pltpu.CompilerParams(dimension_semantics=("arbitrary",)),
    )(targetT, ctx_bf, wc_bf, mask3)

    return hc, attn                            # (B, P, 2C) NHWC-flat, (B, L, P)


# --------------------------------------------------------------------------
# Fused Conv3x3 [+ nearest x2 upsample] + BatchNorm (+GLU) (+residual) kernel
# --------------------------------------------------------------------------
def _conv_band_constants(w, B, H, W_, upsample):
    """Constant matrices expressing pad + 3x3 patch gather (and optionally the
    nearest x2 upsample) as lane-dense matmuls.  w: (3, 3, Cin, Cout) HWIO."""
    Cin, Cout = w.shape[2], w.shape[3]
    Ho, Wo = (2 * H, 2 * W_) if upsample else (H, W_)

    # W-direction: block-banded weights (3, W*Cin, Wo*Cout); kx taps (and the x2
    # column duplication for the up-conv) folded into the band pattern.
    bands = []
    for ky in range(3):
        m = jnp.zeros((W_ * Cin, Wo * Cout), jnp.float32)
        for kx in range(3):
            if upsample:
                vo = np.arange(Wo) + kx - 1
                valid = (vo >= 0) & (vo < Wo)
                src_w = np.clip(vo, 0, Wo - 1) // 2
                S = ((np.arange(W_)[:, None] == src_w[None, :])
                     & valid[None, :]).astype(np.float32)
            else:
                S = np.eye(W_, Wo, k=1 - kx, dtype=np.float32)
            m = m + jnp.kron(jnp.asarray(S), w[ky, kx])
        bands.append(m)
    wband = jnp.stack(bands).astype(jnp.bfloat16)        # (3, W*Cin, Wo*Cout)

    # H-direction: 0/1 row selectors (3, B*Ho, B*H) handling zero padding, the x2
    # row duplication (up-conv), and batch boundaries (block-diagonal over b).
    rsel = np.zeros((3, B * Ho, B * H), np.float32)
    for ky in range(3):
        for ho in range(Ho):
            u = ho + ky - 1
            if not (0 <= u < Ho):
                continue
            hi = (u // 2) if upsample else u
            for b in range(B):
                rsel[ky, b * Ho + ho, b * H + hi] = 1.0
    rsel = jnp.asarray(rsel).astype(jnp.bfloat16)
    return wband, rsel, Ho, Wo


def _make_conv_bn_kernel(n_pix, glu, has_res):
    inv_n = 1.0 / float(n_pix)

    def kernel(*refs):
        x_ref, wband_ref, rsel_ref, tmat_ref, gam_ref, bet_ref = refs[:6]
        i = 6
        sel_ref = None
        res_ref = None
        if glu:
            sel_ref = refs[i]; i += 1
        if has_res:
            res_ref = refs[i]; i += 1
        out_ref = refs[i]

        rows_out = rsel_ref.shape[1]
        lane_out = wband_ref.shape[2]

        x = x_ref[...].astype(jnp.bfloat16)              # cast once (MXU operand)
        acc = jnp.zeros((rows_out, lane_out), jnp.float32)
        for ky in range(3):                              # 3 vertical taps, static
            # Row gather (pad / x2 duplicate) via a 0/1 selector: exact in bf16.
            xr = jnp.dot(rsel_ref[ky], x, preferred_element_type=jnp.float32)
            acc = acc + jnp.dot(xr.astype(jnp.bfloat16), wband_ref[ky],
                                preferred_element_type=jnp.float32)

        # BatchNorm2d (training-mode batch stats), one-pass variance.  Per-channel
        # totals are broadcast back across the w-interleaved lanes with a constant
        # 0/1 matmul so everything stays lane-dense (no in-kernel lane relayout).
        stats = jnp.concatenate(
            [jnp.sum(acc, axis=0, keepdims=True),
             jnp.sum(acc * acc, axis=0, keepdims=True)], axis=0)  # (2, lane_out)
        cs = jnp.dot(stats, tmat_ref[...], preferred_element_type=jnp.float32)
        mean = cs[0:1, :] * inv_n
        var = cs[1:2, :] * inv_n - mean * mean
        y = (acc - mean) * jax.lax.rsqrt(var + 1e-5)
        y = y * gam_ref[...] + bet_ref[...]

        if glu:
            # GLU halves picked with two constant 0/1 selection matmuls (exact f32)
            # instead of narrow lane slices / re-packing.
            a = jnp.dot(y, sel_ref[0], preferred_element_type=jnp.float32)
            g = jnp.dot(y, sel_ref[1], preferred_element_type=jnp.float32)
            y = a * jax.nn.sigmoid(g)

        if has_res:
            y = y + res_ref[...]

        out_ref[...] = y                                 # single full-width store

    return kernel


def conv3x3_bn(x, w, gamma, beta, *, glu, res=None, upsample=False):
    """x: (B, H, W, Cin) NHWC; w: (3, 3, Cin, Cout) HWIO (bias=False conv).
    Returns (B, Ho, Wo, Ceff) NHWC with Ceff = Cout//2 if glu else Cout."""
    B, H, W_, Cin = x.shape
    Cout = w.shape[-1]
    Ceff = Cout // 2 if glu else Cout

    wband, rsel, Ho, Wo = _conv_band_constants(w, B, H, W_, upsample)
    rows_in, rows_out = B * H, B * Ho
    lane_in, lane_eff = W_ * Cin, Wo * Ceff
    n_pix = B * Ho * Wo

    tmat = jnp.asarray(np.kron(np.ones((Wo, Wo), np.float32),
                               np.eye(Cout, dtype=np.float32)))
    gamma_t = jnp.tile(gamma.reshape(1, Cout), (1, Wo)).astype(jnp.float32)
    beta_t = jnp.tile(beta.reshape(1, Cout), (1, Wo)).astype(jnp.float32)

    inputs = [x.reshape(rows_in, lane_in), wband, rsel, tmat, gamma_t, beta_t]
    if glu:
        blk_a = np.vstack([np.eye(Ceff, dtype=np.float32),
                           np.zeros((Ceff, Ceff), np.float32)])
        blk_b = np.vstack([np.zeros((Ceff, Ceff), np.float32),
                           np.eye(Ceff, dtype=np.float32)])
        sels = jnp.asarray(np.stack(
            [np.kron(np.eye(Wo, dtype=np.float32), blk_a),
             np.kron(np.eye(Wo, dtype=np.float32), blk_b)]))
        inputs.append(sels)
    if res is not None:
        inputs.append(res.reshape(rows_out, lane_eff).astype(jnp.float32))

    out = pl.pallas_call(
        _make_conv_bn_kernel(n_pix, glu, res is not None),
        grid=(1,),
        in_specs=[_full_spec(tuple(a.shape)) for a in inputs],
        out_specs=_full_spec((rows_out, lane_eff)),
        out_shape=jax.ShapeDtypeStruct((rows_out, lane_eff), jnp.float32),
        compiler_params=pltpu.CompilerParams(dimension_semantics=("arbitrary",)),
    )(*inputs)

    return out.reshape(B, Ho, Wo, Ceff)         # free reshape back to NHWC


# --------------------------------------------------------------------------
# NextStageGenerator forward  (torch's unused c_code argument is omitted)
# --------------------------------------------------------------------------
def next_stage_generator(params, h_code, word_emb, mask):
    B, ngf, H, W = h_code.shape
    L = word_emb.shape[2]

    # AttentionModule: emits h_code||c_code already in the conv-ready layout and
    # attn already in the torch output layout (B, L, P) -> free reshape below.
    hc, attn_blp = attention_module(h_code, word_emb, params["w_ctx"], mask)
    x = hc.reshape(B, H, W, 2 * ngf)            # free reshape (same bytes)

    # two ResidualBlocks on C = 2*ngf channels
    for blk in params["residual"]:
        y = conv3x3_bn(x, blk["w1"], blk["g1"], blk["b1"], glu=True)
        x = conv3x3_bn(y, blk["w2"], blk["g2"], blk["b2"], glu=False, res=x)

    # UpBlock: nearest x2 upsample fused into the conv's row/band selectors
    x = conv3x3_bn(x, params["up_w"], params["up_g"], params["up_b"],
                   glu=True, upsample=True)

    out = jnp.transpose(x, (0, 3, 1, 2))        # (B, ngf, 2H, 2W) NCHW
    attn = attn_blp.reshape(B, L, H, W)         # free reshape, no transpose
    return out, attn


def init_params(key, ngf, nef):
    keys = iter(jax.random.split(key, 32))

    def nrm(shape, scale=0.1):
        return (scale * jax.random.normal(next(keys), shape)).astype(jnp.float32)

    C = 2 * ngf
    params = {"w_ctx": nrm((ngf, nef))}          # Conv1x1(nef -> ngf), no bias
    blocks = []
    for _ in range(2):                           # num_residual = 2
        blocks.append({
            "w1": nrm((3, 3, C, 2 * C)), "g1": 1.0 + nrm((2 * C,)), "b1": nrm((2 * C,)),
            "w2": nrm((3, 3, C, C)),     "g2": 1.0 + nrm((C,)),     "b2": nrm((C,)),
        })
    params["residual"] = blocks
    params["up_w"] = nrm((3, 3, C, C))           # Conv3x3(2ngf -> 2ngf) before GLU
    params["up_g"] = 1.0 + nrm((C,))
    params["up_b"] = nrm((C,))
    return params


if __name__ == "__main__":
    ngf, nef, ncf = 8, 6, 4          # ncf (cf_dim) is stored but unused in forward
    B, H, W, L = 2, 8, 8, 5

    key = jax.random.PRNGKey(0)
    k_h, k_w, k_m, k_p = jax.random.split(key, 4)
    h_code = jax.random.normal(k_h, (B, ngf, H, W), jnp.float32)
    word_emb = jax.random.normal(k_w, (B, nef, L), jnp.float32)
    mask = jax.random.bernoulli(k_m, 0.3, (B, L))
    mask = mask.at[:, 0].set(False)  # keep at least one unmasked word per row

    params = init_params(k_p, ngf, nef)
    fwd = jax.jit(functools.partial(next_stage_generator, params))

    out, attn = fwd(h_code, word_emb, mask)
    jax.block_until_ready((out, attn))

    assert out.shape == (B, ngf, 2 * H, 2 * W), out.shape
    assert attn.shape == (B, L, H, W), attn.shape
    assert bool(jnp.all(jnp.isfinite(out))) and bool(jnp.all(jnp.isfinite(attn)))
    print("KERNEL_OK")
</pallas_src>

<mosaic_0001>
module attributes {stable_mosaic.version = 11 : i64} {
  func.func @kernel(%arg0: i32, %arg1: memref<2x64x8xf32, #tpu.memory_space<vmem>>, %arg2: memref<2x6x5xbf16, #tpu.memory_space<vmem>>, %arg3: memref<8x6xbf16, #tpu.memory_space<vmem>>, %arg4: memref<2x5x1xf32, #tpu.memory_space<vmem>>, %arg5: memref<2x64x16xf32, #tpu.memory_space<vmem>>, %arg6: memref<2x5x64xf32, #tpu.memory_space<vmem>>) attributes {dimension_semantics = [#tpu.dimension_semantics<arbitrary>], iteration_bounds = array<i64: 1>, scalar_prefetch = 0 : i64, scratch_operands = 0 : i64, tpu.core_type = #tpu.core_type<tc>, window_params = [{pipeline_mode = #tpu.pipeline_mode<synchronous>, transform_indices = @transform_0, window_bounds = array<i64: 2, 64, 8>}, {pipeline_mode = #tpu.pipeline_mode<synchronous>, transform_indices = @transform_1, window_bounds = array<i64: 2, 6, 5>}, {pipeline_mode = #tpu.pipeline_mode<synchronous>, transform_indices = @transform_2, window_bounds = array<i64: 8, 6>}, {pipeline_mode = #tpu.pipeline_mode<synchronous>, transform_indices = @transform_3, window_bounds = array<i64: 2, 5, 1>}, {pipeline_mode = #tpu.pipeline_mode<synchronous>, transform_indices = @transform_4, window_bounds = array<i64: 2, 64, 16>}, {pipeline_mode = #tpu.pipeline_mode<synchronous>, transform_indices = @transform_5, window_bounds = array<i64: 2, 5, 64>}]} {
    %c0 = arith.constant 0 : index
    %c0_0 = arith.constant 0 : index
    %c0_1 = arith.constant 0 : index
    %0 = vector.load %arg1[%c0, %c0_0, %c0_1] : memref<2x64x8xf32, #tpu.memory_space<vmem>>, vector<2x64x8xf32>
    %1 = arith.truncf %0 : vector<2x64x8xf32> to vector<2x64x8xbf16>
    %c0_2 = arith.constant 0 : index
    %c0_3 = arith.constant 0 : index
    %c0_4 = arith.constant 0 : index
    %2 = vector.load %arg2[%c0_2, %c0_3, %c0_4] : memref<2x6x5xbf16, #tpu.memory_space<vmem>>, vector<2x6x5xbf16>
    %c0_5 = arith.constant 0 : index
    %c0_6 = arith.constant 0 : index
    %3 = vector.load %arg3[%c0_5, %c0_6] : memref<8x6xbf16, #tpu.memory_space<vmem>>, vector<8x6xbf16>
    %4 = vector.shape_cast %3 : vector<8x6xbf16> to vector<1x8x6xbf16>
    %5 = vector.broadcast %4 : vector<1x8x6xbf16> to vector<2x8x6xbf16>
    "tpu.trace_start"() <{level = 10 : i32, message = "bcn,bnl->bcl"}> : () -> ()
    %cst = arith.constant dense<0.000000e+00> : vector<2x8x5xf32>
    %6 = tpu.matmul %5, %2, %cst {dimension_numbers = #tpu.dot_dimension_numbers<[2], [1], [1], [2], [0, 0, 0, 1, 1, 2], [0], [0]>} : vector<2x8x6xbf16>, vector<2x6x5xbf16>, vector<2x8x5xf32> -> vector<2x8x5xf32>
    "tpu.trace_stop"() : () -> ()
    %7 = arith.truncf %6 : vector<2x8x5xf32> to vector<2x8x5xbf16>
    "tpu.trace_start"() <{level = 10 : i32, message = "bcl,bpc->blp"}> : () -> ()
    %cst_7 = arith.constant dense<0.000000e+00> : vector<2x5x64xf32>
    %8 = tpu.matmul %7, %1, %cst_7 {dimension_numbers = #tpu.dot_dimension_numbers<[1], [2], [2], [1], [0, 0, 0, 2, 1, 1], [0], [0]>} : vector<2x8x5xbf16>, vector<2x64x8xbf16>, vector<2x5x64xf32> -> vector<2x5x64xf32>
    "tpu.trace_stop"() : () -> ()
    %9 = tpu.iota {dimensions = array<i32: 0>} : vector<2x1x64xi32>
    %10 = tpu.iota {dimensions = array<i32: 2>} : vector<2x1x64xi32>
    %c64_i32 = arith.constant 64 : i32
    %11 = vector.broadcast %c64_i32 : i32 to vector<2x1x64xi32>
    %12 = arith.muli %9, %11 : vector<2x1x64xi32>
    %13 = arith.addi %12, %10 : vector<2x1x64xi32>
    %c2_i32 = arith.constant 2 : i32
    %c0_i32 = arith.constant 0 : i32
    %14 = arith.cmpi eq, %c2_i32, %c0_i32 : i32
    %c1_i32 = arith.constant 1 : i32
    %15 = arith.select %14, %c1_i32, %c2_i32 : i32
    %16 = vector.broadcast %15 : i32 to vector<2x1x64xi32>
    %17 = arith.remsi %13, %16 : vector<2x1x64xi32>
    %c0_i32_8 = arith.constant 0 : i32
    %18 = vector.broadcast %c0_i32_8 : i32 to vector<2x1x64xi32>
    %19 = arith.cmpi ne, %17, %18 : vector<2x1x64xi32>
    %c0_i32_9 = arith.constant 0 : i32
    %20 = vector.broadcast %c0_i32_9 : i32 to vector<2x1x64xi32>
    %21 = arith.cmpi slt, %17, %20 : vector<2x1x64xi32>
    %c0_i32_10 = arith.constant 0 : i32
    %22 = arith.cmpi slt, %15, %c0_i32_10 : i32
    %23 = vector.broadcast %22 : i1 to vector<2x1x64xi1>
    %24 = vector.broadcast %23 : vector<2x1x64xi1> to vector<2x1x64xi1>
    %25 = arith.xori %21, %24 : vector<2x1x64xi1>
    %26 = arith.andi %25, %19 : vector<2x1x64xi1>
    %27 = vector.broadcast %15 : i32 to vector<2x1x64xi32>
    %28 = arith.addi %17, %27 : vector<2x1x64xi32>
    %29 = arith.select %26, %28, %17 : vector<2x1x64xi1>, vector<2x1x64xi32>
    %c0_11 = arith.constant 0 : index
    %c0_12 = arith.constant 0 : index
    %c0_13 = arith.constant 0 : index
    %30 = vector.load %arg4[%c0_11, %c0_12, %c0_13] : memref<2x5x1xf32, #tpu.memory_space<vmem>>, vector<2x5x1xf32>
    %c0_i32_14 = arith.constant 0 : i32
    %31 = vector.broadcast %c0_i32_14 : i32 to vector<2x1x64xi32>
    %32 = arith.cmpi eq, %29, %31 : vector<2x1x64xi32>
    %33 = vector.extract_strided_slice %30 {offsets = [0, 0, 0], sizes = [1, 5, 1], strides = [1, 1, 1]} : vector<2x5x1xf32> to vector<1x5x1xf32>
    %34 = vector.shape_cast %33 : vector<1x5x1xf32> to vector<5x1xf32>
    %cst_15 = arith.constant 5.000000e-01 : f32
    %35 = vector.broadcast %cst_15 : f32 to vector<5x1xf32>
    %36 = arith.cmpf ogt, %34, %35 : vector<5x1xf32>
    %37 = vector.shape_cast %36 : vector<5x1xi1> to vector<1x5x1xi1>
    %38 = vector.broadcast %32 : vector<2x1x64xi1> to vector<2x5x64xi1>
    %39 = vector.broadcast %37 : vector<1x5x1xi1> to vector<2x5x64xi1>
    %40 = arith.andi %38, %39 : vector<2x5x64xi1>
    %cst_16 = arith.constant -1.000000e+30 : f32
    %41 = vector.broadcast %cst_16 : f32 to vector<2x5x64xf32>
    %42 = arith.select %40, %41, %8 : vector<2x5x64xi1>, vector<2x5x64xf32>
    %c1_i32_17 = arith.constant 1 : i32
    %43 = vector.broadcast %c1_i32_17 : i32 to vector<2x1x64xi32>
    %44 = arith.cmpi eq, %29, %43 : vector<2x1x64xi32>
    %45 = vector.extract_strided_slice %30 {offsets = [1, 0, 0], sizes = [1, 5, 1], strides = [1, 1, 1]} : vector<2x5x1xf32> to vector<1x5x1xf32>
    %46 = vector.shape_cast %45 : vector<1x5x1xf32> to vector<5x1xf32>
    %cst_18 = arith.constant 5.000000e-01 : f32
    %47 = vector.broadcast %cst_18 : f32 to vector<5x1xf32>
    %48 = arith.cmpf ogt, %46, %47 : vector<5x1xf32>
    %49 = vector.shape_cast %48 : vector<5x1xi1> to vector<1x5x1xi1>
    %50 = vector.broadcast %44 : vector<2x1x64xi1> to vector<2x5x64xi1>
    %51 = vector.broadcast %49 : vector<1x5x1xi1> to vector<2x5x64xi1>
    %52 = arith.andi %50, %51 : vector<2x5x64xi1>
    %cst_19 = arith.constant -1.000000e+30 : f32
    %53 = vector.broadcast %cst_19 : f32 to vector<2x5x64xf32>
    %54 = arith.select %52, %53, %42 : vector<2x5x64xi1>, vector<2x5x64xf32>
    %cst_20 = arith.constant dense<0xFF800000> : vector<2x64xf32>
    %55 = vector.multi_reduction <maximumf>, %54, %cst_20 [1] : vector<2x5x64xf32> to vector<2x64xf32>
    %56 = vector.shape_cast %55 : vector<2x64xf32> to vector<2x1x64xf32>
    %57 = vector.broadcast %56 : vector<2x1x64xf32> to vector<2x5x64xf32>
    %58 = arith.subf %54, %57 : vector<2x5x64xf32>
    %59 = math.exp %58 : vector<2x5x64xf32>
    %cst_21 = arith.constant dense<0.000000e+00> : vector<2x64xf32>
    %60 = vector.multi_reduction <add>, %59, %cst_21 [1] : vector<2x5x64xf32> to vector<2x64xf32>
    %61 = vector.shape_cast %60 : vector<2x64xf32> to vector<2x1x64xf32>
    %62 = tpu.reciprocal %61 {approx = true} : vector<2x1x64xf32> -> vector<2x1x64xf32>
    %63 = vector.broadcast %62 : vector<2x1x64xf32> to vector<2x5x64xf32>
    %64 = arith.mulf %59, %63 : vector<2x5x64xf32>
    %c0_22 = arith.constant 0 : index
    %c0_23 = arith.constant 0 : index
    %c0_24 = arith.constant 0 : index
    %65 = vector.load %arg6[%c0_22, %c0_23, %c0_24] : memref<2x5x64xf32, #tpu.memory_space<vmem>>, vector<2x5x64xf32>
    tpu.vector_store %arg6[%c0_22, %c0_23, %c0_24], %64 {strides = array<i32>} : memref<2x5x64xf32, #tpu.memory_space<vmem>>, vector<2x5x64xf32>,
    %66 = arith.truncf %64 : vector<2x5x64xf32> to vector<2x5x64xbf16>
    "tpu.trace_start"() <{level = 10 : i32, message = "blp,bcl->bpc"}> : () -> ()
    %cst_25 = arith.constant dense<0.000000e+00> : vector<2x64x8xf32>
    %67 = tpu.matmul %66, %7, %cst_25 {dimension_numbers = #tpu.dot_dimension_numbers<[1], [2], [2], [1], [0, 0, 0, 2, 1, 1], [0], [0]>} : vector<2x5x64xbf16>, vector<2x8x5xbf16>, vector<2x64x8xf32> -> vector<2x64x8xf32>
    "tpu.trace_stop"() : () -> ()
    %68 = tpu.concatenate %0, %67 in 2 : vector<2x64x8xf32>, vector<2x64x8xf32> -> vector<2x64x16xf32>
    %c0_26 = arith.constant 0 : index
    %c0_27 = arith.constant 0 : index
    %c0_28 = arith.constant 0 : index
    %69 = vector.load %arg5[%c0_26, %c0_27, %c0_28] : memref<2x64x16xf32, #tpu.memory_space<vmem>>, vector<2x64x16xf32>
    tpu.vector_store %arg5[%c0_26, %c0_27, %c0_28], %68 {strides = array<i32>} : memref<2x64x16xf32, #tpu.memory_space<vmem>>, vector<2x64x16xf32>,
    return
  }
  func.func @transform_0(%arg0: i32) -> (i32, i32, i32) {
    %c0_i32 = arith.constant 0 : i32
    %c0_i32_0 = arith.constant 0 : i32
    %c0_i32_1 = arith.constant 0 : i32
    %c0_i32_2 = arith.constant 0 : i32
    return %c0_i32, %c0_i32_0, %c0_i32_1 : i32, i32, i32
  }
  func.func @transform_1(%arg0: i32) -> (i32, i32, i32) {
    %c0_i32 = arith.constant 0 : i32
    %c0_i32_0 = arith.constant 0 : i32
    %c0_i32_1 = arith.constant 0 : i32
    %c0_i32_2 = arith.constant 0 : i32
    return %c0_i32, %c0_i32_0, %c0_i32_1 : i32, i32, i32
  }
  func.func @transform_2(%arg0: i32) -> (i32, i32) {
    %c0_i32 = arith.constant 0 : i32
    %c0_i32_0 = arith.constant 0 : i32
    %c0_i32_1 = arith.constant 0 : i32
    return %c0_i32, %c0_i32_0 : i32, i32
  }
  func.func @transform_3(%arg0: i32) -> (i32, i32, i32) {
    %c0_i32 = arith.constant 0 : i32
    %c0_i32_0 = arith.constant 0 : i32
    %c0_i32_1 = arith.constant 0 : i32
    %c0_i32_2 = arith.constant 0 : i32
    return %c0_i32, %c0_i32_0, %c0_i32_1 : i32, i32, i32
  }
  func.func @transform_4(%arg0: i32) -> (i32, i32, i32) {
    %c0_i32 = arith.constant 0 : i32
    %c0_i32_0 = arith.constant 0 : i32
    %c0_i32_1 = arith.constant 0 : i32
    %c0_i32_2 = arith.constant 0 : i32
    return %c0_i32, %c0_i32_0, %c0_i32_1 : i32, i32, i32
  }
  func.func @transform_5(%arg0: i32) -> (i32, i32, i32) {
    %c0_i32 = arith.constant 0 : i32
    %c0_i32_0 = arith.constant 0 : i32
    %c0_i32_1 = arith.constant 0 : i32
    %c0_i32_2 = arith.constant 0 : i32
    return %c0_i32, %c0_i32_0, %c0_i32_1 : i32, i32, i32
  }
}

module attributes {stable_mosaic.version = 11 : i64} {
  func.func @kernel(%arg0: i32, %arg1: memref<16x128xf32, #tpu.memory_space<vmem>>, %arg2: memref<3x128x256xbf16, #tpu.memory_space<vmem>>, %arg3: memref<3x16x16xbf16, #tpu.memory_space<vmem>>, %arg4: memref<256x256xf32, #tpu.memory_space<vmem>>, %arg5: memref<1x256xf32, #tpu.memory_space<vmem>>, %arg6: memref<1x256xf32, #tpu.memory_space<vmem>>, %arg7: memref<2x256x128xf32, #tpu.memory_space<vmem>>, %arg8: memref<16x128xf32, #tpu.memory_space<vmem>>) attributes {dimension_semantics = [#tpu.dimension_semantics<arbitrary>], iteration_bounds = array<i64: 1>, scalar_prefetch = 0 : i64, scratch_operands = 0 : i64, tpu.core_type = #tpu.core_type<tc>, window_params = [{pipeline_mode = #tpu.pipeline_mode<synchronous>, transform_indices = @transform_0, window_bounds = array<i64: 16, 128>}, {pipeline_mode = #tpu.pipeline_mode<synchronous>, transform_indices = @transform_1, window_bounds = array<i64: 3, 128, 256>}, {pipeline_mode = #tpu.pipeline_mode<synchronous>, transform_indices = @transform_2, window_bounds = array<i64: 3, 16, 16>}, {pipeline_mode = #tpu.pipeline_mode<synchronous>, transform_indices = @transform_3, window_bounds = array<i64: 256, 256>}, {pipeline_mode = #tpu.pipeline_mode<synchronous>, transform_indices = @transform_4, window_bounds = array<i64: 1, 256>}, {pipeline_mode = #tpu.pipeline_mode<synchronous>, transform_indices = @transform_5, window_bounds = array<i64: 1, 256>}, {pipeline_mode = #tpu.pipeline_mode<synchronous>, transform_indices = @transform_6, window_bounds = array<i64: 2, 256, 128>}, {pipeline_mode = #tpu.pipeline_mode<synchronous>, transform_indices = @transform_7, window_bounds = array<i64: 16, 128>}]} {
    %c0 = arith.constant 0 : index
    %c0_0 = arith.constant 0 : index
    %0 = vector.load %arg1[%c0, %c0_0] : memref<16x128xf32, #tpu.memory_space<vmem>>, vector<16x128xf32>
    %1 = arith.truncf %0 : vector<16x128xf32> to vector<16x128xbf16>
    %cst = arith.constant 0.000000e+00 : f32
    %2 = vector.broadcast %cst : f32 to vector<16x256xf32>
    %c0_1 = arith.constant 0 : index
    %c0_2 = arith.constant 0 : index
    %c0_3 = arith.constant 0 : index
    %3 = vector.load %arg3[%c0_1, %c0_2, %c0_3] : memref<3x16x16xbf16, #tpu.memory_space<vmem>>, vector<1x16x16xbf16>
    %4 = vector.shape_cast %3 : vector<1x16x16xbf16> to vector<16x16xbf16>
    %cst_4 = arith.constant dense<0.000000e+00> : vector<16x128xf32>
    %5 = tpu.matmul %4, %1, %cst_4 {dimension_numbers = #tpu.dot_dimension_numbers<[1], [0], [0], [1], [0, 0, 1, 1], [], []>} : vector<16x16xbf16>, vector<16x128xbf16>, vector<16x128xf32> -> vector<16x128xf32>
    %6 = arith.truncf %5 : vector<16x128xf32> to vector<16x128xbf16>
    %c0_5 = arith.constant 0 : index
    %c0_6 = arith.constant 0 : index
    %c0_7 = arith.constant 0 : index
    %7 = vector.load %arg2[%c0_5, %c0_6, %c0_7] : memref<3x128x256xbf16, #tpu.memory_space<vmem>>, vector<1x128x256xbf16>
    %8 = vector.shape_cast %7 : vector<1x128x256xbf16> to vector<128x256xbf16>
    %cst_8 = arith.constant dense<0.000000e+00> : vector<16x256xf32>
    %9 = tpu.matmul %6, %8, %cst_8 {dimension_numbers = #tpu.dot_dimension_numbers<[1], [0], [0], [1], [0, 0, 1, 1], [], []>} : vector<16x128xbf16>, vector<128x256xbf16>, vector<16x256xf32> -> vector<16x256xf32>
    %10 = arith.addf %2, %9 : vector<16x256xf32>
    %c1 = arith.constant 1 : index
    %c0_9 = arith.constant 0 : index
    %c0_10 = arith.constant 0 : index
    %11 = vector.load %arg3[%c1, %c0_9, %c0_10] : memref<3x16x16xbf16, #tpu.memory_space<vmem>>, vector<1x16x16xbf16>
    %12 = vector.shape_cast %11 : vector<1x16x16xbf16> to vector<16x16xbf16>
    %cst_11 = arith.constant dense<0.000000e+00> : vector<16x128xf32>
    %13 = tpu.matmul %12, %1, %cst_11 {dimension_numbers = #tpu.dot_dimension_numbers<[1], [0], [0], [1], [0, 0, 1, 1], [], []>} : vector<16x16xbf16>, vector<16x128xbf16>, vector<16x128xf32> -> vector<16x128xf32>
    %14 = arith.truncf %13 : vector<16x128xf32> to vector<16x128xbf16>
    %c1_12 = arith.constant 1 : index
    %c0_13 = arith.constant 0 : index
    %c0_14 = arith.constant 0 : index
    %15 = vector.load %arg2[%c1_12, %c0_13, %c0_14] : memref<3x128x256xbf16, #tpu.memory_space<vmem>>, vector<1x128x256xbf16>
    %16 = vector.shape_cast %15 : vector<1x128x256xbf16> to vector<128x256xbf16>
    %cst_15 = arith.constant dense<0.000000e+00> : vector<16x256xf32>
    %17 = tpu.matmul %14, %16, %cst_15 {dimension_numbers = #tpu.dot_dimension_numbers<[1], [0], [0], [1], [0, 0, 1, 1], [], []>} : vector<16x128xbf16>, vector<128x256xbf16>, vector<16x256xf32> -> vector<16x256xf32>
    %18 = arith.addf %10, %17 : vector<16x256xf32>
    %c2 = arith.constant 2 : index
    %c0_16 = arith.constant 0 : index
    %c0_17 = arith.constant 0 : index
    %19 = vector.load %arg3[%c2, %c0_16, %c0_17] : memref<3x16x16xbf16, #tpu.memory_space<vmem>>, vector<1x16x16xbf16>
    %20 = vector.shape_cast %19 : vector<1x16x16xbf16> to vector<16x16xbf16>
    %cst_18 = arith.constant dense<0.000000e+00> : vector<16x128xf32>
    %21 = tpu.matmul %20, %1, %cst_18 {dimension_numbers = #tpu.dot_dimension_numbers<[1], [0], [0], [1], [0, 0, 1, 1], [], []>} : vector<16x16xbf16>, vector<16x128xbf16>, vector<16x128xf32> -> vector<16x128xf32>
    %22 = arith.truncf %21 : vector<16x128xf32> to vector<16x128xbf16>
    %c2_19 = arith.constant 2 : index
    %c0_20 = arith.constant 0 : index
    %c0_21 = arith.constant 0 : index
    %23 = vector.load %arg2[%c2_19, %c0_20, %c0_21] : memref<3x128x256xbf16, #tpu.memory_space<vmem>>, vector<1x128x256xbf16>
    %24 = vector.shape_cast %23 : vector<1x128x256xbf16> to vector<128x256xbf16>
    %cst_22 = arith.constant dense<0.000000e+00> : vector<16x256xf32>
    %25 = tpu.matmul %22, %24, %cst_22 {dimension_numbers = #tpu.dot_dimension_numbers<[1], [0], [0], [1], [0, 0, 1, 1], [], []>} : vector<16x128xbf16>, vector<128x256xbf16>, vector<16x256xf32> -> vector<16x256xf32>
    %26 = arith.addf %18, %25 : vector<16x256xf32>
    %cst_23 = arith.constant dense<0.000000e+00> : vector<256xf32>
    %27 = vector.multi_reduction <add>, %26, %cst_23 [0] : vector<16x256xf32> to vector<256xf32>
    %28 = vector.shape_cast %27 : vector<256xf32> to vector<1x256xf32>
    %29 = arith.mulf %26, %26 : vector<16x256xf32>
    %cst_24 = arith.constant dense<0.000000e+00> : vector<256xf32>
    %30 = vector.multi_reduction <add>, %29, %cst_24 [0] : vector<16x256xf32> to vector<256xf32>
    %31 = vector.shape_cast %30 : vector<256xf32> to vector<1x256xf32>
    %32 = tpu.concatenate %28, %31 in 0 : vector<1x256xf32>, vector<1x256xf32> -> vector<2x256xf32>
    %c0_25 = arith.constant 0 : index
    %c0_26 = arith.constant 0 : index
    %33 = vector.load %arg4[%c0_25, %c0_26] : memref<256x256xf32, #tpu.memory_space<vmem>>, vector<256x256xf32>
    %cst_27 = arith.constant dense<0.000000e+00> : vector<2x256xf32>
    %34 = tpu.matmul %32, %33, %cst_27 {dimension_numbers = #tpu.dot_dimension_numbers<[1], [0], [0], [1], [0, 0, 1, 1], [], []>} : vector<2x256xf32>, vector<256x256xf32>, vector<2x256xf32> -> vector<2x256xf32>
    %35 = vector.extract_strided_slice %34 {offsets = [0, 0], sizes = [1, 256], strides = [1, 1]} : vector<2x256xf32> to vector<1x256xf32>
    %cst_28 = arith.constant 7.812500e-03 : f32
    %36 = vector.broadcast %cst_28 : f32 to vector<1x256xf32>
    %37 = arith.mulf %35, %36 : vector<1x256xf32>
    %38 = vector.extract_strided_slice %34 {offsets = [1, 0], sizes = [1, 256], strides = [1, 1]} : vector<2x256xf32> to vector<1x256xf32>
    %cst_29 = arith.constant 7.812500e-03 : f32
    %39 = vector.broadcast %cst_29 : f32 to vector<1x256xf32>
    %40 = arith.mulf %38, %39 : vector<1x256xf32>
    %41 = arith.mulf %37, %37 : vector<1x256xf32>
    %42 = arith.subf %40, %41 : vector<1x256xf32>
    %43 = vector.broadcast %37 : vector<1x256xf32> to vector<16x256xf32>
    %44 = arith.subf %26, %43 : vector<16x256xf32>
    %cst_30 = arith.constant 9.99999974E-6 : f32
    %45 = vector.broadcast %cst_30 : f32 to vector<1x256xf32>
    %46 = arith.addf %42, %45 : vector<1x256xf32>
    %47 = math.rsqrt %46 : vector<1x256xf32>
    %48 = vector.broadcast %47 : vector<1x256xf32> to vector<16x256xf32>
    %49 = arith.mulf %44, %48 : vector<16x256xf32>
    %c0_31 = arith.constant 0 : index
    %c0_32 = arith.constant 0 : index
    %50 = vector.load %arg5[%c0_31, %c0_32] : memref<1x256xf32, #tpu.memory_space<vmem>>, vector<1x256xf32>
    %51 = vector.broadcast %50 : vector<1x256xf32> to vector<16x256xf32>
    %52 = arith.mulf %49, %51 : vector<16x256xf32>
    %c0_33 = arith.constant 0 : index
    %c0_34 = arith.constant 0 : index
    %53 = vector.load %arg6[%c0_33, %c0_34] : memref<1x256xf32, #tpu.memory_space<vmem>>, vector<1x256xf32>
    %54 = vector.broadcast %53 : vector<1x256xf32> to vector<16x256xf32>
    %55 = arith.addf %52, %54 : vector<16x256xf32>
    %c0_35 = arith.constant 0 : index
    %c0_36 = arith.constant 0 : index
    %c0_37 = arith.constant 0 : index
    %56 = vector.load %arg7[%c0_35, %c0_36, %c0_37] : memref<2x256x128xf32, #tpu.memory_space<vmem>>, vector<1x256x128xf32>
    %57 = vector.shape_cast %56 : vector<1x256x128xf32> to vector<256x128xf32>
    %cst_38 = arith.constant dense<0.000000e+00> : vector<16x128xf32>
    %58 = tpu.matmul %55, %57, %cst_38 {dimension_numbers = #tpu.dot_dimension_numbers<[1], [0], [0], [1], [0, 0, 1, 1], [], []>} : vector<16x256xf32>, vector<256x128xf32>, vector<16x128xf32> -> vector<16x128xf32>
    %c1_39 = arith.constant 1 : index
    %c0_40 = arith.constant 0 : index
    %c0_41 = arith.constant 0 : index
    %59 = vector.load %arg7[%c1_39, %c0_40, %c0_41] : memref<2x256x128xf32, #tpu.memory_space<vmem>>, vector<1x256x128xf32>
    %60 = vector.shape_cast %59 : vector<1x256x128xf32> to vector<256x128xf32>
    %cst_42 = arith.constant dense<0.000000e+00> : vector<16x128xf32>
    %61 = tpu.matmul %55, %60, %cst_42 {dimension_numbers = #tpu.dot_dimension_numbers<[1], [0], [0], [1], [0, 0, 1, 1], [], []>} : vector<16x256xf32>, vector<256x128xf32>, vector<16x128xf32> -> vector<16x128xf32>
    %62 = arith.negf %61 : vector<16x128xf32>
    %63 = math.exp %62 : vector<16x128xf32>
    %cst_43 = arith.constant 1.000000e+00 : f32
    %64 = vector.broadcast %cst_43 : f32 to vector<16x128xf32>
    %65 = arith.addf %64, %63 : vector<16x128xf32>
    %66 = arith.divf %64, %65 : vector<16x128xf32>
    %67 = arith.mulf %58, %66 : vector<16x128xf32>
    %c0_44 = arith.constant 0 : index
    %c0_45 = arith.constant 0 : index
    %68 = vector.load %arg8[%c0_44, %c0_45] : memref<16x128xf32, #tpu.memory_space<vmem>>, vector<16x128xf32>
    tpu.vector_store %arg8[%c0_44, %c0_45], %67 {strides = array<i32>} : memref<16x128xf32, #tpu.memory_space<vmem>>, vector<16x128xf32>,
    return
  }
  func.func @transform_0(%arg0: i32) -> (i32, i32) {
    %c0_i32 = arith.constant 0 : i32
    %c0_i32_0 = arith.constant 0 : i32
    %c0_i32_1 = arith.constant 0 : i32
    return %c0_i32, %c0_i32_0 : i32, i32
  }
  func.func @transform_1(%arg0: i32) -> (i32, i32, i32) {
    %c0_i32 = arith.constant 0 : i32
    %c0_i32_0 = arith.constant 0 : i32
    %c0_i32_1 = arith.constant 0 : i32
    %c0_i32_2 = arith.constant 0 : i32
    return %c0_i32, %c0_i32_0, %c0_i32_1 : i32, i32, i32
  }
  func.func @transform_2(%arg0: i32) -> (i32, i32, i32) {
    %c0_i32 = arith.constant 0 : i32
    %c0_i32_0 = arith.constant 0 : i32
    %c0_i32_1 = arith.constant 0 : i32
    %c0_i32_2 = arith.constant 0 : i32
    return %c0_i32, %c0_i32_0, %c0_i32_1 : i32, i32, i32
  }
  func.func @transform_3(%arg0: i32) -> (i32, i32) {
    %c0_i32 = arith.constant 0 : i32
    %c0_i32_0 = arith.constant 0 : i32
    %c0_i32_1 = arith.constant 0 : i32
    return %c0_i32, %c0_i32_0 : i32, i32
  }
  func.func @transform_4(%arg0: i32) -> (i32, i32) {
    %c0_i32 = arith.constant 0 : i32
    %c0_i32_0 = arith.constant 0 : i32
    %c0_i32_1 = arith.constant 0 : i32
    return %c0_i32, %c0_i32_0 : i32, i32
  }
  func.func @transform_5(%arg0: i32) -> (i32, i32) {
    %c0_i32 = arith.constant 0 : i32
    %c0_i32_0 = arith.constant 0 : i32
    %c0_i32_1 = arith.constant 0 : i32
    return %c0_i32, %c0_i32_0 : i32, i32
  }
  func.func @transform_6(%arg0: i32) -> (i32, i32, i32) {
    %c0_i32 = arith.constant 0 : i32
    %c0_i32_0 = arith.constant 0 : i32
    %c0_i32_1 = arith.constant 0 : i32
    %c0_i32_2 = arith.constant 0 : i32
    return %c0_i32, %c0_i32_0, %c0_i32_1 : i32, i32, i32
  }
  func.func @transform_7(%arg0: i32) -> (i32, i32) {
    %c0_i32 = arith.constant 0 : i32
    %c0_i32_0 = arith.constant 0 : i32
    %c0_i32_1 = arith.constant 0 : i32
    return %c0_i32, %c0_i32_0 : i32, i32
  }
}

module attributes {stable_mosaic.version = 11 : i64} {
  func.func @kernel(%arg0: i32, %arg1: memref<16x128xf32, #tpu.memory_space<vmem>>, %arg2: memref<3x128x128xbf16, #tpu.memory_space<vmem>>, %arg3: memref<3x16x16xbf16, #tpu.memory_space<vmem>>, %arg4: memref<128x128xf32, #tpu.memory_space<vmem>>, %arg5: memref<1x128xf32, #tpu.memory_space<vmem>>, %arg6: memref<1x128xf32, #tpu.memory_space<vmem>>, %arg7: memref<16x128xf32, #tpu.memory_space<vmem>>, %arg8: memref<16x128xf32, #tpu.memory_space<vmem>>) attributes {dimension_semantics = [#tpu.dimension_semantics<arbitrary>], iteration_bounds = array<i64: 1>, scalar_prefetch = 0 : i64, scratch_operands = 0 : i64, tpu.core_type = #tpu.core_type<tc>, window_params = [{pipeline_mode = #tpu.pipeline_mode<synchronous>, transform_indices = @transform_0, window_bounds = array<i64: 16, 128>}, {pipeline_mode = #tpu.pipeline_mode<synchronous>, transform_indices = @transform_1, window_bounds = array<i64: 3, 128, 128>}, {pipeline_mode = #tpu.pipeline_mode<synchronous>, transform_indices = @transform_2, window_bounds = array<i64: 3, 16, 16>}, {pipeline_mode = #tpu.pipeline_mode<synchronous>, transform_indices = @transform_3, window_bounds = array<i64: 128, 128>}, {pipeline_mode = #tpu.pipeline_mode<synchronous>, transform_indices = @transform_4, window_bounds = array<i64: 1, 128>}, {pipeline_mode = #tpu.pipeline_mode<synchronous>, transform_indices = @transform_5, window_bounds = array<i64: 1, 128>}, {pipeline_mode = #tpu.pipeline_mode<synchronous>, transform_indices = @transform_6, window_bounds = array<i64: 16, 128>}, {pipeline_mode = #tpu.pipeline_mode<synchronous>, transform_indices = @transform_7, window_bounds = array<i64: 16, 128>}]} {
    %c0 = arith.constant 0 : index
    %c0_0 = arith.constant 0 : index
    %0 = vector.load %arg1[%c0, %c0_0] : memref<16x128xf32, #tpu.memory_space<vmem>>, vector<16x128xf32>
    %1 = arith.truncf %0 : vector<16x128xf32> to vector<16x128xbf16>
    %cst = arith.constant 0.000000e+00 : f32
    %2 = vector.broadcast %cst : f32 to vector<16x128xf32>
    %c0_1 = arith.constant 0 : index
    %c0_2 = arith.constant 0 : index
    %c0_3 = arith.constant 0 : index
    %3 = vector.load %arg3[%c0_1, %c0_2, %c0_3] : memref<3x16x16xbf16, #tpu.memory_space<vmem>>, vector<1x16x16xbf16>
    %4 = vector.shape_cast %3 : vector<1x16x16xbf16> to vector<16x16xbf16>
    %cst_4 = arith.constant dense<0.000000e+00> : vector<16x128xf32>
    %5 = tpu.matmul %4, %1, %cst_4 {dimension_numbers = #tpu.dot_dimension_numbers<[1], [0], [0], [1], [0, 0, 1, 1], [], []>} : vector<16x16xbf16>, vector<16x128xbf16>, vector<16x128xf32> -> vector<16x128xf32>
    %6 = arith.truncf %5 : vector<16x128xf32> to vector<16x128xbf16>
    %c0_5 = arith.constant 0 : index
    %c0_6 = arith.constant 0 : index
    %c0_7 = arith.constant 0 : index
    %7 = vector.load %arg2[%c0_5, %c0_6, %c0_7] : memref<3x128x128xbf16, #tpu.memory_space<vmem>>, vector<1x128x128xbf16>
    %8 = vector.shape_cast %7 : vector<1x128x128xbf16> to vector<128x128xbf16>
    %cst_8 = arith.constant dense<0.000000e+00> : vector<16x128xf32>
    %9 = tpu.matmul %6, %8, %cst_8 {dimension_numbers = #tpu.dot_dimension_numbers<[1], [0], [0], [1], [0, 0, 1, 1], [], []>} : vector<16x128xbf16>, vector<128x128xbf16>, vector<16x128xf32> -> vector<16x128xf32>
    %10 = arith.addf %2, %9 : vector<16x128xf32>
    %c1 = arith.constant 1 : index
    %c0_9 = arith.constant 0 : index
    %c0_10 = arith.constant 0 : index
    %11 = vector.load %arg3[%c1, %c0_9, %c0_10] : memref<3x16x16xbf16, #tpu.memory_space<vmem>>, vector<1x16x16xbf16>
    %12 = vector.shape_cast %11 : vector<1x16x16xbf16> to vector<16x16xbf16>
    %cst_11 = arith.constant dense<0.000000e+00> : vector<16x128xf32>
    %13 = tpu.matmul %12, %1, %cst_11 {dimension_numbers = #tpu.dot_dimension_numbers<[1], [0], [0], [1], [0, 0, 1, 1], [], []>} : vector<16x16xbf16>, vector<16x128xbf16>, vector<16x128xf32> -> vector<16x128xf32>
    %14 = arith.truncf %13 : vector<16x128xf32> to vector<16x128xbf16>
    %c1_12 = arith.constant 1 : index
    %c0_13 = arith.constant 0 : index
    %c0_14 = arith.constant 0 : index
    %15 = vector.load %arg2[%c1_12, %c0_13, %c0_14] : memref<3x128x128xbf16, #tpu.memory_space<vmem>>, vector<1x128x128xbf16>
    %16 = vector.shape_cast %15 : vector<1x128x128xbf16> to vector<128x128xbf16>
    %cst_15 = arith.constant dense<0.000000e+00> : vector<16x128xf32>
    %17 = tpu.matmul %14, %16, %cst_15 {dimension_numbers = #tpu.dot_dimension_numbers<[1], [0], [0], [1], [0, 0, 1, 1], [], []>} : vector<16x128xbf16>, vector<128x128xbf16>, vector<16x128xf32> -> vector<16x128xf32>
    %18 = arith.addf %10, %17 : vector<16x128xf32>
    %c2 = arith.constant 2 : index
    %c0_16 = arith.constant 0 : index
    %c0_17 = arith.constant 0 : index
    %19 = vector.load %arg3[%c2, %c0_16, %c0_17] : memref<3x16x16xbf16, #tpu.memory_space<vmem>>, vector<1x16x16xbf16>
    %20 = vector.shape_cast %19 : vector<1x16x16xbf16> to vector<16x16xbf16>
    %cst_18 = arith.constant dense<0.000000e+00> : vector<16x128xf32>
    %21 = tpu.matmul %20, %1, %cst_18 {dimension_numbers = #tpu.dot_dimension_numbers<[1], [0], [0], [1], [0, 0, 1, 1], [], []>} : vector<16x16xbf16>, vector<16x128xbf16>, vector<16x128xf32> -> vector<16x128xf32>
    %22 = arith.truncf %21 : vector<16x128xf32> to vector<16x128xbf16>
    %c2_19 = arith.constant 2 : index
    %c0_20 = arith.constant 0 : index
    %c0_21 = arith.constant 0 : index
    %23 = vector.load %arg2[%c2_19, %c0_20, %c0_21] : memref<3x128x128xbf16, #tpu.memory_space<vmem>>, vector<1x128x128xbf16>
    %24 = vector.shape_cast %23 : vector<1x128x128xbf16> to vector<128x128xbf16>
    %cst_22 = arith.constant dense<0.000000e+00> : vector<16x128xf32>
    %25 = tpu.matmul %22, %24, %cst_22 {dimension_numbers = #tpu.dot_dimension_numbers<[1], [0], [0], [1], [0, 0, 1, 1], [], []>} : vector<16x128xbf16>, vector<128x128xbf16>, vector<16x128xf32> -> vector<16x128xf32>
    %26 = arith.addf %18, %25 : vector<16x128xf32>
    %cst_23 = arith.constant dense<0.000000e+00> : vector<128xf32>
    %27 = vector.multi_reduction <add>, %26, %cst_23 [0] : vector<16x128xf32> to vector<128xf32>
    %28 = vector.shape_cast %27 : vector<128xf32> to vector<1x128xf32>
    %29 = arith.mulf %26, %26 : vector<16x128xf32>
    %cst_24 = arith.constant dense<0.000000e+00> : vector<128xf32>
    %30 = vector.multi_reduction <add>, %29, %cst_24 [0] : vector<16x128xf32> to vector<128xf32>
    %31 = vector.shape_cast %30 : vector<128xf32> to vector<1x128xf32>
    %32 = tpu.concatenate %28, %31 in 0 : vector<1x128xf32>, vector<1x128xf32> -> vector<2x128xf32>
    %c0_25 = arith.constant 0 : index
    %c0_26 = arith.constant 0 : index
    %33 = vector.load %arg4[%c0_25, %c0_26] : memref<128x128xf32, #tpu.memory_space<vmem>>, vector<128x128xf32>
    %cst_27 = arith.constant dense<0.000000e+00> : vector<2x128xf32>
    %34 = tpu.matmul %32, %33, %cst_27 {dimension_numbers = #tpu.dot_dimension_numbers<[1], [0], [0], [1], [0, 0, 1, 1], [], []>} : vector<2x128xf32>, vector<128x128xf32>, vector<2x128xf32> -> vector<2x128xf32>
    %35 = vector.extract_strided_slice %34 {offsets = [0, 0], sizes = [1, 128], strides = [1, 1]} : vector<2x128xf32> to vector<1x128xf32>
    %cst_28 = arith.constant 7.812500e-03 : f32
    %36 = vector.broadcast %cst_28 : f32 to vector<1x128xf32>
    %37 = arith.mulf %35, %36 : vector<1x128xf32>
    %38 = vector.extract_strided_slice %34 {offsets = [1, 0], sizes = [1, 128], strides = [1, 1]} : vector<2x128xf32> to vector<1x128xf32>
    %cst_29 = arith.constant 7.812500e-03 : f32
    %39 = vector.broadcast %cst_29 : f32 to vector<1x128xf32>
    %40 = arith.mulf %38, %39 : vector<1x128xf32>
    %41 = arith.mulf %37, %37 : vector<1x128xf32>
    %42 = arith.subf %40, %41 : vector<1x128xf32>
    %43 = vector.broadcast %37 : vector<1x128xf32> to vector<16x128xf32>
    %44 = arith.subf %26, %43 : vector<16x128xf32>
    %cst_30 = arith.constant 9.99999974E-6 : f32
    %45 = vector.broadcast %cst_30 : f32 to vector<1x128xf32>
    %46 = arith.addf %42, %45 : vector<1x128xf32>
    %47 = math.rsqrt %46 : vector<1x128xf32>
    %48 = vector.broadcast %47 : vector<1x128xf32> to vector<16x128xf32>
    %49 = arith.mulf %44, %48 : vector<16x128xf32>
    %c0_31 = arith.constant 0 : index
    %c0_32 = arith.constant 0 : index
    %50 = vector.load %arg5[%c0_31, %c0_32] : memref<1x128xf32, #tpu.memory_space<vmem>>, vector<1x128xf32>
    %51 = vector.broadcast %50 : vector<1x128xf32> to vector<16x128xf32>
    %52 = arith.mulf %49, %51 : vector<16x128xf32>
    %c0_33 = arith.constant 0 : index
    %c0_34 = arith.constant 0 : index
    %53 = vector.load %arg6[%c0_33, %c0_34] : memref<1x128xf32, #tpu.memory_space<vmem>>, vector<1x128xf32>
    %54 = vector.broadcast %53 : vector<1x128xf32> to vector<16x128xf32>
    %55 = arith.addf %52, %54 : vector<16x128xf32>
    %c0_35 = arith.constant 0 : index
    %c0_36 = arith.constant 0 : index
    %56 = vector.load %arg7[%c0_35, %c0_36] : memref<16x128xf32, #tpu.memory_space<vmem>>, vector<16x128xf32>
    %57 = arith.addf %55, %56 : vector<16x128xf32>
    %c0_37 = arith.constant 0 : index
    %c0_38 = arith.constant 0 : index
    %58 = vector.load %arg8[%c0_37, %c0_38] : memref<16x128xf32, #tpu.memory_space<vmem>>, vector<16x128xf32>
    tpu.vector_store %arg8[%c0_37, %c0_38], %57 {strides = array<i32>} : memref<16x128xf32, #tpu.memory_space<vmem>>, vector<16x128xf32>,
    return
  }
  func.func @transform_0(%arg0: i32) -> (i32, i32) {
    %c0_i32 = arith.constant 0 : i32
    %c0_i32_0 = arith.constant 0 : i32
    %c0_i32_1 = arith.constant 0 : i32
    return %c0_i32, %c0_i32_0 : i32, i32
  }
  func.func @transform_1(%arg0: i32) -> (i32, i32, i32) {
    %c0_i32 = arith.constant 0 : i32
    %c0_i32_0 = arith.constant 0 : i32
    %c0_i32_1 = arith.constant 0 : i32
    %c0_i32_2 = arith.constant 0 : i32
    return %c0_i32, %c0_i32_0, %c0_i32_1 : i32, i32, i32
  }
  func.func @transform_2(%arg0: i32) -> (i32, i32, i32) {
    %c0_i32 = arith.constant 0 : i32
    %c0_i32_0 = arith.constant 0 : i32
    %c0_i32_1 = arith.constant 0 : i32
    %c0_i32_2 = arith.constant 0 : i32
    return %c0_i32, %c0_i32_0, %c0_i32_1 : i32, i32, i32
  }
  func.func @transform_3(%arg0: i32) -> (i32, i32) {
    %c0_i32 = arith.constant 0 : i32
    %c0_i32_0 = arith.constant 0 : i32
    %c0_i32_1 = arith.constant 0 : i32
    return %c0_i32, %c0_i32_0 : i32, i32
  }
  func.func @transform_4(%arg0: i32) -> (i32, i32) {
    %c0_i32 = arith.constant 0 : i32
    %c0_i32_0 = arith.constant 0 : i32
    %c0_i32_1 = arith.constant 0 : i32
    return %c0_i32, %c0_i32_0 : i32, i32
  }
  func.func @transform_5(%arg0: i32) -> (i32, i32) {
    %c0_i32 = arith.constant 0 : i32
    %c0_i32_0 = arith.constant 0 : i32
    %c0_i32_1 = arith.constant 0 : i32
    return %c0_i32, %c0_i32_0 : i32, i32
  }
  func.func @transform_6(%arg0: i32) -> (i32, i32) {
    %c0_i32 = arith.constant 0 : i32
    %c0_i32_0 = arith.constant 0 : i32
    %c0_i32_1 = arith.constant 0 : i32
    return %c0_i32, %c0_i32_0 : i32, i32
  }
  func.func @transform_7(%arg0: i32) -> (i32, i32) {
    %c0_i32 = arith.constant 0 : i32
    %c0_i32_0 = arith.constant 0 : i32
    %c0_i32_1 = arith.constant 0 : i32
    return %c0_i32, %c0_i32_0 : i32, i32
  }
}

module attributes {stable_mosaic.version = 11 : i64} {
  func.func @kernel(%arg0: i32, %arg1: memref<16x128xf32, #tpu.memory_space<vmem>>, %arg2: memref<3x128x256xbf16, #tpu.memory_space<vmem>>, %arg3: memref<3x32x16xbf16, #tpu.memory_space<vmem>>, %arg4: memref<256x256xf32, #tpu.memory_space<vmem>>, %arg5: memref<1x256xf32, #tpu.memory_space<vmem>>, %arg6: memref<1x256xf32, #tpu.memory_space<vmem>>, %arg7: memref<2x256x128xf32, #tpu.memory_space<vmem>>, %arg8: memref<32x128xf32, #tpu.memory_space<vmem>>) attributes {dimension_semantics = [#tpu.dimension_semantics<arbitrary>], iteration_bounds = array<i64: 1>, scalar_prefetch = 0 : i64, scratch_operands = 0 : i64, tpu.core_type = #tpu.core_type<tc>, window_params = [{pipeline_mode = #tpu.pipeline_mode<synchronous>, transform_indices = @transform_0, window_bounds = array<i64: 16, 128>}, {pipeline_mode = #tpu.pipeline_mode<synchronous>, transform_indices = @transform_1, window_bounds = array<i64: 3, 128, 256>}, {pipeline_mode = #tpu.pipeline_mode<synchronous>, transform_indices = @transform_2, window_bounds = array<i64: 3, 32, 16>}, {pipeline_mode = #tpu.pipeline_mode<synchronous>, transform_indices = @transform_3, window_bounds = array<i64: 256, 256>}, {pipeline_mode = #tpu.pipeline_mode<synchronous>, transform_indices = @transform_4, window_bounds = array<i64: 1, 256>}, {pipeline_mode = #tpu.pipeline_mode<synchronous>, transform_indices = @transform_5, window_bounds = array<i64: 1, 256>}, {pipeline_mode = #tpu.pipeline_mode<synchronous>, transform_indices = @transform_6, window_bounds = array<i64: 2, 256, 128>}, {pipeline_mode = #tpu.pipeline_mode<synchronous>, transform_indices = @transform_7, window_bounds = array<i64: 32, 128>}]} {
    %c0 = arith.constant 0 : index
    %c0_0 = arith.constant 0 : index
    %0 = vector.load %arg1[%c0, %c0_0] : memref<16x128xf32, #tpu.memory_space<vmem>>, vector<16x128xf32>
    %1 = arith.truncf %0 : vector<16x128xf32> to vector<16x128xbf16>
    %cst = arith.constant 0.000000e+00 : f32
    %2 = vector.broadcast %cst : f32 to vector<32x256xf32>
    %c0_1 = arith.constant 0 : index
    %c0_2 = arith.constant 0 : index
    %c0_3 = arith.constant 0 : index
    %3 = vector.load %arg3[%c0_1, %c0_2, %c0_3] : memref<3x32x16xbf16, #tpu.memory_space<vmem>>, vector<1x32x16xbf16>
    %4 = vector.shape_cast %3 : vector<1x32x16xbf16> to vector<32x16xbf16>
    %cst_4 = arith.constant dense<0.000000e+00> : vector<32x128xf32>
    %5 = tpu.matmul %4, %1, %cst_4 {dimension_numbers = #tpu.dot_dimension_numbers<[1], [0], [0], [1], [0, 0, 1, 1], [], []>} : vector<32x16xbf16>, vector<16x128xbf16>, vector<32x128xf32> -> vector<32x128xf32>
    %6 = arith.truncf %5 : vector<32x128xf32> to vector<32x128xbf16>
    %c0_5 = arith.constant 0 : index
    %c0_6 = arith.constant 0 : index
    %c0_7 = arith.constant 0 : index
    %7 = vector.load %arg2[%c0_5, %c0_6, %c0_7] : memref<3x128x256xbf16, #tpu.memory_space<vmem>>, vector<1x128x256xbf16>
    %8 = vector.shape_cast %7 : vector<1x128x256xbf16> to vector<128x256xbf16>
    %cst_8 = arith.constant dense<0.000000e+00> : vector<32x256xf32>
    %9 = tpu.matmul %6, %8, %cst_8 {dimension_numbers = #tpu.dot_dimension_numbers<[1], [0], [0], [1], [0, 0, 1, 1], [], []>} : vector<32x128xbf16>, vector<128x256xbf16>, vector<32x256xf32> -> vector<32x256xf32>
    %10 = arith.addf %2, %9 : vector<32x256xf32>
    %c1 = arith.constant 1 : index
    %c0_9 = arith.constant 0 : index
    %c0_10 = arith.constant 0 : index
    %11 = vector.load %arg3[%c1, %c0_9, %c0_10] : memref<3x32x16xbf16, #tpu.memory_space<vmem>>, vector<1x32x16xbf16>
    %12 = vector.shape_cast %11 : vector<1x32x16xbf16> to vector<32x16xbf16>
    %cst_11 = arith.constant dense<0.000000e+00> : vector<32x128xf32>
    %13 = tpu.matmul %12, %1, %cst_11 {dimension_numbers = #tpu.dot_dimension_numbers<[1], [0], [0], [1], [0, 0, 1, 1], [], []>} : vector<32x16xbf16>, vector<16x128xbf16>, vector<32x128xf32> -> vector<32x128xf32>
    %14 = arith.truncf %13 : vector<32x128xf32> to vector<32x128xbf16>
    %c1_12 = arith.constant 1 : index
    %c0_13 = arith.constant 0 : index
    %c0_14 = arith.constant 0 : index
    %15 = vector.load %arg2[%c1_12, %c0_13, %c0_14] : memref<3x128x256xbf16, #tpu.memory_space<vmem>>, vector<1x128x256xbf16>
    %16 = vector.shape_cast %15 : vector<1x128x256xbf16> to vector<128x256xbf16>
    %cst_15 = arith.constant dense<0.000000e+00> : vector<32x256xf32>
    %17 = tpu.matmul %14, %16, %cst_15 {dimension_numbers = #tpu.dot_dimension_numbers<[1], [0], [0], [1], [0, 0, 1, 1], [], []>} : vector<32x128xbf16>, vector<128x256xbf16>, vector<32x256xf32> -> vector<32x256xf32>
    %18 = arith.addf %10, %17 : vector<32x256xf32>
    %c2 = arith.constant 2 : index
    %c0_16 = arith.constant 0 : index
    %c0_17 = arith.constant 0 : index
    %19 = vector.load %arg3[%c2, %c0_16, %c0_17] : memref<3x32x16xbf16, #tpu.memory_space<vmem>>, vector<1x32x16xbf16>
    %20 = vector.shape_cast %19 : vector<1x32x16xbf16> to vector<32x16xbf16>
    %cst_18 = arith.constant dense<0.000000e+00> : vector<32x128xf32>
    %21 = tpu.matmul %20, %1, %cst_18 {dimension_numbers = #tpu.dot_dimension_numbers<[1], [0], [0], [1], [0, 0, 1, 1], [], []>} : vector<32x16xbf16>, vector<16x128xbf16>, vector<32x128xf32> -> vector<32x128xf32>
    %22 = arith.truncf %21 : vector<32x128xf32> to vector<32x128xbf16>
    %c2_19 = arith.constant 2 : index
    %c0_20 = arith.constant 0 : index
    %c0_21 = arith.constant 0 : index
    %23 = vector.load %arg2[%c2_19, %c0_20, %c0_21] : memref<3x128x256xbf16, #tpu.memory_space<vmem>>, vector<1x128x256xbf16>
    %24 = vector.shape_cast %23 : vector<1x128x256xbf16> to vector<128x256xbf16>
    %cst_22 = arith.constant dense<0.000000e+00> : vector<32x256xf32>
    %25 = tpu.matmul %22, %24, %cst_22 {dimension_numbers = #tpu.dot_dimension_numbers<[1], [0], [0], [1], [0, 0, 1, 1], [], []>} : vector<32x128xbf16>, vector<128x256xbf16>, vector<32x256xf32> -> vector<32x256xf32>
    %26 = arith.addf %18, %25 : vector<32x256xf32>
    %cst_23 = arith.constant dense<0.000000e+00> : vector<256xf32>
    %27 = vector.multi_reduction <add>, %26, %cst_23 [0] : vector<32x256xf32> to vector<256xf32>
    %28 = vector.shape_cast %27 : vector<256xf32> to vector<1x256xf32>
    %29 = arith.mulf %26, %26 : vector<32x256xf32>
    %cst_24 = arith.constant dense<0.000000e+00> : vector<256xf32>
    %30 = vector.multi_reduction <add>, %29, %cst_24 [0] : vector<32x256xf32> to vector<256xf32>
    %31 = vector.shape_cast %30 : vector<256xf32> to vector<1x256xf32>
    %32 = tpu.concatenate %28, %31 in 0 : vector<1x256xf32>, vector<1x256xf32> -> vector<2x256xf32>
    %c0_25 = arith.constant 0 : index
    %c0_26 = arith.constant 0 : index
    %33 = vector.load %arg4[%c0_25, %c0_26] : memref<256x256xf32, #tpu.memory_space<vmem>>, vector<256x256xf32>
    %cst_27 = arith.constant dense<0.000000e+00> : vector<2x256xf32>
    %34 = tpu.matmul %32, %33, %cst_27 {dimension_numbers = #tpu.dot_dimension_numbers<[1], [0], [0], [1], [0, 0, 1, 1], [], []>} : vector<2x256xf32>, vector<256x256xf32>, vector<2x256xf32> -> vector<2x256xf32>
    %35 = vector.extract_strided_slice %34 {offsets = [0, 0], sizes = [1, 256], strides = [1, 1]} : vector<2x256xf32> to vector<1x256xf32>
    %cst_28 = arith.constant 0.001953125 : f32
    %36 = vector.broadcast %cst_28 : f32 to vector<1x256xf32>
    %37 = arith.mulf %35, %36 : vector<1x256xf32>
    %38 = vector.extract_strided_slice %34 {offsets = [1, 0], sizes = [1, 256], strides = [1, 1]} : vector<2x256xf32> to vector<1x256xf32>
    %cst_29 = arith.constant 0.001953125 : f32
    %39 = vector.broadcast %cst_29 : f32 to vector<1x256xf32>
    %40 = arith.mulf %38, %39 : vector<1x256xf32>
    %41 = arith.mulf %37, %37 : vector<1x256xf32>
    %42 = arith.subf %40, %41 : vector<1x256xf32>
    %43 = vector.broadcast %37 : vector<1x256xf32> to vector<32x256xf32>
    %44 = arith.subf %26, %43 : vector<32x256xf32>
    %cst_30 = arith.constant 9.99999974E-6 : f32
    %45 = vector.broadcast %cst_30 : f32 to vector<1x256xf32>
    %46 = arith.addf %42, %45 : vector<1x256xf32>
    %47 = math.rsqrt %46 : vector<1x256xf32>
    %48 = vector.broadcast %47 : vector<1x256xf32> to vector<32x256xf32>
    %49 = arith.mulf %44, %48 : vector<32x256xf32>
    %c0_31 = arith.constant 0 : index
    %c0_32 = arith.constant 0 : index
    %50 = vector.load %arg5[%c0_31, %c0_32] : memref<1x256xf32, #tpu.memory_space<vmem>>, vector<1x256xf32>
    %51 = vector.broadcast %50 : vector<1x256xf32> to vector<32x256xf32>
    %52 = arith.mulf %49, %51 : vector<32x256xf32>
    %c0_33 = arith.constant 0 : index
    %c0_34 = arith.constant 0 : index
    %53 = vector.load %arg6[%c0_33, %c0_34] : memref<1x256xf32, #tpu.memory_space<vmem>>, vector<1x256xf32>
    %54 = vector.broadcast %53 : vector<1x256xf32> to vector<32x256xf32>
    %55 = arith.addf %52, %54 : vector<32x256xf32>
    %c0_35 = arith.constant 0 : index
    %c0_36 = arith.constant 0 : index
    %c0_37 = arith.constant 0 : index
    %56 = vector.load %arg7[%c0_35, %c0_36, %c0_37] : memref<2x256x128xf32, #tpu.memory_space<vmem>>, vector<1x256x128xf32>
    %57 = vector.shape_cast %56 : vector<1x256x128xf32> to vector<256x128xf32>
    %cst_38 = arith.constant dense<0.000000e+00> : vector<32x128xf32>
    %58 = tpu.matmul %55, %57, %cst_38 {dimension_numbers = #tpu.dot_dimension_numbers<[1], [0], [0], [1], [0, 0, 1, 1], [], []>} : vector<32x256xf32>, vector<256x128xf32>, vector<32x128xf32> -> vector<32x128xf32>
    %c1_39 = arith.constant 1 : index
    %c0_40 = arith.constant 0 : index
    %c0_41 = arith.constant 0 : index
    %59 = vector.load %arg7[%c1_39, %c0_40, %c0_41] : memref<2x256x128xf32, #tpu.memory_space<vmem>>, vector<1x256x128xf32>
    %60 = vector.shape_cast %59 : vector<1x256x128xf32> to vector<256x128xf32>
    %cst_42 = arith.constant dense<0.000000e+00> : vector<32x128xf32>
    %61 = tpu.matmul %55, %60, %cst_42 {dimension_numbers = #tpu.dot_dimension_numbers<[1], [0], [0], [1], [0, 0, 1, 1], [], []>} : vector<32x256xf32>, vector<256x128xf32>, vector<32x128xf32> -> vector<32x128xf32>
    %62 = arith.negf %61 : vector<32x128xf32>
    %63 = math.exp %62 : vector<32x128xf32>
    %cst_43 = arith.constant 1.000000e+00 : f32
    %64 = vector.broadcast %cst_43 : f32 to vector<32x128xf32>
    %65 = arith.addf %64, %63 : vector<32x128xf32>
    %66 = arith.divf %64, %65 : vector<32x128xf32>
    %67 = arith.mulf %58, %66 : vector<32x128xf32>
    %c0_44 = arith.constant 0 : index
    %c0_45 = arith.constant 0 : index
    %68 = vector.load %arg8[%c0_44, %c0_45] : memref<32x128xf32, #tpu.memory_space<vmem>>, vector<32x128xf32>
    tpu.vector_store %arg8[%c0_44, %c0_45], %67 {strides = array<i32>} : memref<32x128xf32, #tpu.memory_space<vmem>>, vector<32x128xf32>,
    return
  }
  func.func @transform_0(%arg0: i32) -> (i32, i32) {
    %c0_i32 = arith.constant 0 : i32
    %c0_i32_0 = arith.constant 0 : i32
    %c0_i32_1 = arith.constant 0 : i32
    return %c0_i32, %c0_i32_0 : i32, i32
  }
  func.func @transform_1(%arg0: i32) -> (i32, i32, i32) {
    %c0_i32 = arith.constant 0 : i32
    %c0_i32_0 = arith.constant 0 : i32
    %c0_i32_1 = arith.constant 0 : i32
    %c0_i32_2 = arith.constant 0 : i32
    return %c0_i32, %c0_i32_0, %c0_i32_1 : i32, i32, i32
  }
  func.func @transform_2(%arg0: i32) -> (i32, i32, i32) {
    %c0_i32 = arith.constant 0 : i32
    %c0_i32_0 = arith.constant 0 : i32
    %c0_i32_1 = arith.constant 0 : i32
    %c0_i32_2 = arith.constant 0 : i32
    return %c0_i32, %c0_i32_0, %c0_i32_1 : i32, i32, i32
  }
  func.func @transform_3(%arg0: i32) -> (i32, i32) {
    %c0_i32 = arith.constant 0 : i32
    %c0_i32_0 = arith.constant 0 : i32
    %c0_i32_1 = arith.constant 0 : i32
    return %c0_i32, %c0_i32_0 : i32, i32
  }
  func.func @transform_4(%arg0: i32) -> (i32, i32) {
    %c0_i32 = arith.constant 0 : i32
    %c0_i32_0 = arith.constant 0 : i32
    %c0_i32_1 = arith.constant 0 : i32
    return %c0_i32, %c0_i32_0 : i32, i32
  }
  func.func @transform_5(%arg0: i32) -> (i32, i32) {
    %c0_i32 = arith.constant 0 : i32
    %c0_i32_0 = arith.constant 0 : i32
    %c0_i32_1 = arith.constant 0 : i32
    return %c0_i32, %c0_i32_0 : i32, i32
  }
  func.func @transform_6(%arg0: i32) -> (i32, i32, i32) {
    %c0_i32 = arith.constant 0 : i32
    %c0_i32_0 = arith.constant 0 : i32
    %c0_i32_1 = arith.constant 0 : i32
    %c0_i32_2 = arith.constant 0 : i32
    return %c0_i32, %c0_i32_0, %c0_i32_1 : i32, i32, i32
  }
  func.func @transform_7(%arg0: i32) -> (i32, i32) {
    %c0_i32 = arith.constant 0 : i32
    %c0_i32_0 = arith.constant 0 : i32
    %c0_i32_1 = arith.constant 0 : i32
    return %c0_i32, %c0_i32_0 : i32, i32
  }
}

</mosaic_0001>

<bundles_post_ra>
// kernel: next_stage_generator.6
= control target key start
LH: loop header
LB: loop body
LE: loop exit
PB: predicated region body
PF: predicated region fallthrough
CT: control target
= control target key end

     0   :  { %vm51_vm0 = vcmask 1042432   ;;  %v793_v0 = vmov 0.0   ;;  %vm794_vm1 = vmmov 0   ;;  %vm47_vm2 = vcmask 48128   ;;  %s1096_s1 = inlined_call_operand.vmem [shape: bf16[2,6,5], index: 1, kind: input, shape index: {}]   ;;  %s1097_s2 = inlined_call_operand.vmem [shape: bf16[8,6], index: 2, kind: input, shape index: {}]   ;;  %s1098_s0 = inlined_call_operand.vmem [shape: f32[2,64,8], index: 0, kind: input, shape index: {}]   ;;  %s1099_s3 = inlined_call_operand.vmem [shape: f32[2,5,1], index: 3, kind: input, shape index: {}]   ;;  %s1100_s5 = inlined_call_operand.vmem [shape: f32[2,5,64], index: 5, kind: output, shape index: {1}]   ;;  %s1101_s4 = inlined_call_operand.vmem [shape: f32[2,64,16], index: 4, kind: output, shape index: {0}]  }
   0x1   :  { %721 = vmatprep.subr.bf16.mxu0 %v793_v0  ;;  %v44_v1 = vld [vmem:[%s1096_s1] sm:$0x7]  ;;  %727 = vmatprep.subr.bf16.mxu1 %v793_v0  ;;  %v45_v2 = vld [vmem:[%s1096_s1 + $0x4] sm:$0x7]  ;;  %v843_v6 = vld [vmem:[%s1098_s0 + $0x8] sm:$0xff]  ;;  %vm156_vm3 = vcmask 64512   ;;  %v283_v57 = vlaneseq }
   0x2   :  { %v53_v3 = vsel %vm51_vm0, %v44_v1, 0  ;;  %v96_v4 = vsel %vm51_vm0, %v45_v2, 0  ;;  %723 = vmatprep.mubr.msk.bf16.mxu0 %vm794_vm1, %v793_v0  ;;  %729 = vmatprep.mubr.msk.bf16.mxu1 %vm794_vm1, %v793_v0  ;;  %v838_v5 = vld [vmem:[%s1098_s0] sm:$0xff]  ;;  %v856_v9 = vld [vmem:[%s1098_s0 + $0x48] sm:$0xff]  ;;  %v869_v14 = vld [vmem:[%s1098_s0 + $0x10] sm:$0xff]  ;;  %v795_v38 = vmov 0  }
   0x3   :  { %v848_v7 = vld [vmem:[%s1098_s0 + $0x40] sm:$0xff]  ;;  %722 = vmatpush3.bf16.msra.mxu0 %v53_v3  ;;  %728 = vmatpush3.bf16.msra.mxu1 %v96_v4  ;;  %v36_v10 = vpack.c.bf16 %v843_v6, %v838_v5  ;;  %v874_v15 = vld [vmem:[%s1098_s0 + $0x18] sm:$0xff]  ;;  %v879_v16 = vld [vmem:[%s1098_s0 + $0x50] sm:$0xff]  ;;  %vm403_vm6 = vcmask 39936   ;;  %v284_v59 = vand.u32 127, %v283_v57  ;;  %vm344_vm12 = vcmask 520192  }
   0x4   :  { %v46_v8 = vld [vmem:[%s1097_s2] sm:$0xf]  ;;  %733 = vmatprep.subr.bf16.mxu0 %v793_v0  ;;  %745 = vmatprep.subr.bf16.mxu1 %v793_v0  ;;  %v40_v11 = vpack.c.bf16 %v856_v9, %v848_v7  ;;  %v884_v17 = vld [vmem:[%s1098_s0 + $0x58] sm:$0xff]  ;;  %v37_v18 = vpack.c.bf16 %v874_v15, %v869_v14  ;;  %v900_v23 = vld [vmem:[%s1098_s0 + $0x28] sm:$0xff] }
   0x5   :  { %v161_v12 = vsel %vm156_vm3, %v36_v10, 0  ;;  %v41_v19 = vpack.c.bf16 %v884_v17, %v879_v16  ;;  %v895_v22 = vld [vmem:[%s1098_s0 + $0x20] sm:$0xff]  ;;  %v910_v25 = vld [vmem:[%s1098_s0 + $0x68] sm:$0xff]  ;;  %v921_v30 = vld [vmem:[%s1098_s0 + $0x30] sm:$0xff]  ;;  %783 = vset.pattern.permute.xlu1 %v795_v38  ;;  %v285_v60 = vadd.s32 64, %v284_v59  ;;  %v290_v61 = vand.u32 1, %v284_v59 }
   0x6   :  { %724 = vmatmul.mubr.msk.bf16.vlgmr.msra.gmra.mrb[0].mxu0 %vm47_vm2, %v46_v8  ;;  %730 = vmatmul.mubr.msk.bf16.vlgmr.msra.gmra.mrb[0].mxu1 %vm47_vm2, %v46_v8  ;;  %v232_v13 = vsel %vm156_vm3, %v40_v11, 0  ;;  %v164_v20 = vsel %vm156_vm3, %v37_v18, 0  ;;  %v905_v24 = vld [vmem:[%s1098_s0 + $0x60] sm:$0xff]  ;;  %v38_v26 = vpack.c.bf16 %v900_v23, %v895_v22  ;;  %v926_v31 = vld [vmem:[%s1098_s0 + $0x38] sm:$0xff]  ;;  %v934_v34 = vld [vmem:[%s1098_s0 + $0x70] sm:$0xff]  ;;  %vm660_vm2 = vcmask 130048  }
   0x7   :  { %741 = vmatprep.mubr.msk.bf16.mxu0 %vm794_vm1, %v793_v0  ;;  %753 = vmatprep.mubr.msk.bf16.mxu1 %vm794_vm1, %v793_v0  ;;  %v235_v21 = vsel %vm156_vm3, %v41_v19, 0  ;;  %v42_v27 = vpack.c.bf16 %v910_v25, %v905_v24  ;;  %v39_v32 = vpack.c.bf16 %v926_v31, %v921_v30  ;;  %v939_v35 = vld [vmem:[%s1098_s0 + $0x78] sm:$0xff]  ;;  %v310_v39 = vld [vmem:[%s1099_s3] sm:$0x1f]  ;;  %v311_v40 = vld [vmem:[%s1099_s3 + $0x8] sm:$0x1f] }
   0x8   :  { %v167_v28 = vsel %vm156_vm3, %v38_v26, 0  ;;  %v43_v36 = vpack.c.bf16 %v939_v35, %v934_v34  ;;  %vm314_vm4 = vcmp.gt.f32.partialorder %v310_v39, 0.5  ;;  %vm330_vm5 = vcmp.gt.f32.partialorder %v311_v40, 0.5 }
   0x9   :  { %v238_v29 = vsel %vm156_vm3, %v42_v27, 0  ;;  %v170_v33 = vsel %vm156_vm3, %v39_v32, 0  ;;  %v319_v41 = vsel %vm314_vm4, 1, %v795_v38  ;;  %v335_v42 = vsel %vm330_vm5, 1, %v795_v38 }
   0xa   :  { %v241_v37 = vsel %vm156_vm3, %v43_v36, 0  ;;  %321 = vperm.xlu1 %783, %v319_v41   ;;  %v297_v63 = vand.u32 1, %v285_v60  ;;  %vm312_vm8 = vcmp.eq.s32.totalorder %v290_v61, 0  ;;  %vm328_vm9 = vcmp.eq.s32.totalorder %v290_v61, 1 }
   0xc   :  { %734 = vmatpush3.bf16.xpose.msra.mxu0 %v161_v12  ;;  %746 = vmatpush3.bf16.xpose.msra.mxu1 %v232_v13  ;;  %vm313_vm14 = vcmp.eq.s32.totalorder %v297_v63, 0  ;;  %vm329_vm15 = vcmp.eq.s32.totalorder %v297_v63, 1 }
   0xd   :  { %735 = vmatprep.subr.bf16.mxu0 %v793_v0  ;;  %747 = vmatprep.subr.bf16.mxu1 %v793_v0 }
   0xe   :  { %337 = vperm.xlu1 %783, %v335_v42  }
  0x14   :  { %736 = vmatpush3.bf16.xpose.msra.mxu0 %v164_v20  ;;  %748 = vmatpush3.bf16.xpose.msra.mxu1 %v235_v21 }
  0x15   :  { %737 = vmatprep.subr.bf16.mxu0 %v793_v0  ;;  %749 = vmatprep.subr.bf16.mxu1 %v793_v0 }
  0x1c   :  { %738 = vmatpush3.bf16.xpose.msra.mxu0 %v167_v28  ;;  %750 = vmatpush3.bf16.xpose.msra.mxu1 %v238_v29 }
  0x1d   :  { %739 = vmatprep.subr.bf16.mxu0 %v793_v0  ;;  %751 = vmatprep.subr.bf16.mxu1 %v793_v0 }
  0x24   :  { %740 = vmatpush3.bf16.xpose.msra.mxu0 %v170_v33  ;;  %752 = vmatpush3.bf16.xpose.msra.mxu1 %v241_v37 }
  0x89   :  { %v322_v58 = vpop.permute.xlu1 %321 }
  0x8a   :  { %vm323_vm7 = vcmp.eq.s32.totalorder %v322_v58, 1 }
  0x8b   :  { %vm324_vm11 = vmand %vm312_vm8, %vm323_vm7 }
  0x8c   :  { %vm325_vm0 = vmand %vm313_vm14, %vm323_vm7 }
  0x8d   :  { %v338_v62 = vpop.permute.xlu1 %337 }
  0x8e   :  { %vm339_vm10 = vcmp.eq.s32.totalorder %v338_v62, 1 }
  0x8f   :  { %vm340_vm13 = vmand %vm328_vm9, %vm339_vm10 }
  0x90   :  { %vm341_vm1 = vmand %vm329_vm15, %vm339_vm10 }
  0xd9   :  { %v89_v43 = vpop.f32.mrb[0].mxu0  ;;  %v132_v44 = vpop.f32.mrb[0].mxu1 }
  0xda   :  { %v138_v45 = vpack.c.bf16 %v89_v43, %v89_v43  ;;  %v725_v46 = vpop.f32.mrb[1].mxu0  ;;  %v139_v47 = vpack.c.bf16 %v132_v44, %v132_v44  ;;  %v731_v48 = vpop.f32.mrb[1].mxu1 }
  0xdb   :  { %v92_v49 = vpop.f32.mrb[2].mxu0  ;;  %v135_v50 = vpop.f32.mrb[2].mxu1 }
  0xdc   :  { %140 = vxpose.xlu0.c.b16.start.end [1/1] (short) (narrow) %v138_v45, 16  ;;  %v726_v51 = vpop.f32.mrb[3].mxu0  ;;  %777 = vmatprep.subr.msk.bf16.mxu0 %vm403_vm6, %v138_v45  ;;  %v732_v52 = vpop.f32.mrb[3].mxu1  ;;  %v417_v54 = vsel %vm403_vm6, %v138_v45, 0  ;;  %v513_v56 = vsel %vm403_vm6, %v139_v47, 0 }
  0xdd   :  { %778 = vmatprep.subr.msk.bf16.mxu1 %vm403_vm6, %v139_v47 }
  0xe0   :  { %212 = vxpose.xlu0.c.b16.start.end [1/1] (short) (narrow) %v139_v47, 16 }
 0x142   :  { %v148_v53 = vpop.trf.xlu0 }
 0x143   :  { %742 = vmatmul.mubr.msk.bf16.vlgmr.msra.gmra.mrb[4].mxu0 %vm156_vm3, %v148_v53 }
 0x144   :  { %758 = vmatpush3.bf16.xpose.msra.mxu0 %v417_v54 }
 0x146   :  { %v220_v55 = vpop.trf.xlu0 }
 0x147   :  { %754 = vmatmul.mubr.msk.bf16.vlgmr.msra.gmra.mrb[4].mxu1 %vm156_vm3, %v220_v55 }
 0x148   :  { %768 = vmatpush3.bf16.xpose.msra.mxu1 %v513_v56 }
 0x216   :  { %v206_v0 = vpop.f32.mrb[4].mxu0 }
 0x217   :  { %v326_v1 = vsel %vm324_vm11, -1e+30, %v206_v0  ;;  %v743_v2 = vpop.f32.mrb[5].mxu0 }
 0x218   :  { %v342_v3 = vsel %vm340_vm13, -1e+30, %v326_v1  ;;  %v209_v4 = vpop.f32.mrb[6].mxu0 }
 0x219   :  { %v345_v8 = vsel %vm344_vm12, %v342_v3, -inf  ;;  %v744_v10 = vpop.f32.mrb[7].mxu0 }
 0x21a   :  { %v346_v11 = vrot.slane %v345_v8, 4  ;;  %v277_v12 = vpop.f32.mrb[4].mxu1 }
 0x21b   :  { %v327_v13 = vsel %vm325_vm0, -1e+30, %v277_v12  ;;  %v755_v18 = vpop.f32.mrb[5].mxu1 }
 0x21c   :  { %v347_v19 = vmax.f32 %v345_v8, %v346_v11  ;;  %v343_v20 = vsel %vm341_vm1, -1e+30, %v327_v13  ;;  %v280_v21 = vpop.f32.mrb[6].mxu1 }
 0x21d   :  { %v352_v26 = vsel %vm344_vm12, %v343_v20, -inf  ;;  %v756_v27 = vpop.f32.mrb[7].mxu1 }
 0x21e   :  { %v348_v28 = vrot.slane %v347_v19, 2  ;;  %v353_v29 = vrot.slane %v352_v26, 4 }
 0x220   :  { %v349_v32 = vmax.f32 %v347_v19, %v348_v28  ;;  %v354_v33 = vmax.f32 %v352_v26, %v353_v29 }
 0x222   :  { %v350_v36 = vrot.slane %v349_v32, 1  ;;  %v355_v37 = vrot.slane %v354_v33, 2 }
 0x224   :  { %v351_v39 = vmax.f32 %v349_v32, %v350_v36  ;;  %v356_v40 = vmax.f32 %v354_v33, %v355_v37 }
 0x226   :  { %v359_v41 = vsub.f32 %v342_v3, %v351_v39  ;;  %v357_v42 = vrot.slane %v356_v40, 1 }
 0x228   :  { %v361_v43 = vmul.f32 1.442695, %v359_v41  ;;  %v358_v44 = vmax.f32 %v356_v40, %v357_v42 }
 0x22a   :  { %785 = vpow2.f32 %v361_v43  ;;  %v360_v45 = vsub.f32 %v343_v20, %v358_v44 }
 0x22c   :  { %v363_v46 = vmul.f32 1.442695, %v360_v45 }
 0x22e   :  { %787 = vpow2.f32 %v363_v46 }
 0x234   :  { %v786_v47 = vpop.eup %785 }
 0x235   :  { %v365_v48 = vsel %vm344_vm12, %v786_v47, 0.0 }
 0x236   :  { %v366_v49 = vrot.slane %v365_v48, 4 }
 0x238   :  { %v788_v50 = vpop.eup %787  ;;  %v367_v51 = vadd.f32 %v366_v49, %v365_v48 }
 0x239   :  { %v372_v52 = vsel %vm344_vm12, %v788_v50, 0.0 }
 0x23a   :  { %v368_v53 = vrot.slane %v367_v51, 2  ;;  %v373_v54 = vrot.slane %v372_v52, 4 }
 0x23c   :  { %v374_v55 = vadd.f32 %v373_v54, %v372_v52  ;;  %v369_v56 = vadd.f32 %v368_v53, %v367_v51 }
 0x23e   :  { %v375_v57 = vrot.slane %v374_v55, 2  ;;  %v370_v58 = vrot.slane %v369_v56, 1 }
 0x240   :  { %v376_v59 = vadd.f32 %v375_v57, %v374_v55  ;;  %v371_v60 = vadd.f32 %v370_v58, %v369_v56 }
 0x242   :  { %789 = vrcp.f32 %v371_v60  ;;  %v377_v61 = vrot.slane %v376_v59, 1 }
 0x244   :  { %v378_v62 = vadd.f32 %v377_v61, %v376_v59 }
 0x246   :  { %791 = vrcp.f32 %v378_v62 }
 0x24c   :  { %v790_v63 = vpop.eup %789 }
 0x24d   :  { %v381_v0 = vmul.f32 %v790_v63, %v786_v47 }
 0x24f   :  { %v385_v1 = vpack.c.bf16 %v381_v0, %v381_v0  ;;  %383 = vst.msk [vmem:[%s1100_s5] sm:$0x1f] %vm344_vm12, %v381_v0 }
 0x250   :  { %v792_v2 = vpop.eup %791 }
 0x251   :  { %387 = vxpose.xlu0.c.b16.start.end [1/1] (short) (narrow) %v385_v1, 64  ;;  %v382_v3 = vmul.f32 %v792_v2, %v788_v50 }
 0x253   :  { %v386_v4 = vpack.c.bf16 %v382_v3, %v382_v3  ;;  %384 = vst.msk [vmem:[%s1100_s5 + $0x8] sm:$0x1f] %vm344_vm12, %v382_v3  ;;  %s796_s5 = smov 8  }
 0x255   :  { %484 = vxpose.xlu1.c.b16.start.end [1/1] (short) (narrow) %v386_v4, 64 }
 0x25a   :  { %784 = vset.pattern.permute.xlu0 %v795_v38 }
 0x2b7   :  { %v395_v8 = vpop.trf.xlu0 }
 0x2b8   :  { %759 = vmatprep.mubr.msk.bf16.mxu0 %vm403_vm6, %v395_v8 }
 0x2bb   :  { %v492_v10 = vpop.trf.xlu1  ;;  %v396_v11 = vpop.trf.xlu0 }
 0x2bc   :  { %760 = vmatmul.mubr.msk.bf16.vlgmr.msra.gmra.mrb[8].mxu0 %vm403_vm6, %v396_v11  ;;  %769 = vmatprep.mubr.msk.bf16.mxu1 %vm403_vm6, %v492_v10 }
 0x2bf   :  { %v493_v12 = vpop.trf.xlu1  ;;  %v397_v13 = vpop.trf.xlu0 }
 0x2c0   :  { %770 = vmatmul.mubr.msk.bf16.vlgmr.msra.gmra.mrb[8].mxu1 %vm403_vm6, %v493_v12  ;;  %763 = vmatprep.mubr.msk.bf16.mxu0 %vm403_vm6, %v397_v13 }
 0x2c3   :  { %v494_v18 = vpop.trf.xlu1  ;;  %v398_v19 = vpop.trf.xlu0 }
 0x2c4   :  { %764 = vmatmul.mubr.msk.bf16.gmra.mrb[12].mxu0 %vm403_vm6, %v398_v19  ;;  %773 = vmatprep.mubr.msk.bf16.mxu1 %vm403_vm6, %v494_v18 }
 0x2c7   :  { %v495_v38 = vpop.trf.xlu1 }
 0x2c8   :  { %774 = vmatmul.mubr.msk.bf16.gmra.mrb[12].mxu1 %vm403_vm6, %v495_v38 }
 0x38f   :  { %v761_v20 = vpop.f32.mrb[8].mxu0 }
 0x390   :  { %600 = vrot.lane.b32.xlu0 %v761_v20, %s796_s5  ;;  %v453_v21 = vpop.f32.mrb[9].mxu0 }
 0x391   :  { %v762_v26 = vpop.f32.mrb[10].mxu0 }
 0x392   :  { %v456_v27 = vpop.f32.mrb[11].mxu0 }
 0x393   :  { %v771_v28 = vpop.f32.mrb[8].mxu1 }
 0x394   :  { %v549_v29 = vpop.f32.mrb[9].mxu1  ;;  %616 = vrot.lane.b32.xlu0 %v771_v28, %s796_s5 }
 0x395   :  { %v772_v32 = vpop.f32.mrb[10].mxu1 }
 0x396   :  { %618 = vrot.lane.b32.xlu1 %v772_v32, %s796_s5  ;;  %v552_v33 = vpop.f32.mrb[11].mxu1 }
 0x397   :  { %v765_v36 = vpop.f32.mrb[12].mxu0 }
 0x398   :  { %596 = vrot.lane.b32.xlu0 %v453_v21, %s796_s5  ;;  %v469_v37 = vpop.f32.mrb[13].mxu0 }
 0x399   :  { %v766_v39 = vpop.f32.mrb[14].mxu0 }
 0x39a   :  { %614 = vrot.lane.b32.xlu1 %v552_v33, %s796_s5  ;;  %v472_v40 = vpop.f32.mrb[15].mxu0 }
 0x39b   :  { %v775_v41 = vpop.f32.mrb[12].mxu1 }
 0x39c   :  { %612 = vrot.lane.b32.xlu0 %v549_v29, %s796_s5  ;;  %v565_v42 = vpop.f32.mrb[13].mxu1 }
 0x39d   :  { %v776_v43 = vpop.f32.mrb[14].mxu1 }
 0x39e   :  { %604 = vrot.lane.b32.xlu1 %v469_v37, %s796_s5  ;;  %v568_v44 = vpop.f32.mrb[15].mxu1 }
 0x3a0   :  { %602 = vrot.lane.b32.xlu0 %v762_v26, %s796_s5 }
 0x3a2   :  { %622 = vrot.lane.b32.xlu1 %v568_v44, %s796_s5 }
 0x3a4   :  { %598 = vrot.lane.b32.xlu0 %v456_v27, %s796_s5 }
 0x3a6   :  { %626 = vrot.lane.b32.xlu1 %v776_v43, %s796_s5 }
 0x3a8   :  { %608 = vrot.lane.b32.xlu0 %v765_v36, %s796_s5 }
 0x3ac   :  { %620 = vrot.lane.b32.xlu0 %v565_v42, %s796_s5 }
 0x3b0   :  { %610 = vrot.lane.b32.xlu0 %v766_v39, %s796_s5 }
 0x3b4   :  { %606 = vrot.lane.b32.xlu0 %v472_v40, %s796_s5 }
 0x3b8   :  { %624 = vrot.lane.b32.xlu0 %v775_v41, %s796_s5 }
 0x402   :  { %v601_v45 = vpop.permute.xlu0 %600 }
 0x403   :  { %v646_v46 = vsel %vm156_vm3, %v869_v14, %v601_v45 }
 0x404   :  { %663 = vst.msk [vmem:[%s1101_s4 + $0x10] sm:$0xff] %vm660_vm2, %v646_v46 }
 0x406   :  { %v617_v47 = vpop.permute.xlu0 %616 }
 0x407   :  { %v654_v48 = vsel %vm156_vm3, %v879_v16, %v617_v47 }
 0x408   :  { %671 = vst.msk [vmem:[%s1101_s4 + $0x50] sm:$0xff] %vm660_vm2, %v654_v48  ;;  %v619_v49 = vpop.permute.xlu1 %618 }
 0x409   :  { %v655_v50 = vsel %vm156_vm3, %v884_v17, %v619_v49 }
 0x40a   :  { %672 = vst.msk [vmem:[%s1101_s4 + $0x58] sm:$0xff] %vm660_vm2, %v655_v50  ;;  %v597_v14 = vpop.permute.xlu0 %596 }
 0x40b   :  { %v644_v51 = vsel %vm156_vm3, %v838_v5, %v597_v14 }
 0x40c   :  { %661 = vst.msk [vmem:[%s1101_s4] sm:$0xff] %vm660_vm2, %v644_v51  ;;  %v615_v16 = vpop.permute.xlu1 %614 }
 0x40d   :  { %v653_v52 = vsel %vm156_vm3, %v856_v9, %v615_v16 }
 0x40e   :  { %670 = vst.msk [vmem:[%s1101_s4 + $0x48] sm:$0xff] %vm660_vm2, %v653_v52  ;;  %v613_v17 = vpop.permute.xlu0 %612 }
 0x40f   :  { %v652_v53 = vsel %vm156_vm3, %v848_v7, %v613_v17 }
 0x410   :  { %669 = vst.msk [vmem:[%s1101_s4 + $0x40] sm:$0xff] %vm660_vm2, %v652_v53  ;;  %v605_v5 = vpop.permute.xlu1 %604 }
 0x411   :  { %v648_v54 = vsel %vm156_vm3, %v895_v22, %v605_v5 }
 0x412   :  { %v603_v55 = vpop.permute.xlu0 %602  ;;  %665 = vst.msk [vmem:[%s1101_s4 + $0x20] sm:$0xff] %vm660_vm2, %v648_v54 }
 0x413   :  { %v647_v9 = vsel %vm156_vm3, %v874_v15, %v603_v55 }
 0x414   :  { %664 = vst.msk [vmem:[%s1101_s4 + $0x18] sm:$0xff] %vm660_vm2, %v647_v9  ;;  %v623_v7 = vpop.permute.xlu1 %622 }
 0x415   :  { %v657_v56 = vsel %vm156_vm3, %v910_v25, %v623_v7 }
 0x416   :  { %v599_v57 = vpop.permute.xlu0 %598  ;;  %674 = vst.msk [vmem:[%s1101_s4 + $0x68] sm:$0xff] %vm660_vm2, %v657_v56 }
 0x417   :  { %v645_v22 = vsel %vm156_vm3, %v843_v6, %v599_v57 }
 0x418   :  { %662 = vst.msk [vmem:[%s1101_s4 + $0x8] sm:$0xff] %vm660_vm2, %v645_v22  ;;  %v627_v15 = vpop.permute.xlu1 %626 }
 0x419   :  { %v659_v58 = vsel %vm156_vm3, %v939_v35, %v627_v15 }
 0x41a   :  { %v609_v59 = vpop.permute.xlu0 %608  ;;  %676 = vst.msk [vmem:[%s1101_s4 + $0x78] sm:$0xff] %vm660_vm2, %v659_v58 }
 0x41b   :  { %v650_v25 = vsel %vm156_vm3, %v921_v30, %v609_v59 }
 0x41c   :  { %667 = vst.msk [vmem:[%s1101_s4 + $0x30] sm:$0xff] %vm660_vm2, %v650_v25 }
 0x41e   :  { %v621_v6 = vpop.permute.xlu0 %620 }
 0x41f   :  { %v656_v60 = vsel %vm156_vm3, %v905_v24, %v621_v6 }
 0x420   :  { %673 = vst.msk [vmem:[%s1101_s4 + $0x60] sm:$0xff] %vm660_vm2, %v656_v60 }
 0x422   :  { %v611_v35 = vpop.permute.xlu0 %610 }
 0x423   :  { %v651_v61 = vsel %vm156_vm3, %v926_v31, %v611_v35 }
 0x424   :  { %668 = vst.msk [vmem:[%s1101_s4 + $0x38] sm:$0xff] %vm660_vm2, %v651_v61 }
 0x426   :  { %v607_v30 = vpop.permute.xlu0 %606 }
 0x427   :  { %v649_v62 = vsel %vm156_vm3, %v900_v23, %v607_v30 }
 0x428   :  { %666 = vst.msk [vmem:[%s1101_s4 + $0x28] sm:$0xff] %vm660_vm2, %v649_v62 }
 0x42a   :  { %v625_v24 = vpop.permute.xlu0 %624 }
 0x42b   :  { %v658_v63 = vsel %vm156_vm3, %v934_v34, %v625_v24 }
 0x42c   :  { %675 = vst.msk [vmem:[%s1101_s4 + $0x70] sm:$0xff] %vm660_vm2, %v658_v63 }

// kernel: next_stage_generator.7
= control target key start
LH: loop header
LB: loop body
LE: loop exit
PB: predicated region body
PF: predicated region fallthrough
CT: control target
= control target key end

     0   :  { %v1539_v0 = vmov 0.0   ;;  %vm1540_vm0 = vmmov 0   ;;  %vm37_vm1 = vcmask 130048   ;;  %v1541_v24 = vmov 0   ;;  %s2173_s0 = inlined_call_operand.vmem [shape: f32[16,128], index: 0, kind: input, shape index: {}]   ;;  %s2174_s2 = inlined_call_operand.vmem [shape: bf16[3,16,16], index: 2, kind: input, shape index: {}]   ;;  %s2175_s1 = inlined_call_operand.vmem [shape: bf16[3,128,256], index: 1, kind: input, shape index: {}]   ;;  %s2176_s3 = inlined_call_operand.vmem [shape: f32[256,256], index: 3, kind: input, shape index: {}]   ;;  %s2177_s6 = inlined_call_operand.vmem [shape: f32[2,256,128], index: 6, kind: input, shape index: {}]   ;;  %s2178_s4 = inlined_call_operand.vmem [shape: f32[1,256], index: 4, kind: input, shape index: {}]   ;;  %s2179_s5 = inlined_call_operand.vmem [shape: f32[1,256], index: 5, kind: input, shape index: {}]   ;;  %s2180_s7 = inlined_call_operand.vmem [shape: f32[16,128], index: 7, kind: output, shape index: {}]  }
   0x1   :  { %1295 = vmatprep.subr.bf16.mxu1 %v1539_v0  ;;  %v27_v1 = vld [vmem:[%s2173_s0] sm:$0xff]  ;;  %v28_v2 = vld [vmem:[%s2173_s0 + $0x8] sm:$0xff]  ;;  %1297 = vmatprep.mubr.msk.bf16.mxu1 %vm1540_vm0, %v1539_v0  ;;  %v1458_v7 = vld [vmem:[%s2175_s1 + $0x94] ss:$8 sps:$4 sm:$0xff]   ;;  %vm644_vm2 = vcmask 1040384  }
   0x2   :  { %v29_v3 = vpack.c.bf16 %v28_v2, %v27_v1  ;;  %v1452_v4 = vld [vmem:[%s2174_s2] sm:$0xff]   ;;  %v1453_v8 = vld [vmem:[%s2174_s2 + $0x8] sm:$0xff]   ;;  %v1460_v9 = vld [vmem:[%s2175_s1 + $0x90] ss:$8 sps:$4 sm:$0xff]   ;;  %281 = vmatprep.mubr.bf16.mxu0 %v1541_v24 }
   0x3   :  { %v1455_v5 = vld [vmem:[%s2175_s1 + $0x84] ss:$8 sps:$4 sm:$0xff]   ;;  %v1457_v6 = vld [vmem:[%s2175_s1 + $0x80] ss:$8 sps:$4 sm:$0xff]   ;;  %v1464_v12 = vld [vmem:[%s2175_s1 + $0xb4] ss:$8 sps:$4 sm:$0xff]  }
   0x4   :  { %1296 = vmatpush3.bf16.msra.mxu1 %v29_v3  ;;  %249 = vmatprep.subr.bf16.mxu0 %v1455_v5  ;;  %v1461_v10 = vld [vmem:[%s2175_s1 + $0xa4] ss:$8 sps:$4 sm:$0xff]   ;;  %v1463_v11 = vld [vmem:[%s2175_s1 + $0xa0] ss:$8 sps:$4 sm:$0xff]   ;;  %v1466_v13 = vld [vmem:[%s2175_s1 + $0xb0] ss:$8 sps:$4 sm:$0xff]  }
   0x5   :  { %1301 = vmatprep.subr.bf16.mxu1 %v1539_v0  ;;  %250 = vmatpush1.bf16.msra.mxu0 %v1457_v6  ;;  %v1467_v14 = vld [vmem:[%s2175_s1 + $0xc4] ss:$8 sps:$4 sm:$0xff]   ;;  %v1454_v15 = vld [vmem:[%s2174_s2 + $0x10] sm:$0xff]   ;;  %v1469_v16 = vld [vmem:[%s2175_s1 + $0xc0] ss:$8 sps:$4 sm:$0xff]  }
   0x6   :  { %251 = vmatprep.subr.bf16.mxu0 %v1458_v7  ;;  %v1470_v17 = vld [vmem:[%s2175_s1 + $0xd4] ss:$8 sps:$4 sm:$0xff]   ;;  %v1472_v18 = vld [vmem:[%s2175_s1 + $0xd0] ss:$8 sps:$4 sm:$0xff]   ;;  %v1473_v19 = vld [vmem:[%s2175_s1 + $0xe4] ss:$8 sps:$4 sm:$0xff]  }
   0x7   :  { %1298 = vmatmul.mubr.msk.bf16.vlgmr.msra.gmra.mrb[0].mxu1 %vm37_vm1, %v1452_v4  ;;  %v1475_v20 = vld [vmem:[%s2175_s1 + $0xe0] ss:$8 sps:$4 sm:$0xff]   ;;  %v1476_v21 = vld [vmem:[%s2175_s1 + $0xf4] ss:$8 sps:$4 sm:$0xff]   ;;  %v1478_v22 = vld [vmem:[%s2175_s1 + $0xf0] ss:$8 sps:$4 sm:$0xff]  }
   0x8   :  { %1302 = vmatpush3.bf16.msra.mxu1 %v29_v3  ;;  %1303 = vmatprep.mubr.msk.bf16.mxu1 %vm1540_vm0, %v1539_v0  ;;  %v1481_v23 = vld [vmem:[%s2175_s1 + $0x4] ss:$8 sps:$4 sm:$0xff]   ;;  %v650_v26 = vld [vmem:[%s2176_s3 + $0x18] sm:$0xff]  ;;  %v649_v29 = vld [vmem:[%s2176_s3 + $0x10] sm:$0xff] }
   0x9   :  { %1307 = vmatprep.subr.bf16.mxu1 %v1539_v0  ;;  %252 = vmatpush1.bf16.msra.mxu0 %v1460_v9  ;;  %v648_v25 = vld [vmem:[%s2176_s3 + $0x8] sm:$0xff]  ;;  %v647_v27 = vld [vmem:[%s2176_s3] sm:$0xff]  ;;  %v654_v31 = vld [vmem:[%s2176_s3 + $0x38] sm:$0xff] }
   0xa   :  { %253 = vmatprep.subr.bf16.mxu0 %v1461_v10  ;;  %v1313_v28 = vpack.c.bf16 %v650_v26, %v648_v25  ;;  %v652_v30 = vld [vmem:[%s2176_s3 + $0x28] sm:$0xff]  ;;  %v1315_v32 = vpack.c.bf16 %v649_v29, %v647_v27  ;;  %v651_v34 = vld [vmem:[%s2176_s3 + $0x20] sm:$0xff]  ;;  %v653_v35 = vld [vmem:[%s2176_s3 + $0x30] sm:$0xff] }
   0xb   :  { %v1317_v33 = vpack.c.bf16 %v654_v31, %v652_v30  ;;  %v656_v36 = vld [vmem:[%s2176_s3 + $0x48] sm:$0xff]  ;;  %v658_v37 = vld [vmem:[%s2176_s3 + $0x58] sm:$0xff]  ;;  %v1319_v38 = vpack.c.bf16 %v653_v35, %v651_v34  ;;  %v655_v40 = vld [vmem:[%s2176_s3 + $0x40] sm:$0xff] }
   0xc   :  { %v1321_v39 = vpack.c.bf16 %v658_v37, %v656_v36  ;;  %v657_v41 = vld [vmem:[%s2176_s3 + $0x50] sm:$0xff]  ;;  %v660_v42 = vld [vmem:[%s2176_s3 + $0x68] sm:$0xff]  ;;  %v662_v43 = vld [vmem:[%s2176_s3 + $0x78] sm:$0xff] }
   0xd   :  { %254 = vmatpush1.bf16.msra.mxu0 %v1463_v11  ;;  %v1323_v44 = vpack.c.bf16 %v657_v41, %v655_v40  ;;  %v1325_v45 = vpack.c.bf16 %v662_v43, %v660_v42  ;;  %v659_v46 = vld [vmem:[%s2176_s3 + $0x60] sm:$0xff]  ;;  %v661_v47 = vld [vmem:[%s2176_s3 + $0x70] sm:$0xff]  ;;  %v664_v48 = vld [vmem:[%s2176_s3 + $0x88] sm:$0xff] }
   0xe   :  { %255 = vmatprep.subr.bf16.mxu0 %v1464_v12  ;;  %v666_v49 = vld [vmem:[%s2176_s3 + $0x98] sm:$0xff]  ;;  %v1327_v50 = vpack.c.bf16 %v661_v47, %v659_v46  ;;  %v663_v52 = vld [vmem:[%s2176_s3 + $0x80] sm:$0xff]  ;;  %v665_v53 = vld [vmem:[%s2176_s3 + $0x90] sm:$0xff] }
   0xf   :  { %1304 = vmatmul.mubr.msk.bf16.vlgmr.msra.gmra.mrb[4].mxu1 %vm37_vm1, %v1453_v8  ;;  %v1329_v51 = vpack.c.bf16 %v666_v49, %v664_v48  ;;  %v668_v54 = vld [vmem:[%s2176_s3 + $0xa8] sm:$0xff]  ;;  %v670_v55 = vld [vmem:[%s2176_s3 + $0xb8] sm:$0xff]  ;;  %v1331_v56 = vpack.c.bf16 %v665_v53, %v663_v52  ;;  %v667_v58 = vld [vmem:[%s2176_s3 + $0xa0] sm:$0xff] }
  0x10   :  { %1308 = vmatpush3.bf16.msra.mxu1 %v29_v3  ;;  %1309 = vmatprep.mubr.msk.bf16.mxu1 %vm1540_vm0, %v1539_v0  ;;  %v1333_v57 = vpack.c.bf16 %v670_v55, %v668_v54  ;;  %v669_v59 = vld [vmem:[%s2176_s3 + $0xb0] sm:$0xff]  ;;  %v672_v60 = vld [vmem:[%s2176_s3 + $0xc8] sm:$0xff]  ;;  %v674_v61 = vld [vmem:[%s2176_s3 + $0xd8] sm:$0xff] }
  0x11   :  { %256 = vmatpush1.bf16.msra.mxu0 %v1466_v13  ;;  %1314 = vmatprep.subr.bf16.mxu1 %v1313_v28  ;;  %v1335_v62 = vpack.c.bf16 %v669_v59, %v667_v58  ;;  %v1337_v63 = vpack.c.bf16 %v674_v61, %v672_v60  ;;  %v671_v0 = vld [vmem:[%s2176_s3 + $0xc0] sm:$0xff]  ;;  %v673_v1 = vld [vmem:[%s2176_s3 + $0xd0] sm:$0xff]  ;;  %v676_v2 = vld [vmem:[%s2176_s3 + $0xe8] sm:$0xff] }
  0x12   :  { %257 = vmatprep.subr.bf16.mxu0 %v1467_v14  ;;  %v678_v3 = vld [vmem:[%s2176_s3 + $0xf8] sm:$0xff]  ;;  %v1339_v4 = vpack.c.bf16 %v673_v1, %v671_v0  ;;  %v675_v6 = vld [vmem:[%s2176_s3 + $0xe0] sm:$0xff]  ;;  %v677_v7 = vld [vmem:[%s2176_s3 + $0xf0] sm:$0xff] }
  0x13   :  { %v1341_v5 = vpack.c.bf16 %v678_v3, %v676_v2  ;;  %v680_v8 = vld [vmem:[%s2176_s3 + $0x108] sm:$0xff]  ;;  %v682_v9 = vld [vmem:[%s2176_s3 + $0x118] sm:$0xff]  ;;  %v1343_v10 = vpack.c.bf16 %v677_v7, %v675_v6  ;;  %v679_v12 = vld [vmem:[%s2176_s3 + $0x100] sm:$0xff] }
  0x14   :  { %v1345_v11 = vpack.c.bf16 %v682_v9, %v680_v8  ;;  %v681_v13 = vld [vmem:[%s2176_s3 + $0x110] sm:$0xff]  ;;  %v684_v14 = vld [vmem:[%s2176_s3 + $0x128] sm:$0xff]  ;;  %v687_v25 = vld [vmem:[%s2176_s3 + $0x140] sm:$0xff] }
  0x15   :  { %258 = vmatpush1.bf16.msra.mxu0 %v1469_v16  ;;  %v1347_v16 = vpack.c.bf16 %v681_v13, %v679_v12  ;;  %v689_v26 = vld [vmem:[%s2176_s3 + $0x150] sm:$0xff]  ;;  %v1479_v36 = vld [vmem:[%s2175_s1] ss:$8 sps:$4 sm:$0xff]   ;;  %v1487_v41 = vld [vmem:[%s2175_s1 + $0x24] ss:$8 sps:$4 sm:$0xff]  }
  0x16   :  { %259 = vmatprep.subr.bf16.mxu0 %v1470_v17  ;;  %v1355_v27 = vpack.c.bf16 %v689_v26, %v687_v25  ;;  %v1482_v40 = vld [vmem:[%s2175_s1 + $0x10] ss:$8 sps:$4 sm:$0xff]   ;;  %v1490_v46 = vld [vmem:[%s2175_s1 + $0x34] ss:$8 sps:$4 sm:$0xff]   ;;  %v1499_v54 = vld [vmem:[%s2175_s1 + $0x64] ss:$8 sps:$4 sm:$0xff]  }
  0x17   :  { %1310 = vmatmul.mubr.msk.bf16.vlgmr.msra.gmra.mrb[8].mxu1 %vm37_vm1, %v1454_v15  ;;  %v686_v15 = vld [vmem:[%s2176_s3 + $0x138] sm:$0xff]  ;;  %v1497_v55 = vld [vmem:[%s2175_s1 + $0x60] ss:$8 sps:$4 sm:$0xff]   ;;  %v1505_v58 = vld [vmem:[%s2175_s1 + $0x104] ss:$8 sps:$4 sm:$0xff]  }
  0x18   :  { %1316 = vmatpush1.bf16.msra.mxu1 %v1315_v32  ;;  %v1349_v17 = vpack.c.bf16 %v686_v15, %v684_v14  ;;  %v1488_v49 = vld [vmem:[%s2175_s1 + $0x30] ss:$8 sps:$4 sm:$0xff]   ;;  %v1496_v52 = vld [vmem:[%s2175_s1 + $0x54] ss:$8 sps:$4 sm:$0xff]   ;;  %v1503_v59 = vld [vmem:[%s2175_s1 + $0x100] ss:$8 sps:$4 sm:$0xff]  }
  0x19   :  { %260 = vmatpush1.bf16.msra.mxu0 %v1472_v18  ;;  %1318 = vmatprep.subr.bf16.mxu1 %v1317_v33  ;;  %v683_v18 = vld [vmem:[%s2176_s3 + $0x120] sm:$0xff]  ;;  %v1494_v53 = vld [vmem:[%s2175_s1 + $0x50] ss:$8 sps:$4 sm:$0xff]   ;;  %v1508_v60 = vld [vmem:[%s2175_s1 + $0x114] ss:$8 sps:$4 sm:$0xff]  }
  0x1a   :  { %261 = vmatprep.subr.bf16.mxu0 %v1473_v19  ;;  %v685_v19 = vld [vmem:[%s2176_s3 + $0x130] sm:$0xff]  ;;  %v1517_v1 = vld [vmem:[%s2175_s1 + $0x144] ss:$8 sps:$4 sm:$0xff]   ;;  %v1515_v2 = vld [vmem:[%s2175_s1 + $0x140] ss:$8 sps:$4 sm:$0xff]  }
  0x1b   :  { %v1506_v61 = vld [vmem:[%s2175_s1 + $0x110] ss:$8 sps:$4 sm:$0xff]   ;;  %v1514_v0 = vld [vmem:[%s2175_s1 + $0x134] ss:$8 sps:$4 sm:$0xff]   ;;  %v1521_v6 = vld [vmem:[%s2175_s1 + $0x160] ss:$8 sps:$4 sm:$0xff]  }
  0x1c   :  { %1320 = vmatpush1.bf16.msra.mxu1 %v1319_v38  ;;  %v1520_v3 = vld [vmem:[%s2175_s1 + $0x154] ss:$8 sps:$4 sm:$0xff]   ;;  %v1524_v8 = vld [vmem:[%s2175_s1 + $0x170] ss:$8 sps:$4 sm:$0xff]   ;;  %v692_v9 = vld [vmem:[%s2176_s3 + $0x168] sm:$0xff] }
  0x1d   :  { %262 = vmatpush1.bf16.msra.mxu0 %v1475_v20  ;;  %1322 = vmatprep.subr.bf16.mxu1 %v1321_v39  ;;  %v688_v20 = vld [vmem:[%s2176_s3 + $0x148] sm:$0xff]  ;;  %v1484_v39 = vld [vmem:[%s2175_s1 + $0x14] ss:$8 sps:$4 sm:$0xff]   ;;  %v691_v12 = vld [vmem:[%s2176_s3 + $0x160] sm:$0xff] }
  0x1e   :  { %263 = vmatprep.subr.bf16.mxu0 %v1476_v21  ;;  %v690_v21 = vld [vmem:[%s2176_s3 + $0x158] sm:$0xff]  ;;  %v693_v13 = vld [vmem:[%s2176_s3 + $0x170] sm:$0xff]  ;;  %v696_v15 = vld [vmem:[%s2176_s3 + $0x188] sm:$0xff] }
  0x1f   :  { %v1526_v7 = vld [vmem:[%s2175_s1 + $0x174] ss:$8 sps:$4 sm:$0xff]   ;;  %v1359_v14 = vpack.c.bf16 %v693_v13, %v691_v12  ;;  %v699_v25 = vld [vmem:[%s2176_s3 + $0x1a0] sm:$0xff] }
  0x20   :  { %1324 = vmatpush1.bf16.msra.mxu1 %v1323_v44  ;;  %v1485_v44 = vld [vmem:[%s2175_s1 + $0x20] ss:$8 sps:$4 sm:$0xff]   ;;  %v701_v26 = vld [vmem:[%s2176_s3 + $0x1b0] sm:$0xff] }
  0x21   :  { %264 = vmatpush1.bf16.msra.mxu0 %v1478_v22  ;;  %1326 = vmatprep.subr.bf16.mxu1 %v1325_v45  ;;  %v1351_v22 = vpack.c.bf16 %v685_v19, %v683_v18  ;;  %v695_v18 = vld [vmem:[%s2176_s3 + $0x180] sm:$0xff]  ;;  %v697_v19 = vld [vmem:[%s2176_s3 + $0x190] sm:$0xff] }
  0x22   :  { %372 = vmatprep.subr.bf16.mxu0 %v1481_v23  ;;  %v1353_v23 = vpack.c.bf16 %v690_v21, %v688_v20  ;;  %v1363_v20 = vpack.c.bf16 %v697_v19, %v695_v18  ;;  %v700_v21 = vld [vmem:[%s2176_s3 + $0x1a8] sm:$0xff]  ;;  %v870_v13 = vld [vmem:[%s2177_s6 + $0x80] sm:$0xff] }
  0x23   :  { %v854_v18 = vld [vmem:[%s2177_s6] sm:$0xff]  ;;  %v855_v19 = vld [vmem:[%s2177_s6 + $0x8] sm:$0xff] }
  0x24   :  { %1328 = vmatpush1.bf16.msra.mxu1 %v1327_v50  ;;  %v1493_v50 = vld [vmem:[%s2175_s1 + $0x44] ss:$8 sps:$4 sm:$0xff]  }
  0x25   :  { %1330 = vmatprep.subr.bf16.mxu1 %v1329_v51  ;;  %v1491_v51 = vld [vmem:[%s2175_s1 + $0x40] ss:$8 sps:$4 sm:$0xff]  }
  0x28   :  { %1332 = vmatpush1.bf16.msra.mxu1 %v1331_v56  ;;  %v1502_v56 = vld [vmem:[%s2175_s1 + $0x74] ss:$8 sps:$4 sm:$0xff]  }
  0x29   :  { %1334 = vmatprep.subr.bf16.mxu1 %v1333_v57  ;;  %v1500_v57 = vld [vmem:[%s2175_s1 + $0x70] ss:$8 sps:$4 sm:$0xff]  }
  0x2c   :  { %1336 = vmatpush1.bf16.msra.mxu1 %v1335_v62  ;;  %v1511_v62 = vld [vmem:[%s2175_s1 + $0x124] ss:$8 sps:$4 sm:$0xff]  }
  0x2d   :  { %1338 = vmatprep.subr.bf16.mxu1 %v1337_v63  ;;  %v1509_v63 = vld [vmem:[%s2175_s1 + $0x120] ss:$8 sps:$4 sm:$0xff]  }
  0x30   :  { %1340 = vmatpush1.bf16.msra.mxu1 %v1339_v4  ;;  %v1518_v4 = vld [vmem:[%s2175_s1 + $0x150] ss:$8 sps:$4 sm:$0xff]  }
  0x31   :  { %1342 = vmatprep.subr.bf16.mxu1 %v1341_v5  ;;  %v1523_v5 = vld [vmem:[%s2175_s1 + $0x164] ss:$8 sps:$4 sm:$0xff]  }
  0x34   :  { %1344 = vmatpush1.bf16.msra.mxu1 %v1343_v10  ;;  %v694_v10 = vld [vmem:[%s2176_s3 + $0x178] sm:$0xff] }
  0x35   :  { %1346 = vmatprep.subr.bf16.mxu1 %v1345_v11  ;;  %v1357_v11 = vpack.c.bf16 %v694_v10, %v692_v9 }
  0x38   :  { %1348 = vmatpush1.bf16.msra.mxu1 %v1347_v16  ;;  %v698_v16 = vld [vmem:[%s2176_s3 + $0x198] sm:$0xff] }
  0x39   :  { %1350 = vmatprep.subr.bf16.mxu1 %v1349_v17  ;;  %v1361_v17 = vpack.c.bf16 %v698_v16, %v696_v15  ;;  %v1195_v15 = vld [vmem:[%s2177_s6 + $0x180] sm:$0xff] }
  0x3c   :  { %1352 = vmatpush1.bf16.msra.mxu1 %v1351_v22  ;;  %v702_v22 = vld [vmem:[%s2176_s3 + $0x1b8] sm:$0xff] }
  0x3d   :  { %1354 = vmatprep.subr.bf16.mxu1 %v1353_v23  ;;  %v1365_v23 = vpack.c.bf16 %v702_v22, %v700_v21  ;;  %v1379_v21 = vpack.c.bf16 %v855_v19, %v854_v18  ;;  %v1179_v22 = vld [vmem:[%s2177_s6 + $0x100] sm:$0xff]  ;;  %v864_v18 = vld [vmem:[%s2177_s6 + $0x50] sm:$0xff]  ;;  %v865_v19 = vld [vmem:[%s2177_s6 + $0x58] sm:$0xff] }
  0x40   :  { %1356 = vmatpush1.bf16.msra.mxu1 %v1355_v27  ;;  %v1367_v27 = vpack.c.bf16 %v701_v26, %v699_v25  ;;  %v872_v26 = vld [vmem:[%s2177_s6 + $0x90] sm:$0xff] }
  0x41   :  { %1358 = vmatprep.subr.bf16.mxu1 %v1357_v11 }
  0x44   :  { %1360 = vmatpush1.bf16.msra.mxu1 %v1359_v14  ;;  %v871_v14 = vld [vmem:[%s2177_s6 + $0x88] sm:$0xff] }
  0x45   :  { %1362 = vmatprep.subr.bf16.mxu1 %v1361_v17  ;;  %v1377_v16 = vpack.c.bf16 %v871_v14, %v870_v13  ;;  %v1196_v17 = vld [vmem:[%s2177_s6 + $0x188] sm:$0xff]  ;;  %v880_v13 = vld [vmem:[%s2177_s6 + $0xd0] sm:$0xff]  ;;  %v881_v14 = vld [vmem:[%s2177_s6 + $0xd8] sm:$0xff] }
  0x48   :  { %1364 = vmatpush1.bf16.msra.mxu1 %v1363_v20  ;;  %v1409_v20 = vpack.c.bf16 %v1196_v17, %v1195_v15  ;;  %v1205_v15 = vld [vmem:[%s2177_s6 + $0x1d0] sm:$0xff]  ;;  %v1206_v17 = vld [vmem:[%s2177_s6 + $0x1d8] sm:$0xff] }
  0x49   :  { %1366 = vmatprep.subr.bf16.mxu1 %v1365_v23  ;;  %v1180_v23 = vld [vmem:[%s2177_s6 + $0x108] sm:$0xff] }
  0x4a   :  { %v1411_v25 = vpack.c.bf16 %v1180_v23, %v1179_v22  ;;  %v1189_v22 = vld [vmem:[%s2177_s6 + $0x150] sm:$0xff]  ;;  %v1190_v23 = vld [vmem:[%s2177_s6 + $0x158] sm:$0xff] }
  0x4c   :  { %1368 = vmatpush1.bf16.msra.mxu1 %v1367_v27  ;;  %v873_v27 = vld [vmem:[%s2177_s6 + $0x98] sm:$0xff] }
  0xda   :  { %v75_v28 = vpop.f32.mrb[0].mxu1 }
  0xdb   :  { %v1299_v29 = vpop.f32.mrb[1].mxu1 }
  0xdc   :  { %v78_v30 = vpop.f32.mrb[2].mxu1  ;;  %v706_v29 = vld [vmem:[%s2176_s3 + $0x1d8] sm:$0xff] }
  0xdd   :  { %v82_v31 = vpack.c.bf16 %v78_v30, %v75_v28  ;;  %v1300_v32 = vpop.f32.mrb[3].mxu1  ;;  %v704_v28 = vld [vmem:[%s2176_s3 + $0x1c8] sm:$0xff] }
  0xde   :  { %v1369_v30 = vpack.c.bf16 %v706_v29, %v704_v28  ;;  %v705_v32 = vld [vmem:[%s2176_s3 + $0x1d0] sm:$0xff]  ;;  %v1381_v29 = vpack.c.bf16 %v873_v27, %v872_v26  ;;  %v882_v26 = vld [vmem:[%s2177_s6 + $0xe0] sm:$0xff]  ;;  %v883_v27 = vld [vmem:[%s2177_s6 + $0xe8] sm:$0xff] }
  0xdf   :  { %v1197_v28 = vld [vmem:[%s2177_s6 + $0x190] sm:$0xff] }
  0xe0   :  { %1370 = vmatprep.subr.bf16.mxu1 %v1369_v30  ;;  %v1198_v30 = vld [vmem:[%s2177_s6 + $0x198] sm:$0xff] }
  0xe2   :  { %v144_v33 = vpop.f32.mrb[4].mxu1 }
  0xe3   :  { %v1305_v34 = vpop.f32.mrb[5].mxu1 }
  0xe4   :  { %v147_v35 = vpop.f32.mrb[6].mxu1  ;;  %v708_v34 = vld [vmem:[%s2176_s3 + $0x1e8] sm:$0xff] }
  0xe5   :  { %v151_v37 = vpack.c.bf16 %v147_v35, %v144_v33  ;;  %v1306_v38 = vpop.f32.mrb[7].mxu1  ;;  %v710_v35 = vld [vmem:[%s2176_s3 + $0x1f8] sm:$0xff] }
  0xe6   :  { %v709_v38 = vld [vmem:[%s2176_s3 + $0x1f0] sm:$0xff] }
  0xe7   :  { %282 = vmatmul.mubr.bf16.vlgmr.msra.gmra.mrb[0].mxu0 %v151_v37  ;;  %v1373_v37 = vpack.c.bf16 %v710_v35, %v708_v34  ;;  %v1181_v35 = vld [vmem:[%s2177_s6 + $0x110] sm:$0xff] }
  0xe8   :  { %373 = vmatpush1.bf16.msra.mxu0 %v1479_v36  ;;  %404 = vmatprep.mubr.bf16.mxu0 %v1541_v24  ;;  %v707_v36 = vld [vmem:[%s2176_s3 + $0x1e0] sm:$0xff] }
  0xe9   :  { %374 = vmatprep.subr.bf16.mxu0 %v1484_v39  ;;  %v1375_v39 = vpack.c.bf16 %v709_v38, %v707_v36  ;;  %v1182_v36 = vld [vmem:[%s2177_s6 + $0x118] sm:$0xff]  ;;  %v874_v38 = vld [vmem:[%s2177_s6 + $0xa0] sm:$0xff] }
  0xea   :  { %v1800_v42 = vpop.f32.mrb[8].mxu1 }
  0xeb   :  { %v1311_v43 = vpop.f32.mrb[9].mxu1 }
  0xec   :  { %375 = vmatpush1.bf16.msra.mxu0 %v1482_v40  ;;  %v463_v45 = vpop.f32.mrb[10].mxu1 }
  0xed   :  { %376 = vmatprep.subr.bf16.mxu0 %v1487_v41  ;;  %v467_v47 = vpack.c.bf16 %v463_v45, %v1800_v42  ;;  %v1312_v48 = vpop.f32.mrb[11].mxu1 }
  0xf0   :  { %377 = vmatpush1.bf16.msra.mxu0 %v1485_v44 }
  0xf1   :  { %378 = vmatprep.subr.bf16.mxu0 %v1490_v46 }
  0xf4   :  { %379 = vmatpush1.bf16.msra.mxu0 %v1488_v49 }
  0xf5   :  { %380 = vmatprep.subr.bf16.mxu0 %v1493_v50 }
  0xf8   :  { %381 = vmatpush1.bf16.msra.mxu0 %v1491_v51 }
  0xf9   :  { %382 = vmatprep.subr.bf16.mxu0 %v1496_v52 }
  0xfc   :  { %383 = vmatpush1.bf16.msra.mxu0 %v1494_v53 }
  0xfd   :  { %384 = vmatprep.subr.bf16.mxu0 %v1499_v54 }
 0x100   :  { %385 = vmatpush1.bf16.msra.mxu0 %v1497_v55 }
 0x101   :  { %386 = vmatprep.subr.bf16.mxu0 %v1502_v56 }
 0x104   :  { %387 = vmatpush1.bf16.msra.mxu0 %v1500_v57 }
 0x105   :  { %565 = vmatprep.subr.bf16.mxu0 %v1505_v58 }
 0x107   :  { %405 = vmatmul.mubr.bf16.vlgmr.msra.gmra.mrb[0].mxu0 %v82_v31  ;;  %v703_v31 = vld [vmem:[%s2176_s3 + $0x1c0] sm:$0xff] }
 0x108   :  { %566 = vmatpush1.bf16.msra.mxu0 %v1503_v59  ;;  %597 = vmatprep.mubr.bf16.mxu0 %v1541_v24  ;;  %v1512_v24 = vld [vmem:[%s2175_s1 + $0x130] ss:$8 sps:$4 sm:$0xff]   ;;  %v1371_v33 = vpack.c.bf16 %v705_v32, %v703_v31 }
 0x109   :  { %567 = vmatprep.subr.bf16.mxu0 %v1508_v60  ;;  %v856_v31 = vld [vmem:[%s2177_s6 + $0x10] sm:$0xff]  ;;  %v857_v32 = vld [vmem:[%s2177_s6 + $0x18] sm:$0xff] }
 0x10a   :  { %1372 = vmatpush1.bf16.msra.mxu1 %v1371_v33  ;;  %v1413_v33 = vpack.c.bf16 %v1198_v30, %v1197_v28  ;;  %v1383_v34 = vpack.c.bf16 %v857_v32, %v856_v31  ;;  %v1207_v28 = vld [vmem:[%s2177_s6 + $0x1e0] sm:$0xff]  ;;  %v1208_v30 = vld [vmem:[%s2177_s6 + $0x1e8] sm:$0xff] }
 0x10b   :  { %1374 = vmatprep.subr.bf16.mxu1 %v1373_v37  ;;  %v1415_v37 = vpack.c.bf16 %v1182_v36, %v1181_v35  ;;  %v866_v31 = vld [vmem:[%s2177_s6 + $0x60] sm:$0xff]  ;;  %v867_v32 = vld [vmem:[%s2177_s6 + $0x68] sm:$0xff] }
 0x10c   :  { %568 = vmatpush1.bf16.msra.mxu0 %v1506_v61  ;;  %v1191_v35 = vld [vmem:[%s2177_s6 + $0x160] sm:$0xff]  ;;  %v1192_v36 = vld [vmem:[%s2177_s6 + $0x168] sm:$0xff] }
 0x10d   :  { %569 = vmatprep.subr.bf16.mxu0 %v1511_v62 }
 0x10e   :  { %1376 = vmatpush1.bf16.msra.mxu1 %v1375_v39  ;;  %v875_v39 = vld [vmem:[%s2177_s6 + $0xa8] sm:$0xff] }
 0x10f   :  { %1378 = vmatprep.subr.bf16.mxu1 %v1377_v16  ;;  %v1397_v16 = vpack.c.bf16 %v881_v14, %v880_v13 }
 0x110   :  { %570 = vmatpush1.bf16.msra.mxu0 %v1509_v63 }
 0x111   :  { %571 = vmatprep.subr.bf16.mxu0 %v1514_v0 }
 0x114   :  { %572 = vmatpush1.bf16.msra.mxu0 %v1512_v24 }
 0x115   :  { %573 = vmatprep.subr.bf16.mxu0 %v1517_v1 }
 0x118   :  { %574 = vmatpush1.bf16.msra.mxu0 %v1515_v2 }
 0x119   :  { %575 = vmatprep.subr.bf16.mxu0 %v1520_v3 }
 0x11c   :  { %576 = vmatpush1.bf16.msra.mxu0 %v1518_v4 }
 0x11d   :  { %577 = vmatprep.subr.bf16.mxu0 %v1523_v5 }
 0x120   :  { %578 = vmatpush1.bf16.msra.mxu0 %v1521_v6 }
 0x121   :  { %579 = vmatprep.subr.bf16.mxu0 %v1526_v7 }
 0x124   :  { %580 = vmatpush1.bf16.msra.mxu0 %v1524_v8 }
 0x125   :  { %1410 = vmatprep.subr.bf16.mxu0 %v1409_v20  ;;  %v1429_v20 = vpack.c.bf16 %v1206_v17, %v1205_v15 }
 0x127   :  { %598 = vmatmul.mubr.bf16.vlgmr.msra.gmra.mrb[0].mxu0 %v467_v47 }
 0x128   :  { %1412 = vmatpush3.bf16.msra.mxu0 %v1411_v25  ;;  %v1431_v25 = vpack.c.bf16 %v1190_v23, %v1189_v22 }
 0x129   :  { %1414 = vmatprep.subr.bf16.mxu0 %v1413_v33  ;;  %v1433_v33 = vpack.c.bf16 %v1208_v30, %v1207_v28 }
 0x12c   :  { %1416 = vmatpush3.bf16.msra.mxu0 %v1415_v37  ;;  %v1435_v37 = vpack.c.bf16 %v1192_v36, %v1191_v35 }
 0x1fa   :  { %v1945_v40 = vpop.f32.mrb[0].mxu0 }
 0x1fb   :  { %v1947_v41 = vpop.f32.mrb[1].mxu0  ;;  %v626_v43 = vmul.f32 %v1945_v40, %v1945_v40 }
 0x1fc   :  { %v1949_v42 = vpop.f32.mrb[2].mxu0  ;;  %v627_v47 = vmul.f32 %v1947_v41, %v1947_v41 }
 0x1fd   :  { %v612_v44 = vadd.f32 %v1949_v42, %v1945_v40  ;;  %v628_v45 = vmul.f32 %v1949_v42, %v1949_v42  ;;  %v1957_v46 = vpop.f32.mrb[3].mxu0 }
 0x1fe   :  { %v619_v48 = vadd.f32 %v1957_v46, %v1947_v41  ;;  %v629_v49 = vmul.f32 %v1957_v46, %v1957_v46 }
 0x1ff   :  { %v613_v50 = vrot.slane %v612_v44, 4  ;;  %v630_v51 = vadd.f32 %v628_v45, %v626_v43  ;;  %v1199_v43 = vld [vmem:[%s2177_s6 + $0x1a0] sm:$0xff]  ;;  %v1200_v45 = vld [vmem:[%s2177_s6 + $0x1a8] sm:$0xff] }
 0x200   :  { %v620_v52 = vrot.slane %v619_v48, 4  ;;  %v637_v53 = vadd.f32 %v629_v49, %v627_v47  ;;  %v858_v47 = vld [vmem:[%s2177_s6 + $0x20] sm:$0xff]  ;;  %v1417_v49 = vpack.c.bf16 %v1200_v45, %v1199_v43  ;;  %v1209_v43 = vld [vmem:[%s2177_s6 + $0x1f0] sm:$0xff]  ;;  %v1210_v45 = vld [vmem:[%s2177_s6 + $0x1f8] sm:$0xff] }
 0x201   :  { %v614_v54 = vadd.f32 %v613_v50, %v612_v44  ;;  %v631_v55 = vrot.slane %v630_v51, 4  ;;  %v1385_v44 = vpack.c.bf16 %v875_v39, %v874_v38  ;;  %v884_v38 = vld [vmem:[%s2177_s6 + $0xf0] sm:$0xff]  ;;  %v885_v39 = vld [vmem:[%s2177_s6 + $0xf8] sm:$0xff] }
 0x202   :  { %v621_v56 = vadd.f32 %v620_v52, %v619_v48  ;;  %v638_v57 = vrot.slane %v637_v53, 4  ;;  %v859_v48 = vld [vmem:[%s2177_s6 + $0x28] sm:$0xff]  ;;  %1418 = vmatprep.subr.bf16.mxu0 %v1417_v49  ;;  %v1437_v49 = vpack.c.bf16 %v1210_v45, %v1209_v43 }
 0x203   :  { %v615_v58 = vrot.slane %v614_v54, 2  ;;  %v632_v59 = vadd.f32 %v631_v55, %v630_v51  ;;  %v1387_v50 = vpack.c.bf16 %v859_v48, %v858_v47  ;;  %v1183_v51 = vld [vmem:[%s2177_s6 + $0x120] sm:$0xff]  ;;  %v1184_v52 = vld [vmem:[%s2177_s6 + $0x128] sm:$0xff]  ;;  %v877_v55 = vld [vmem:[%s2177_s6 + $0xb8] sm:$0xff] }
 0x204   :  { %v622_v60 = vrot.slane %v621_v56, 2  ;;  %v639_v61 = vadd.f32 %v638_v57, %v637_v53  ;;  %v1419_v53 = vpack.c.bf16 %v1184_v52, %v1183_v51  ;;  %v868_v47 = vld [vmem:[%s2177_s6 + $0x70] sm:$0xff]  ;;  %v869_v48 = vld [vmem:[%s2177_s6 + $0x78] sm:$0xff] }
 0x205   :  { %v616_v62 = vadd.f32 %v615_v58, %v614_v54  ;;  %v633_v63 = vrot.slane %v632_v59, 2  ;;  %v876_v54 = vld [vmem:[%s2177_s6 + $0xb0] sm:$0xff]  ;;  %v1202_v58 = vld [vmem:[%s2177_s6 + $0x1b8] sm:$0xff] }
 0x206   :  { %v623_v0 = vadd.f32 %v622_v60, %v621_v56  ;;  %v640_v24 = vrot.slane %v639_v61, 2  ;;  %v1201_v56 = vld [vmem:[%s2177_s6 + $0x1b0] sm:$0xff]  ;;  %1420 = vmatpush3.bf16.msra.mxu0 %v1419_v53  ;;  %v1389_v57 = vpack.c.bf16 %v877_v55, %v876_v54  ;;  %v861_v60 = vld [vmem:[%s2177_s6 + $0x38] sm:$0xff]  ;;  %v794_v54 = vlaneseq }
 0x207   :  { %v617_v1 = vrot.slane %v616_v62, 1  ;;  %v634_v2 = vadd.f32 %v633_v63, %v632_v59  ;;  %v860_v59 = vld [vmem:[%s2177_s6 + $0x30] sm:$0xff]  ;;  %v1194_v52 = vld [vmem:[%s2177_s6 + $0x178] sm:$0xff] }
 0x208   :  { %v624_v3 = vrot.slane %v623_v0, 1  ;;  %v641_v4 = vadd.f32 %v640_v24, %v639_v61  ;;  %v1421_v61 = vpack.c.bf16 %v1202_v58, %v1201_v56  ;;  %v1185_v63 = vld [vmem:[%s2177_s6 + $0x130] sm:$0xff]  ;;  %v795_v55 = vshrl.u32 %v794_v54, 7 }
 0x209   :  { %v635_v5 = vrot.slane %v634_v2, 1  ;;  %v618_v7 = vadd.f32 %v617_v1, %v616_v62  ;;  %v1391_v62 = vpack.c.bf16 %v861_v60, %v860_v59  ;;  %v878_v1 = vld [vmem:[%s2177_s6 + $0xc0] sm:$0xff]  ;;  %v1193_v51 = vld [vmem:[%s2177_s6 + $0x170] sm:$0xff] }
 0x20a   :  { %v642_v6 = vrot.slane %v641_v4, 1  ;;  %v625_v9 = vadd.f32 %v624_v3, %v623_v0  ;;  %v1186_v0 = vld [vmem:[%s2177_s6 + $0x138] sm:$0xff]  ;;  %1422 = vmatprep.subr.bf16.mxu0 %v1421_v61  ;;  %v1203_v3 = vld [vmem:[%s2177_s6 + $0x1c0] sm:$0xff]  ;;  %v1439_v53 = vpack.c.bf16 %v1194_v52, %v1193_v51  ;;  %v796_v56 = vsub.s32 0, %v795_v55 }
 0x20b   :  { %v636_v8 = vadd.f32 %v635_v5, %v634_v2  ;;  %v1423_v24 = vpack.c.bf16 %v1186_v0, %v1185_v63  ;;  %v879_v2 = vld [vmem:[%s2177_s6 + $0xc8] sm:$0xff] }
 0x20c   :  { %v643_v10 = vadd.f32 %v642_v6, %v641_v4  ;;  %v1393_v4 = vpack.c.bf16 %v879_v2, %v878_v1  ;;  %v1204_v5 = vld [vmem:[%s2177_s6 + $0x1c8] sm:$0xff]  ;;  %v862_v6 = vld [vmem:[%s2177_s6 + $0x40] sm:$0xff] }
 0x20d   :  { %v645_v11 = vsel %vm644_vm2, %v618_v7, %v636_v8  ;;  %1424 = vmatpush3.bf16.msra.mxu0 %v1423_v24  ;;  %v863_v7 = vld [vmem:[%s2177_s6 + $0x48] sm:$0xff]  ;;  %v1425_v8 = vpack.c.bf16 %v1204_v5, %v1203_v3 }
 0x20e   :  { %v646_v12 = vsel %vm644_vm2, %v625_v9, %v643_v10  ;;  %v1395_v9 = vpack.c.bf16 %v863_v7, %v862_v6  ;;  %v1187_v10 = vld [vmem:[%s2177_s6 + $0x140] sm:$0xff] }
 0x20f   :  { %775 = vmatprep.mubr.f32.mxu1 %v646_v12  ;;  %1426 = vmatprep.subr.bf16.mxu0 %v1425_v8 }
 0x210   :  { %776 = vmatmul.mubr.f32.vlgmr.msra.gmra.mrb[12].mxu1 %v645_v11  ;;  %v1188_v11 = vld [vmem:[%s2177_s6 + $0x148] sm:$0xff] }
 0x211   :  { %1380 = vmatpush3.bf16.msra.mxu1 %v1379_v21  ;;  %v1427_v12 = vpack.c.bf16 %v1188_v11, %v1187_v10  ;;  %v1399_v21 = vpack.c.bf16 %v865_v19, %v864_v18  ;;  %v812_v10 = vsub.s32 1, %v795_v55  ;;  %v822_v11 = vld [vmem:[%s2178_s4] sm:$0x3] }
 0x212   :  { %1382 = vmatprep.subr.bf16.mxu1 %v1381_v29  ;;  %v1401_v29 = vpack.c.bf16 %v883_v27, %v882_v26 }
 0x213   :  { %1428 = vmatpush3.bf16.msra.mxu0 %v1427_v12  ;;  %v831_v14 = vrot.slane %v822_v11, %v812_v10 }
 0x214   :  { %1430 = vmatprep.subr.bf16.mxu0 %v1429_v20 }
 0x215   :  { %1384 = vmatpush3.bf16.msra.mxu1 %v1383_v34  ;;  %v1403_v34 = vpack.c.bf16 %v867_v32, %v866_v31 }
 0x216   :  { %1386 = vmatprep.subr.bf16.mxu1 %v1385_v44  ;;  %v1405_v44 = vpack.c.bf16 %v885_v39, %v884_v38 }
 0x217   :  { %1432 = vmatpush3.bf16.msra.mxu0 %v1431_v25 }
 0x218   :  { %1434 = vmatprep.subr.bf16.mxu0 %v1433_v33 }
 0x219   :  { %1388 = vmatpush3.bf16.msra.mxu1 %v1387_v50  ;;  %v1407_v50 = vpack.c.bf16 %v869_v48, %v868_v47 }
 0x21a   :  { %1390 = vmatprep.subr.bf16.mxu1 %v1389_v57 }
 0x21b   :  { %1436 = vmatpush3.bf16.msra.mxu0 %v1435_v37 }
 0x21c   :  { %1438 = vmatprep.subr.bf16.mxu0 %v1437_v49 }
 0x21d   :  { %1392 = vmatpush3.bf16.msra.mxu1 %v1391_v62 }
 0x21e   :  { %1394 = vmatprep.subr.bf16.mxu1 %v1393_v4 }
 0x21f   :  { %1440 = vmatpush3.bf16.msra.mxu0 %v1439_v53 }
 0x221   :  { %1396 = vmatpush3.bf16.msra.mxu1 %v1395_v9 }
 0x222   :  { %1398 = vmatprep.subr.bf16.mxu1 %v1397_v16 }
 0x225   :  { %1400 = vmatpush3.bf16.msra.mxu1 %v1399_v21 }
 0x226   :  { %1402 = vmatprep.subr.bf16.mxu1 %v1401_v29 }
 0x229   :  { %1404 = vmatpush3.bf16.msra.mxu1 %v1403_v34 }
 0x22a   :  { %1406 = vmatprep.subr.bf16.mxu1 %v1405_v44 }
 0x22d   :  { %1408 = vmatpush3.bf16.msra.mxu1 %v1407_v50 }
 0x2e3   :  { %v777_v57 = vpop.f32.mrb[12].mxu1 }
 0x2e4   :  { %v782_v58 = vmul.f32 0.0078125, %v777_v57  ;;  %v779_v59 = vpop.f32.mrb[13].mxu1 }
 0x2e5   :  { %v783_v60 = vmul.f32 0.0078125, %v779_v59 }
 0x2e6   :  { %v784_v61 = vmul.f32 %v782_v58, %v782_v58  ;;  %v797_v62 = vrot.slane %v782_v58, %v796_v56 }
 0x2e7   :  { %v785_v63 = vmul.f32 %v783_v60, %v783_v60  ;;  %v801_v0 = vrot.slane %v783_v60, %v796_v56 }
 0x2e8   :  { %v788_v24 = vrot.slane %v784_v61, 7  ;;  %v802_v1 = vsub.f32 %v1945_v40, %v797_v62  ;;  %v804_v2 = vsub.f32 %v1949_v42, %v797_v62  ;;  %v827_v42 = vrot.slane %v822_v11, %v796_v56 }
 0x2e9   :  { %v789_v3 = vrot.slane %v785_v63, 7  ;;  %v803_v4 = vsub.f32 %v1947_v41, %v801_v0  ;;  %v805_v5 = vsub.f32 %v1957_v46, %v801_v0  ;;  %v838_v41 = vld [vmem:[%s2179_s5] sm:$0x3] }
 0x2ea   :  { %v792_v6 = vsub.f32 %v782_v58, %v788_v24  ;;  %v847_v18 = vrot.slane %v838_v41, %v812_v10  ;;  %v843_v20 = vrot.slane %v838_v41, %v796_v56 }
 0x2eb   :  { %v793_v7 = vsub.f32 %v783_v60, %v789_v3 }
 0x2ec   :  { %v806_v8 = vadd.f32 1e-05, %v792_v6 }
 0x2ed   :  { %v807_v9 = vadd.f32 1e-05, %v793_v7 }
 0x2ee   :  { %1527 = vrsqrt.f32 %v806_v8 }
 0x2ef   :  { %1529 = vrsqrt.f32 %v807_v9 }
 0x2f8   :  { %v1528_v12 = vpop.eup %1527 }
 0x2f9   :  { %v1530_v40 = vpop.eup %1529  ;;  %v813_v13 = vrot.slane %v1528_v12, %v812_v10 }
 0x2fa   :  { %v817_v46 = vrot.slane %v1530_v40, %v812_v10 }
 0x2fb   :  { %v818_v15 = vmul.f32 %v813_v13, %v802_v1  ;;  %v820_v16 = vmul.f32 %v813_v13, %v804_v2 }
 0x2fc   :  { %v819_v17 = vmul.f32 %v817_v46, %v803_v4  ;;  %v821_v19 = vmul.f32 %v817_v46, %v805_v5 }
 0x2fd   :  { %v834_v21 = vmul.f32 %v827_v42, %v818_v15  ;;  %v836_v27 = vmul.f32 %v827_v42, %v820_v16 }
 0x2fe   :  { %v835_v22 = vmul.f32 %v831_v14, %v819_v17  ;;  %v837_v23 = vmul.f32 %v831_v14, %v821_v19 }
 0x2ff   :  { %v850_v26 = vadd.f32 %v843_v20, %v834_v21  ;;  %v852_v29 = vadd.f32 %v843_v20, %v836_v27 }
 0x300   :  { %v851_v25 = vadd.f32 %v847_v18, %v835_v22  ;;  %v853_v28 = vadd.f32 %v847_v18, %v837_v23 }
 0x302   :  { %950 = vmatprep.mubr.f32.mxu1 %v851_v25  ;;  %1058 = vmatprep.mubr.f32.mxu0 %v851_v25 }
 0x303   :  { %951 = vmatmul.mubr.f32.vlgmr.msra.gmra.mrb[14].mxu1 %v850_v26  ;;  %1059 = vmatmul.mubr.f32.vlgmr.msra.gmra.mrb[4].mxu0 %v850_v26 }
 0x304   :  { %955 = vmatprep.mubr.f32.mxu1 %v853_v28  ;;  %1063 = vmatprep.mubr.f32.mxu0 %v853_v28 }
 0x307   :  { %956 = vmatmul.mubr.f32.gmra.mrb[16].mxu1 %v852_v29  ;;  %1064 = vmatmul.mubr.f32.gmra.mrb[6].mxu0 %v852_v29 }
 0x3d6   :  { %v1251_v30 = vpop.f32.mrb[14].mxu1  ;;  %v1289_v31 = vpop.f32.mrb[4].mxu0 }
 0x3d7   :  { %v1252_v32 = vpop.f32.mrb[15].mxu1  ;;  %v1290_v33 = vpop.f32.mrb[5].mxu0 }
 0x3d8   :  { %v1253_v34 = vadd.f32 %v1252_v32, %v1251_v30  ;;  %v1291_v35 = vadd.f32 %v1290_v33, %v1289_v31 }
 0x3da   :  { %v1211_v36 = vmul.f32 -1.442695, %v1291_v35  ;;  %v1254_v37 = vpop.f32.mrb[16].mxu1  ;;  %v1292_v38 = vpop.f32.mrb[6].mxu0 }
 0x3db   :  { %v1255_v39 = vpop.f32.mrb[17].mxu1  ;;  %v1293_v43 = vpop.f32.mrb[7].mxu0 }
 0x3dc   :  { %1531 = vpow2.f32 %v1211_v36  ;;  %v1256_v44 = vadd.f32 %v1255_v39, %v1254_v37  ;;  %v1294_v45 = vadd.f32 %v1293_v43, %v1292_v38 }
 0x3de   :  { %v1212_v47 = vmul.f32 -1.442695, %v1294_v45 }
 0x3e0   :  { %1533 = vpow2.f32 %v1212_v47 }
 0x3e6   :  { %v1532_v48 = vpop.eup %1531 }
 0x3e7   :  { %v1075_v49 = vadd.f32 1.0, %v1532_v48 }
 0x3e9   :  { %1535 = vrcp.f32 %v1075_v49 }
 0x3ea   :  { %v1534_v50 = vpop.eup %1533 }
 0x3eb   :  { %v1076_v51 = vadd.f32 1.0, %v1534_v50 }
 0x3ed   :  { %1537 = vrcp.f32 %v1076_v51 }
 0x3f3   :  { %v1536_v52 = vpop.eup %1535 }
 0x3f4   :  { %v1081_v53 = vmul.f32 %v1536_v52, %v1253_v34 }
 0x3f6   :  { %1083 = vst [vmem:[%s2180_s7] sm:$0xff] %v1081_v53 }
 0x3f7   :  { %v1538_v54 = vpop.eup %1537 }
 0x3f8   :  { %v1082_v55 = vmul.f32 %v1538_v54, %v1256_v44 }
 0x3fa   :  { %1084 = vst [vmem:[%s2180_s7 + $0x8] sm:$0xff] %v1082_v55 }

// kernel: next_stage_generator.8
= control target key start
LH: loop header
LB: loop body
LE: loop exit
PB: predicated region body
PF: predicated region fallthrough
CT: control target
= control target key end

     0   :  { %v953_v0 = vmov 0.0   ;;  %vm954_vm0 = vmmov 0   ;;  %vm37_vm1 = vcmask 130048   ;;  %v955_v41 = vmov 0.0|0.0   ;;  %s1198_s0 = inlined_call_operand.vmem [shape: f32[16,128], index: 0, kind: input, shape index: {}]   ;;  %s1199_s2 = inlined_call_operand.vmem [shape: bf16[3,16,16], index: 2, kind: input, shape index: {}]   ;;  %s1200_s1 = inlined_call_operand.vmem [shape: bf16[3,128,128], index: 1, kind: input, shape index: {}]   ;;  %s1201_s3 = inlined_call_operand.vmem [shape: f32[128,128], index: 3, kind: input, shape index: {}]   ;;  %s1202_s4 = inlined_call_operand.vmem [shape: f32[1,128], index: 4, kind: input, shape index: {}]   ;;  %s1203_s5 = inlined_call_operand.vmem [shape: f32[1,128], index: 5, kind: input, shape index: {}]   ;;  %s1204_s6 = inlined_call_operand.vmem [shape: f32[16,128], index: 6, kind: input, shape index: {}]   ;;  %s1205_s7 = inlined_call_operand.vmem [shape: f32[16,128], index: 7, kind: output, shape index: {}]  }
   0x1   :  { %784 = vmatprep.subr.bf16.mxu1 %v953_v0  ;;  %v27_v1 = vld [vmem:[%s1198_s0] sm:$0xff]  ;;  %v28_v2 = vld [vmem:[%s1198_s0 + $0x8] sm:$0xff]  ;;  %786 = vmatprep.mubr.msk.bf16.mxu1 %vm954_vm0, %v953_v0  ;;  %v928_v8 = vld [vmem:[%s1200_s1 + $0x50] sm:$0xff]   ;;  %vm524_vm2 = vcmask 1040384  }
   0x2   :  { %v1005_v3 = vpack.c.bf16 %v28_v2, %v27_v1  ;;  %778 = vmatprep.subr.bf16.mxu0 %v953_v0  ;;  %780 = vmatprep.mubr.msk.bf16.mxu0 %vm954_vm0, %v953_v0  ;;  %v924_v4 = vld [vmem:[%s1199_s2 + $0x8] sm:$0xff]   ;;  %v925_v5 = vld [vmem:[%s1200_s1 + $0x40] sm:$0xff]   ;;  %v929_v9 = vld [vmem:[%s1200_s1 + $0x58] sm:$0xff]  }
   0x3   :  { %v927_v6 = vld [vmem:[%s1199_s2] sm:$0xff]   ;;  %v926_v7 = vld [vmem:[%s1200_s1 + $0x48] sm:$0xff]   ;;  %v932_v12 = vld [vmem:[%s1200_s1 + $0x70] sm:$0xff]  }
   0x4   :  { %785 = vmatpush3.bf16.msra.mxu1 %v1005_v3  ;;  %779 = vmatpush3.bf16.msra.mxu0 %v1005_v3  ;;  %v930_v10 = vld [vmem:[%s1200_s1 + $0x60] sm:$0xff]   ;;  %v931_v11 = vld [vmem:[%s1200_s1 + $0x68] sm:$0xff]   ;;  %v933_v13 = vld [vmem:[%s1200_s1 + $0x78] sm:$0xff]  }
   0x5   :  { %790 = vmatprep.subr.bf16.mxu1 %v953_v0  ;;  %810 = vmatprep.subr.bf16.mxu0 %v953_v0  ;;  %v935_v14 = vld [vmem:[%s1200_s1] sm:$0xff]   ;;  %v936_v15 = vld [vmem:[%s1200_s1 + $0x8] sm:$0xff]   ;;  %v937_v16 = vld [vmem:[%s1200_s1 + $0x10] sm:$0xff]  }
   0x6   :  { %v938_v17 = vld [vmem:[%s1200_s1 + $0x18] sm:$0xff]   ;;  %v939_v18 = vld [vmem:[%s1200_s1 + $0x20] sm:$0xff]   ;;  %v940_v19 = vld [vmem:[%s1200_s1 + $0x28] sm:$0xff]  }
   0x7   :  { %787 = vmatmul.mubr.msk.bf16.vlgmr.msra.gmra.mrb[0].mxu1 %vm37_vm1, %v924_v4  ;;  %781 = vmatmul.mubr.msk.bf16.vlgmr.msra.gmra.mrb[0].mxu0 %vm37_vm1, %v927_v6  ;;  %v941_v20 = vld [vmem:[%s1200_s1 + $0x30] sm:$0xff]   ;;  %v942_v21 = vld [vmem:[%s1200_s1 + $0x38] sm:$0xff]   ;;  %v943_v32 = vld [vmem:[%s1200_s1 + $0x80] sm:$0xff]  }
   0x8   :  { %791 = vmatpush3.bf16.msra.mxu1 %v925_v5  ;;  %806 = vmatprep.mubr.msk.bf16.mxu1 %vm954_vm0, %v953_v0  ;;  %v944_v33 = vld [vmem:[%s1200_s1 + $0x88] sm:$0xff]   ;;  %v934_v34 = vld [vmem:[%s1199_s2 + $0x10] sm:$0xff]   ;;  %v946_v36 = vld [vmem:[%s1200_s1 + $0x98] sm:$0xff]  }
   0x9   :  { %792 = vmatprep.subr.bf16.mxu1 %v953_v0  ;;  %826 = vmatprep.mubr.msk.bf16.mxu0 %vm954_vm0, %v953_v0  ;;  %v945_v35 = vld [vmem:[%s1200_s1 + $0x90] sm:$0xff]   ;;  %v947_v37 = vld [vmem:[%s1200_s1 + $0xa0] sm:$0xff]   ;;  %v948_v38 = vld [vmem:[%s1200_s1 + $0xa8] sm:$0xff]  }
   0xa   :  { %811 = vmatpush3.bf16.msra.mxu0 %v935_v14  ;;  %v949_v39 = vld [vmem:[%s1200_s1 + $0xb0] sm:$0xff]   ;;  %v950_v40 = vld [vmem:[%s1200_s1 + $0xb8] sm:$0xff]   ;;  %v526_v42 = vld [vmem:[%s1201_s3] sm:$0xff] }
   0xb   :  { %812 = vmatprep.subr.bf16.mxu0 %v953_v0  ;;  %v527_v43 = vld [vmem:[%s1201_s3 + $0x8] sm:$0xff]  ;;  %v528_v44 = vld [vmem:[%s1201_s3 + $0x10] sm:$0xff]  ;;  %v529_v46 = vld [vmem:[%s1201_s3 + $0x18] sm:$0xff] }
   0xc   :  { %793 = vmatpush3.bf16.msra.mxu1 %v926_v7  ;;  %v892_v45 = vpack.c.bf16 %v527_v43, %v526_v42  ;;  %v895_v47 = vpack.c.bf16 %v529_v46, %v528_v44  ;;  %v530_v48 = vld [vmem:[%s1201_s3 + $0x20] sm:$0xff]  ;;  %v531_v49 = vld [vmem:[%s1201_s3 + $0x28] sm:$0xff]  ;;  %v532_v60 = vld [vmem:[%s1201_s3 + $0x30] sm:$0xff] }
   0xd   :  { %794 = vmatprep.subr.bf16.mxu1 %v953_v0  ;;  %v898_v50 = vpack.c.bf16 %v531_v49, %v530_v48  ;;  %v533_v61 = vld [vmem:[%s1201_s3 + $0x38] sm:$0xff]  ;;  %v534_v63 = vld [vmem:[%s1201_s3 + $0x40] sm:$0xff]  ;;  %v536_v2 = vld [vmem:[%s1201_s3 + $0x50] sm:$0xff] }
   0xe   :  { %813 = vmatpush3.bf16.msra.mxu0 %v936_v15  ;;  %v901_v62 = vpack.c.bf16 %v533_v61, %v532_v60  ;;  %v538_v5 = vld [vmem:[%s1201_s3 + $0x60] sm:$0xff]  ;;  %v539_v6 = vld [vmem:[%s1201_s3 + $0x68] sm:$0xff] }
   0xf   :  { %814 = vmatprep.subr.bf16.mxu0 %v953_v0  ;;  %v910_v7 = vpack.c.bf16 %v539_v6, %v538_v5 }
  0x10   :  { %795 = vmatpush3.bf16.msra.mxu1 %v928_v8  ;;  %v540_v8 = vld [vmem:[%s1201_s3 + $0x70] sm:$0xff] }
  0x11   :  { %796 = vmatprep.subr.bf16.mxu1 %v953_v0 }
  0x12   :  { %815 = vmatpush3.bf16.msra.mxu0 %v937_v16 }
  0x13   :  { %816 = vmatprep.subr.bf16.mxu0 %v953_v0 }
  0x14   :  { %797 = vmatpush3.bf16.msra.mxu1 %v929_v9  ;;  %v541_v9 = vld [vmem:[%s1201_s3 + $0x78] sm:$0xff] }
  0x15   :  { %798 = vmatprep.subr.bf16.mxu1 %v953_v0 }
  0x16   :  { %817 = vmatpush3.bf16.msra.mxu0 %v938_v17 }
  0x17   :  { %818 = vmatprep.subr.bf16.mxu0 %v953_v0 }
  0x18   :  { %799 = vmatpush3.bf16.msra.mxu1 %v930_v10  ;;  %v913_v10 = vpack.c.bf16 %v541_v9, %v540_v8 }
  0x19   :  { %800 = vmatprep.subr.bf16.mxu1 %v953_v0 }
  0x1a   :  { %819 = vmatpush3.bf16.msra.mxu0 %v939_v18 }
  0x1b   :  { %820 = vmatprep.subr.bf16.mxu0 %v953_v0 }
  0x1c   :  { %801 = vmatpush3.bf16.msra.mxu1 %v931_v11 }
  0x1d   :  { %802 = vmatprep.subr.bf16.mxu1 %v953_v0 }
  0x1e   :  { %821 = vmatpush3.bf16.msra.mxu0 %v940_v19 }
  0x1f   :  { %822 = vmatprep.subr.bf16.mxu0 %v953_v0 }
  0x20   :  { %803 = vmatpush3.bf16.msra.mxu1 %v932_v12 }
  0x21   :  { %804 = vmatprep.subr.bf16.mxu1 %v953_v0 }
  0x22   :  { %823 = vmatpush3.bf16.msra.mxu0 %v941_v20 }
  0x23   :  { %824 = vmatprep.subr.bf16.mxu0 %v953_v0 }
  0x24   :  { %805 = vmatpush3.bf16.msra.mxu1 %v933_v13 }
  0x25   :  { %830 = vmatprep.subr.bf16.mxu1 %v953_v0 }
  0x26   :  { %825 = vmatpush3.bf16.msra.mxu0 %v942_v21 }
  0x27   :  { %836 = vmatprep.subr.bf16.mxu0 %v953_v0 }
  0xda   :  { %v144_v22 = vpop.f32.mrb[0].mxu1  ;;  %v75_v23 = vpop.f32.mrb[0].mxu0 }
  0xdb   :  { %v788_v24 = vpop.f32.mrb[1].mxu1  ;;  %v782_v25 = vpop.f32.mrb[1].mxu0 }
  0xdc   :  { %v147_v26 = vpop.f32.mrb[2].mxu1  ;;  %v78_v27 = vpop.f32.mrb[2].mxu0 }
  0xdd   :  { %v151_v28 = vpack.c.bf16 %v147_v26, %v144_v22  ;;  %v789_v29 = vpop.f32.mrb[3].mxu1  ;;  %v82_v30 = vpack.c.bf16 %v78_v27, %v75_v23  ;;  %v783_v31 = vpop.f32.mrb[3].mxu0 }
  0xdf   :  { %807 = vmatmul.mubr.bf16.vlgmr.msra.gmra.mrb[4].mxu1 %v151_v28  ;;  %827 = vmatmul.mubr.bf16.vlgmr.msra.gmra.mrb[4].mxu0 %v82_v30 }
  0xe0   :  { %831 = vmatpush3.bf16.msra.mxu1 %v1005_v3  ;;  %832 = vmatprep.mubr.msk.bf16.mxu1 %vm954_vm0, %v953_v0  ;;  %v537_v3 = vld [vmem:[%s1201_s3 + $0x58] sm:$0xff] }
  0xe1   :  { %837 = vmatpush3.bf16.msra.mxu0 %v943_v32  ;;  %852 = vmatprep.mubr.msk.bf16.mxu0 %vm954_vm0, %v953_v0  ;;  %v907_v4 = vpack.c.bf16 %v537_v3, %v536_v2 }
  0xe2   :  { %838 = vmatprep.subr.bf16.mxu0 %v953_v0  ;;  %891 = vmatprep.subr.bf16.mxu1 %v955_v41 }
  0xe5   :  { %839 = vmatpush3.bf16.msra.mxu0 %v944_v33 }
  0xe6   :  { %840 = vmatprep.subr.bf16.mxu0 %v953_v0 }
  0xe7   :  { %833 = vmatmul.mubr.msk.bf16.vlgmr.msra.gmra.mrb[8].mxu1 %vm37_vm1, %v934_v34 }
  0xe8   :  { %888 = vmatprep.mubr.msk.f32.mxu1 %vm954_vm0, %v953_v0  ;;  %893 = vmatpush3.bf16.msra.mxu1 %v892_v45 }
  0xe9   :  { %841 = vmatpush3.bf16.msra.mxu0 %v945_v35  ;;  %894 = vmatprep.subr.bf16.mxu1 %v955_v41 }
  0xea   :  { %842 = vmatprep.subr.bf16.mxu0 %v953_v0 }
  0xec   :  { %896 = vmatpush3.bf16.msra.mxu1 %v895_v47 }
  0xed   :  { %843 = vmatpush3.bf16.msra.mxu0 %v946_v36  ;;  %897 = vmatprep.subr.bf16.mxu1 %v955_v41 }
  0xee   :  { %844 = vmatprep.subr.bf16.mxu0 %v953_v0 }
  0xf0   :  { %899 = vmatpush3.bf16.msra.mxu1 %v898_v50  ;;  %v726_v50 = vld [vmem:[%s1202_s4] ss:$0 sm:$0xff] }
  0xf1   :  { %845 = vmatpush3.bf16.msra.mxu0 %v947_v37  ;;  %900 = vmatprep.subr.bf16.mxu1 %v955_v41 }
  0xf2   :  { %846 = vmatprep.subr.bf16.mxu0 %v953_v0 }
  0xf4   :  { %902 = vmatpush3.bf16.msra.mxu1 %v901_v62 }
  0xf5   :  { %847 = vmatpush3.bf16.msra.mxu0 %v948_v38  ;;  %903 = vmatprep.subr.bf16.mxu1 %v955_v41 }
  0xf6   :  { %848 = vmatprep.subr.bf16.mxu0 %v953_v0 }
  0xf9   :  { %849 = vmatpush3.bf16.msra.mxu0 %v949_v39  ;;  %v618_v39 = vlaneseq }
  0xfa   :  { %850 = vmatprep.subr.bf16.mxu0 %v953_v0  ;;  %v535_v0 = vld [vmem:[%s1201_s3 + $0x48] sm:$0xff] }
  0xfb   :  { %v904_v1 = vpack.c.bf16 %v535_v0, %v534_v63  ;;  %v619_v42 = vshrl.u32 %v618_v39, 7 }
  0xfd   :  { %851 = vmatpush3.bf16.msra.mxu0 %v950_v40  ;;  %905 = vmatpush3.bf16.msra.mxu1 %v904_v1  ;;  %v620_v43 = vsub.s32 0, %v619_v42  ;;  %v628_v45 = vsub.s32 1, %v619_v42 }
  0xfe   :  { %906 = vmatprep.subr.bf16.mxu1 %v955_v41 }
 0x101   :  { %908 = vmatpush3.bf16.msra.mxu1 %v907_v4 }
 0x102   :  { %909 = vmatprep.subr.bf16.mxu1 %v955_v41 }
 0x105   :  { %911 = vmatpush3.bf16.msra.mxu1 %v910_v7 }
 0x106   :  { %912 = vmatprep.subr.bf16.mxu1 %v955_v41 }
 0x109   :  { %914 = vmatpush3.bf16.msra.mxu1 %v913_v10 }
 0x1b2   :  { %v251_v51 = vpop.f32.mrb[4].mxu1 }
 0x1b3   :  { %v808_v52 = vpop.f32.mrb[5].mxu1 }
 0x1b4   :  { %v254_v53 = vpop.f32.mrb[6].mxu1 }
 0x1b5   :  { %v809_v54 = vpop.f32.mrb[7].mxu1 }
 0x1ba   :  { %v392_v55 = vpop.f32.mrb[8].mxu1 }
 0x1bb   :  { %v834_v56 = vpop.f32.mrb[9].mxu1 }
 0x1bc   :  { %v395_v57 = vpop.f32.mrb[10].mxu1  ;;  %v650_v56 = vld [vmem:[%s1204_s6] sm:$0xff] }
 0x1bd   :  { %v399_v58 = vpack.c.bf16 %v395_v57, %v392_v55  ;;  %v835_v59 = vpop.f32.mrb[11].mxu1  ;;  %v651_v57 = vld [vmem:[%s1204_s6 + $0x8] sm:$0xff] }
 0x1bf   :  { %853 = vmatmul.mubr.bf16.vlgmr.msra.gmra.mrb[4].mxu0 %v399_v58 }
 0x292   :  { %v499_v11 = vpop.f32.mrb[4].mxu0 }
 0x293   :  { %v915_v12 = vadd.f32 %v499_v11, %v251_v51  ;;  %v854_v13 = vpop.f32.mrb[5].mxu0 }
 0x294   :  { %v502_v14 = vpop.f32.mrb[6].mxu0 }
 0x295   :  { %v916_v15 = vadd.f32 %v502_v14, %v254_v53  ;;  %v855_v16 = vpop.f32.mrb[7].mxu0  ;;  %v515_v17 = vmul.f32 %v915_v12, %v915_v12  ;;  %v727_v53 = vld [vmem:[%s1203_s5] ss:$0 sm:$0xff] }
 0x297   :  { %v508_v18 = vadd.f32 %v916_v15, %v915_v12  ;;  %v516_v19 = vmul.f32 %v916_v15, %v916_v15 }
 0x299   :  { %v509_v20 = vrot.slane %v508_v18, 4  ;;  %v517_v21 = vadd.f32 %v516_v19, %v515_v17 }
 0x29b   :  { %v510_v22 = vadd.f32 %v509_v20, %v508_v18  ;;  %v518_v23 = vrot.slane %v517_v21, 4 }
 0x29d   :  { %v511_v24 = vrot.slane %v510_v22, 2  ;;  %v519_v25 = vadd.f32 %v518_v23, %v517_v21 }
 0x29f   :  { %v512_v26 = vadd.f32 %v511_v24, %v510_v22  ;;  %v520_v27 = vrot.slane %v519_v25, 2 }
 0x2a1   :  { %v513_v28 = vrot.slane %v512_v26, 1  ;;  %v521_v29 = vadd.f32 %v520_v27, %v519_v25 }
 0x2a3   :  { %v522_v30 = vrot.slane %v521_v29, 1  ;;  %v514_v31 = vadd.f32 %v513_v28, %v512_v26 }
 0x2a5   :  { %v523_v32 = vadd.f32 %v522_v30, %v521_v29 }
 0x2a7   :  { %v525_v33 = vsel %vm524_vm2, %v514_v31, %v523_v32 }
 0x2a8   :  { %889 = vmatmul.mubr.f32.vlgmr.msra.gmra.mrb[12].mxu1 %v525_v33 }
 0x37b   :  { %v608_v34 = vpop.f32.mrb[12].mxu1 }
 0x37c   :  { %v612_v35 = vmul.f32 0.0078125, %v608_v34  ;;  %v890_v36 = vpop.f32.mrb[13].mxu1 }
 0x37e   :  { %v613_v37 = vmul.f32 %v612_v35, %v612_v35  ;;  %v621_v44 = vrot.slane %v612_v35, %v620_v43 }
 0x380   :  { %v615_v38 = vrot.slane %v613_v37, 7  ;;  %v622_v47 = vsub.f32 %v915_v12, %v621_v44  ;;  %v623_v48 = vsub.f32 %v916_v15, %v621_v44 }
 0x382   :  { %v617_v40 = vsub.f32 %v612_v35, %v615_v38 }
 0x384   :  { %v624_v41 = vadd.f32 1e-05, %v617_v40 }
 0x386   :  { %951 = vrsqrt.f32 %v624_v41 }
 0x390   :  { %v952_v46 = vpop.eup %951 }
 0x391   :  { %v629_v49 = vrot.slane %v952_v46, %v628_v45 }
 0x393   :  { %v630_v51 = vmul.f32 %v629_v49, %v622_v47  ;;  %v631_v52 = vmul.f32 %v629_v49, %v623_v48 }
 0x395   :  { %v639_v54 = vmul.f32 %v726_v50, %v630_v51  ;;  %v640_v55 = vmul.f32 %v726_v50, %v631_v52 }
 0x397   :  { %v648_v58 = vadd.f32 %v727_v53, %v639_v54  ;;  %v649_v59 = vadd.f32 %v727_v53, %v640_v55 }
 0x399   :  { %v652_v60 = vadd.f32 %v650_v56, %v648_v58  ;;  %v653_v61 = vadd.f32 %v651_v57, %v649_v59 }
 0x39b   :  { %654 = vst [vmem:[%s1205_s7] sm:$0xff] %v652_v60  ;;  %655 = vst [vmem:[%s1205_s7 + $0x8] sm:$0xff] %v653_v61 }

// kernel: next_stage_generator.11
= control target key start
LH: loop header
LB: loop body
LE: loop exit
PB: predicated region body
PF: predicated region fallthrough
CT: control target
= control target key end

     0   :  { %vm44_vm0 = vcmask 130048   ;;  %v1738_v26 = vmov 0   ;;  %vm747_vm1 = vcmask 1040384   ;;  %s2427_s0 = inlined_call_operand.vmem [shape: f32[16,128], index: 0, kind: input, shape index: {}]   ;;  %s2428_s2 = inlined_call_operand.vmem [shape: bf16[3,32,16], index: 2, kind: input, shape index: {}]   ;;  %s2429_s1 = inlined_call_operand.vmem [shape: bf16[3,128,256], index: 1, kind: input, shape index: {}]   ;;  %s2430_s3 = inlined_call_operand.vmem [shape: f32[256,256], index: 3, kind: input, shape index: {}]   ;;  %s2431_s6 = inlined_call_operand.vmem [shape: f32[2,256,128], index: 6, kind: input, shape index: {}]   ;;  %s2432_s4 = inlined_call_operand.vmem [shape: f32[1,256], index: 4, kind: input, shape index: {}]   ;;  %s2433_s5 = inlined_call_operand.vmem [shape: f32[1,256], index: 5, kind: input, shape index: {}]   ;;  %s2434_s7 = inlined_call_operand.vmem [shape: f32[32,128], index: 7, kind: output, shape index: {}]  }
   0x1   :  { %v27_v0 = vld [vmem:[%s2427_s0] sm:$0xff]  ;;  %v28_v1 = vld [vmem:[%s2427_s0 + $0x8] sm:$0xff]  ;;  %v1642_v5 = vld [vmem:[%s2428_s2 + $0x10] sm:$0xff]   ;;  %319 = vmatprep.mubr.bf16.mxu0 %v1738_v26 }
   0x2   :  { %v29_v2 = vpack.c.bf16 %v28_v1, %v27_v0  ;;  %v1640_v3 = vld [vmem:[%s2428_s2] sm:$0xff]   ;;  %v1641_v4 = vld [vmem:[%s2428_s2 + $0x8] sm:$0xff]   ;;  %v1649_v8 = vld [vmem:[%s2429_s1 + $0x94] ss:$8 sps:$4 sm:$0xff]  }
   0x3   :  { %1479 = vmatprep.mubr.msk.bf16.mxu1 %vm44_vm0, %v1640_v3  ;;  %v1646_v6 = vld [vmem:[%s2429_s1 + $0x84] ss:$8 sps:$4 sm:$0xff]   ;;  %v1648_v7 = vld [vmem:[%s2429_s1 + $0x80] ss:$8 sps:$4 sm:$0xff]   ;;  %v1643_v9 = vld [vmem:[%s2428_s2 + $0x18] sm:$0xff]  }
   0x4   :  { %1477 = vmatprep.subr.bf16.mxu1 %v29_v2  ;;  %287 = vmatprep.subr.bf16.mxu0 %v1646_v6  ;;  %v1651_v10 = vld [vmem:[%s2429_s1 + $0x90] ss:$8 sps:$4 sm:$0xff]   ;;  %v1644_v11 = vld [vmem:[%s2428_s2 + $0x20] sm:$0xff]   ;;  %v1655_v14 = vld [vmem:[%s2429_s1 + $0xb4] ss:$8 sps:$4 sm:$0xff]  }
   0x5   :  { %1478 = vmatpush3.bf16.msra.mxu1 %v29_v2  ;;  %288 = vmatpush1.bf16.msra.mxu0 %v1648_v7  ;;  %v1652_v12 = vld [vmem:[%s2429_s1 + $0xa4] ss:$8 sps:$4 sm:$0xff]   ;;  %v1654_v13 = vld [vmem:[%s2429_s1 + $0xa0] ss:$8 sps:$4 sm:$0xff]   ;;  %v1657_v15 = vld [vmem:[%s2429_s1 + $0xb0] ss:$8 sps:$4 sm:$0xff]  }
   0x6   :  { %1483 = vmatprep.subr.bf16.mxu1 %v29_v2  ;;  %289 = vmatprep.subr.bf16.mxu0 %v1649_v8  ;;  %v1645_v16 = vld [vmem:[%s2428_s2 + $0x28] sm:$0xff]   ;;  %v1661_v19 = vld [vmem:[%s2429_s1 + $0xd4] ss:$8 sps:$4 sm:$0xff]   ;;  %v1663_v20 = vld [vmem:[%s2429_s1 + $0xd0] ss:$8 sps:$4 sm:$0xff]  }
   0x7   :  { %v1658_v17 = vld [vmem:[%s2429_s1 + $0xc4] ss:$8 sps:$4 sm:$0xff]   ;;  %v1660_v18 = vld [vmem:[%s2429_s1 + $0xc0] ss:$8 sps:$4 sm:$0xff]   ;;  %v1667_v23 = vld [vmem:[%s2429_s1 + $0xf4] ss:$8 sps:$4 sm:$0xff]  }
   0x8   :  { %1480 = vmatmul.mubr.msk.bf16.vlgmr.msra.gmra.mrb[0].mxu1 %vm44_vm0, %v1641_v4  ;;  %v1664_v21 = vld [vmem:[%s2429_s1 + $0xe4] ss:$8 sps:$4 sm:$0xff]   ;;  %v1666_v22 = vld [vmem:[%s2429_s1 + $0xe0] ss:$8 sps:$4 sm:$0xff]   ;;  %v1669_v24 = vld [vmem:[%s2429_s1 + $0xf0] ss:$8 sps:$4 sm:$0xff]  }
   0x9   :  { %1484 = vmatpush3.bf16.msra.mxu1 %v29_v2  ;;  %1485 = vmatprep.mubr.msk.bf16.mxu1 %vm44_vm0, %v1642_v5  ;;  %v1672_v25 = vld [vmem:[%s2429_s1 + $0x4] ss:$8 sps:$4 sm:$0xff]   ;;  %v753_v28 = vld [vmem:[%s2430_s3 + $0x18] sm:$0xff]  ;;  %v752_v31 = vld [vmem:[%s2430_s3 + $0x10] sm:$0xff] }
   0xa   :  { %1489 = vmatprep.subr.bf16.mxu1 %v29_v2  ;;  %290 = vmatpush1.bf16.msra.mxu0 %v1651_v10  ;;  %v751_v27 = vld [vmem:[%s2430_s3 + $0x8] sm:$0xff]  ;;  %v750_v29 = vld [vmem:[%s2430_s3] sm:$0xff]  ;;  %v757_v33 = vld [vmem:[%s2430_s3 + $0x38] sm:$0xff] }
   0xb   :  { %291 = vmatprep.subr.bf16.mxu0 %v1652_v12  ;;  %v1495_v30 = vpack.c.bf16 %v753_v28, %v751_v27  ;;  %v755_v32 = vld [vmem:[%s2430_s3 + $0x28] sm:$0xff]  ;;  %v1497_v34 = vpack.c.bf16 %v752_v31, %v750_v29  ;;  %v754_v36 = vld [vmem:[%s2430_s3 + $0x20] sm:$0xff]  ;;  %v756_v37 = vld [vmem:[%s2430_s3 + $0x30] sm:$0xff] }
   0xc   :  { %v1499_v35 = vpack.c.bf16 %v757_v33, %v755_v32  ;;  %v759_v38 = vld [vmem:[%s2430_s3 + $0x48] sm:$0xff]  ;;  %v761_v39 = vld [vmem:[%s2430_s3 + $0x58] sm:$0xff]  ;;  %v1501_v40 = vpack.c.bf16 %v756_v37, %v754_v36  ;;  %v758_v42 = vld [vmem:[%s2430_s3 + $0x40] sm:$0xff] }
   0xd   :  { %v1503_v41 = vpack.c.bf16 %v761_v39, %v759_v38  ;;  %v760_v43 = vld [vmem:[%s2430_s3 + $0x50] sm:$0xff]  ;;  %v763_v44 = vld [vmem:[%s2430_s3 + $0x68] sm:$0xff]  ;;  %v765_v45 = vld [vmem:[%s2430_s3 + $0x78] sm:$0xff] }
   0xe   :  { %292 = vmatpush1.bf16.msra.mxu0 %v1654_v13  ;;  %v1505_v46 = vpack.c.bf16 %v760_v43, %v758_v42  ;;  %v1507_v47 = vpack.c.bf16 %v765_v45, %v763_v44  ;;  %v762_v48 = vld [vmem:[%s2430_s3 + $0x60] sm:$0xff]  ;;  %v764_v49 = vld [vmem:[%s2430_s3 + $0x70] sm:$0xff]  ;;  %v767_v50 = vld [vmem:[%s2430_s3 + $0x88] sm:$0xff] }
   0xf   :  { %293 = vmatprep.subr.bf16.mxu0 %v1655_v14  ;;  %v769_v51 = vld [vmem:[%s2430_s3 + $0x98] sm:$0xff]  ;;  %v1509_v52 = vpack.c.bf16 %v764_v49, %v762_v48  ;;  %v766_v54 = vld [vmem:[%s2430_s3 + $0x80] sm:$0xff]  ;;  %v768_v55 = vld [vmem:[%s2430_s3 + $0x90] sm:$0xff] }
  0x10   :  { %1486 = vmatmul.mubr.msk.bf16.vlgmr.msra.gmra.mrb[4].mxu1 %vm44_vm0, %v1643_v9  ;;  %v1511_v53 = vpack.c.bf16 %v769_v51, %v767_v50  ;;  %v771_v56 = vld [vmem:[%s2430_s3 + $0xa8] sm:$0xff]  ;;  %v773_v57 = vld [vmem:[%s2430_s3 + $0xb8] sm:$0xff]  ;;  %v1513_v58 = vpack.c.bf16 %v768_v55, %v766_v54  ;;  %v770_v60 = vld [vmem:[%s2430_s3 + $0xa0] sm:$0xff] }
  0x11   :  { %1490 = vmatpush3.bf16.msra.mxu1 %v29_v2  ;;  %1491 = vmatprep.mubr.msk.bf16.mxu1 %vm44_vm0, %v1644_v11  ;;  %v1515_v59 = vpack.c.bf16 %v773_v57, %v771_v56  ;;  %v772_v61 = vld [vmem:[%s2430_s3 + $0xb0] sm:$0xff]  ;;  %v775_v62 = vld [vmem:[%s2430_s3 + $0xc8] sm:$0xff]  ;;  %v777_v63 = vld [vmem:[%s2430_s3 + $0xd8] sm:$0xff] }
  0x12   :  { %294 = vmatpush1.bf16.msra.mxu0 %v1657_v15  ;;  %1496 = vmatprep.subr.bf16.mxu1 %v1495_v30  ;;  %v1517_v0 = vpack.c.bf16 %v772_v61, %v770_v60  ;;  %v1519_v1 = vpack.c.bf16 %v777_v63, %v775_v62  ;;  %v774_v2 = vld [vmem:[%s2430_s3 + $0xc0] sm:$0xff]  ;;  %v776_v3 = vld [vmem:[%s2430_s3 + $0xd0] sm:$0xff]  ;;  %v779_v4 = vld [vmem:[%s2430_s3 + $0xe8] sm:$0xff] }
  0x13   :  { %295 = vmatprep.subr.bf16.mxu0 %v1658_v17  ;;  %v781_v5 = vld [vmem:[%s2430_s3 + $0xf8] sm:$0xff]  ;;  %v1521_v6 = vpack.c.bf16 %v776_v3, %v774_v2  ;;  %v778_v8 = vld [vmem:[%s2430_s3 + $0xe0] sm:$0xff]  ;;  %v780_v9 = vld [vmem:[%s2430_s3 + $0xf0] sm:$0xff] }
  0x14   :  { %v1523_v7 = vpack.c.bf16 %v781_v5, %v779_v4  ;;  %v783_v10 = vld [vmem:[%s2430_s3 + $0x108] sm:$0xff]  ;;  %v785_v11 = vld [vmem:[%s2430_s3 + $0x118] sm:$0xff]  ;;  %v1525_v12 = vpack.c.bf16 %v780_v9, %v778_v8  ;;  %v782_v14 = vld [vmem:[%s2430_s3 + $0x100] sm:$0xff] }
  0x15   :  { %v1527_v13 = vpack.c.bf16 %v785_v11, %v783_v10  ;;  %v784_v15 = vld [vmem:[%s2430_s3 + $0x110] sm:$0xff]  ;;  %v1670_v29 = vld [vmem:[%s2429_s1] ss:$8 sps:$4 sm:$0xff]   ;;  %v1678_v33 = vld [vmem:[%s2429_s1 + $0x24] ss:$8 sps:$4 sm:$0xff]  }
  0x16   :  { %296 = vmatpush1.bf16.msra.mxu0 %v1660_v18  ;;  %v1675_v31 = vld [vmem:[%s2429_s1 + $0x14] ss:$8 sps:$4 sm:$0xff]   ;;  %v1673_v32 = vld [vmem:[%s2429_s1 + $0x10] ss:$8 sps:$4 sm:$0xff]   ;;  %v1676_v37 = vld [vmem:[%s2429_s1 + $0x20] ss:$8 sps:$4 sm:$0xff]  }
  0x17   :  { %297 = vmatprep.subr.bf16.mxu0 %v1661_v19  ;;  %v1679_v42 = vld [vmem:[%s2429_s1 + $0x30] ss:$8 sps:$4 sm:$0xff]   ;;  %v1684_v43 = vld [vmem:[%s2429_s1 + $0x44] ss:$8 sps:$4 sm:$0xff]   ;;  %v1682_v44 = vld [vmem:[%s2429_s1 + $0x40] ss:$8 sps:$4 sm:$0xff]  }
  0x18   :  { %1492 = vmatmul.mubr.msk.bf16.vlgmr.msra.gmra.mrb[8].mxu1 %vm44_vm0, %v1645_v16  ;;  %v1529_v16 = vpack.c.bf16 %v784_v15, %v782_v14  ;;  %v1687_v45 = vld [vmem:[%s2429_s1 + $0x54] ss:$8 sps:$4 sm:$0xff]   ;;  %v1688_v48 = vld [vmem:[%s2429_s1 + $0x60] ss:$8 sps:$4 sm:$0xff]   ;;  %v1691_v50 = vld [vmem:[%s2429_s1 + $0x70] ss:$8 sps:$4 sm:$0xff]  }
  0x19   :  { %1498 = vmatpush1.bf16.msra.mxu1 %v1497_v34  ;;  %v1693_v49 = vld [vmem:[%s2429_s1 + $0x74] ss:$8 sps:$4 sm:$0xff]   ;;  %v1696_v51 = vld [vmem:[%s2429_s1 + $0x104] ss:$8 sps:$4 sm:$0xff]   ;;  %v1697_v54 = vld [vmem:[%s2429_s1 + $0x110] ss:$8 sps:$4 sm:$0xff]  }
  0x1a   :  { %298 = vmatpush1.bf16.msra.mxu0 %v1663_v20  ;;  %1500 = vmatprep.subr.bf16.mxu1 %v1499_v35  ;;  %v1702_v55 = vld [vmem:[%s2429_s1 + $0x124] ss:$8 sps:$4 sm:$0xff]   ;;  %v1700_v56 = vld [vmem:[%s2429_s1 + $0x120] ss:$8 sps:$4 sm:$0xff]   ;;  %v1705_v57 = vld [vmem:[%s2429_s1 + $0x134] ss:$8 sps:$4 sm:$0xff]  }
  0x1b   :  { %299 = vmatprep.subr.bf16.mxu0 %v1664_v21  ;;  %v1706_v60 = vld [vmem:[%s2429_s1 + $0x140] ss:$8 sps:$4 sm:$0xff]   ;;  %v1711_v61 = vld [vmem:[%s2429_s1 + $0x154] ss:$8 sps:$4 sm:$0xff]   ;;  %v1709_v62 = vld [vmem:[%s2429_s1 + $0x150] ss:$8 sps:$4 sm:$0xff]  }
  0x1c   :  { %v1714_v63 = vld [vmem:[%s2429_s1 + $0x164] ss:$8 sps:$4 sm:$0xff]   ;;  %v1715_v2 = vld [vmem:[%s2429_s1 + $0x170] ss:$8 sps:$4 sm:$0xff]  }
  0x1d   :  { %1502 = vmatpush1.bf16.msra.mxu1 %v1501_v40  ;;  %v1681_v40 = vld [vmem:[%s2429_s1 + $0x34] ss:$8 sps:$4 sm:$0xff]   ;;  %v787_v3 = vld [vmem:[%s2430_s3 + $0x128] sm:$0xff]  ;;  %v790_v11 = vld [vmem:[%s2430_s3 + $0x140] sm:$0xff] }
  0x1e   :  { %300 = vmatpush1.bf16.msra.mxu0 %v1666_v22  ;;  %1504 = vmatprep.subr.bf16.mxu1 %v1503_v41  ;;  %v789_v4 = vld [vmem:[%s2430_s3 + $0x138] sm:$0xff]  ;;  %v791_v8 = vld [vmem:[%s2430_s3 + $0x148] sm:$0xff] }
  0x1f   :  { %301 = vmatprep.subr.bf16.mxu0 %v1667_v23  ;;  %v1531_v5 = vpack.c.bf16 %v789_v4, %v787_v3  ;;  %v793_v9 = vld [vmem:[%s2430_s3 + $0x158] sm:$0xff]  ;;  %v795_v14 = vld [vmem:[%s2430_s3 + $0x168] sm:$0xff] }
  0x20   :  { %v1535_v10 = vpack.c.bf16 %v793_v9, %v791_v8  ;;  %v797_v15 = vld [vmem:[%s2430_s3 + $0x178] sm:$0xff] }
  0x21   :  { %1506 = vmatpush1.bf16.msra.mxu1 %v1505_v46  ;;  %v1685_v46 = vld [vmem:[%s2429_s1 + $0x50] ss:$8 sps:$4 sm:$0xff]  }
  0x22   :  { %302 = vmatpush1.bf16.msra.mxu0 %v1669_v24  ;;  %1508 = vmatprep.subr.bf16.mxu1 %v1507_v47  ;;  %v1690_v47 = vld [vmem:[%s2429_s1 + $0x64] ss:$8 sps:$4 sm:$0xff]  }
  0x23   :  { %420 = vmatprep.subr.bf16.mxu0 %v1672_v25 }
  0x25   :  { %1510 = vmatpush1.bf16.msra.mxu1 %v1509_v52  ;;  %v1694_v52 = vld [vmem:[%s2429_s1 + $0x100] ss:$8 sps:$4 sm:$0xff]  }
  0x26   :  { %1512 = vmatprep.subr.bf16.mxu1 %v1511_v53  ;;  %v1699_v53 = vld [vmem:[%s2429_s1 + $0x114] ss:$8 sps:$4 sm:$0xff]  }
  0x29   :  { %1514 = vmatpush1.bf16.msra.mxu1 %v1513_v58  ;;  %v1703_v58 = vld [vmem:[%s2429_s1 + $0x130] ss:$8 sps:$4 sm:$0xff]  }
  0x2a   :  { %1516 = vmatprep.subr.bf16.mxu1 %v1515_v59  ;;  %v1708_v59 = vld [vmem:[%s2429_s1 + $0x144] ss:$8 sps:$4 sm:$0xff]  }
  0x2d   :  { %1518 = vmatpush1.bf16.msra.mxu1 %v1517_v0  ;;  %v1712_v0 = vld [vmem:[%s2429_s1 + $0x160] ss:$8 sps:$4 sm:$0xff]  }
  0x2e   :  { %1520 = vmatprep.subr.bf16.mxu1 %v1519_v1  ;;  %v1717_v1 = vld [vmem:[%s2429_s1 + $0x174] ss:$8 sps:$4 sm:$0xff]  }
  0x31   :  { %1522 = vmatpush1.bf16.msra.mxu1 %v1521_v6  ;;  %v786_v6 = vld [vmem:[%s2430_s3 + $0x120] sm:$0xff] }
  0x32   :  { %1524 = vmatprep.subr.bf16.mxu1 %v1523_v7 }
  0x35   :  { %1526 = vmatpush1.bf16.msra.mxu1 %v1525_v12  ;;  %v792_v12 = vld [vmem:[%s2430_s3 + $0x150] sm:$0xff] }
  0x36   :  { %1528 = vmatprep.subr.bf16.mxu1 %v1527_v13  ;;  %v1537_v13 = vpack.c.bf16 %v792_v12, %v790_v11 }
  0x39   :  { %1530 = vmatpush1.bf16.msra.mxu1 %v1529_v16  ;;  %v1539_v16 = vpack.c.bf16 %v797_v15, %v795_v14 }
  0x3a   :  { %1532 = vmatprep.subr.bf16.mxu1 %v1531_v5 }
  0xdb   :  { %v1969_v17 = vpop.f32.mrb[0].mxu1 }
  0xdc   :  { %v85_v18 = vpop.f32.mrb[1].mxu1 }
  0xdd   :  { %v1971_v19 = vpop.f32.mrb[2].mxu1 }
  0xde   :  { %v101_v20 = vpack.c.bf16 %v1971_v19, %v1969_v17  ;;  %v88_v21 = vpop.f32.mrb[3].mxu1  ;;  %v794_v17 = vld [vmem:[%s2430_s3 + $0x160] sm:$0xff] }
  0xdf   :  { %v100_v22 = vpack.c.bf16 %v88_v21, %v85_v18  ;;  %v796_v18 = vld [vmem:[%s2430_s3 + $0x170] sm:$0xff]  ;;  %v801_v21 = vld [vmem:[%s2430_s3 + $0x198] sm:$0xff] }
  0xe0   :  { %v1541_v19 = vpack.c.bf16 %v796_v18, %v794_v17 }
  0xe3   :  { %v1487_v23 = vpop.f32.mrb[4].mxu1 }
  0xe4   :  { %v173_v24 = vpop.f32.mrb[5].mxu1 }
  0xe5   :  { %v1488_v25 = vpop.f32.mrb[6].mxu1 }
  0xe6   :  { %v189_v27 = vpack.c.bf16 %v1488_v25, %v1487_v23  ;;  %v176_v28 = vpop.f32.mrb[7].mxu1  ;;  %v798_v23 = vld [vmem:[%s2430_s3 + $0x180] sm:$0xff] }
  0xe7   :  { %v188_v30 = vpack.c.bf16 %v176_v28, %v173_v24  ;;  %v800_v24 = vld [vmem:[%s2430_s3 + $0x190] sm:$0xff]  ;;  %v805_v28 = vld [vmem:[%s2430_s3 + $0x1b8] sm:$0xff] }
  0xe8   :  { %v1545_v25 = vpack.c.bf16 %v800_v24, %v798_v23 }
  0xe9   :  { %320 = vmatmul.mubr.bf16.vlgmr.msra.gmra.mrb[0].mxu0 %v188_v30  ;;  %v802_v30 = vld [vmem:[%s2430_s3 + $0x1a0] sm:$0xff] }
  0xea   :  { %421 = vmatpush1.bf16.msra.mxu0 %v1670_v29  ;;  %329 = vmatprep.mubr.bf16.mxu0 %v1738_v26 }
  0xeb   :  { %422 = vmatprep.subr.bf16.mxu0 %v1675_v31  ;;  %v1988_v34 = vpop.f32.mrb[8].mxu1  ;;  %v804_v31 = vld [vmem:[%s2430_s3 + $0x1b0] sm:$0xff] }
  0xec   :  { %v1990_v35 = vpop.f32.mrb[9].mxu1 }
  0xed   :  { %v1992_v36 = vpop.f32.mrb[10].mxu1 }
  0xee   :  { %423 = vmatpush1.bf16.msra.mxu0 %v1673_v32  ;;  %v544_v38 = vpack.c.bf16 %v1992_v36, %v1988_v34  ;;  %v531_v39 = vpop.f32.mrb[11].mxu1  ;;  %v1549_v32 = vpack.c.bf16 %v804_v31, %v802_v30  ;;  %v809_v34 = vld [vmem:[%s2430_s3 + $0x1d8] sm:$0xff]  ;;  %v806_v36 = vld [vmem:[%s2430_s3 + $0x1c0] sm:$0xff] }
  0xef   :  { %424 = vmatprep.subr.bf16.mxu0 %v1678_v33  ;;  %v543_v41 = vpack.c.bf16 %v531_v39, %v1990_v35  ;;  %v807_v33 = vld [vmem:[%s2430_s3 + $0x1c8] sm:$0xff] }
  0xf0   :  { %v1551_v35 = vpack.c.bf16 %v809_v34, %v807_v33  ;;  %v811_v39 = vld [vmem:[%s2430_s3 + $0x1e8] sm:$0xff] }
  0xf1   :  { %330 = vmatmul.mubr.bf16.gmra.mrb[4].mxu0 %v189_v27  ;;  %v803_v27 = vld [vmem:[%s2430_s3 + $0x1a8] sm:$0xff] }
  0xf2   :  { %425 = vmatpush1.bf16.msra.mxu0 %v1676_v37  ;;  %452 = vmatprep.mubr.bf16.mxu0 %v1738_v26  ;;  %v1547_v29 = vpack.c.bf16 %v805_v28, %v803_v27  ;;  %v808_v37 = vld [vmem:[%s2430_s3 + $0x1d0] sm:$0xff] }
  0xf3   :  { %426 = vmatprep.subr.bf16.mxu0 %v1681_v40  ;;  %v813_v40 = vld [vmem:[%s2430_s3 + $0x1f8] sm:$0xff] }
  0xf6   :  { %427 = vmatpush1.bf16.msra.mxu0 %v1679_v42  ;;  %v1555_v42 = vpack.c.bf16 %v813_v40, %v811_v39  ;;  %v1361_v39 = vld [vmem:[%s2431_s6 + $0x188] sm:$0xff]  ;;  %v973_v40 = vld [vmem:[%s2431_s6] sm:$0xff] }
  0xf7   :  { %428 = vmatprep.subr.bf16.mxu0 %v1684_v43  ;;  %v812_v43 = vld [vmem:[%s2430_s3 + $0x1f0] sm:$0xff] }
  0xfa   :  { %429 = vmatpush1.bf16.msra.mxu0 %v1682_v44 }
  0xfb   :  { %430 = vmatprep.subr.bf16.mxu0 %v1687_v45 }
  0xfe   :  { %431 = vmatpush1.bf16.msra.mxu0 %v1685_v46 }
  0xff   :  { %432 = vmatprep.subr.bf16.mxu0 %v1690_v47 }
 0x102   :  { %433 = vmatpush1.bf16.msra.mxu0 %v1688_v48 }
 0x103   :  { %434 = vmatprep.subr.bf16.mxu0 %v1693_v49 }
 0x106   :  { %435 = vmatpush1.bf16.msra.mxu0 %v1691_v50 }
 0x107   :  { %642 = vmatprep.subr.bf16.mxu0 %v1696_v51 }
 0x109   :  { %453 = vmatmul.mubr.bf16.vlgmr.msra.gmra.mrb[0].mxu0 %v100_v22 }
 0x10a   :  { %643 = vmatpush1.bf16.msra.mxu0 %v1694_v52  ;;  %462 = vmatprep.mubr.bf16.mxu0 %v1738_v26 }
 0x10b   :  { %644 = vmatprep.subr.bf16.mxu0 %v1699_v53 }
 0x10e   :  { %645 = vmatpush1.bf16.msra.mxu0 %v1697_v54 }
 0x10f   :  { %646 = vmatprep.subr.bf16.mxu0 %v1702_v55 }
 0x111   :  { %463 = vmatmul.mubr.bf16.gmra.mrb[4].mxu0 %v101_v20  ;;  %v799_v20 = vld [vmem:[%s2430_s3 + $0x188] sm:$0xff] }
 0x112   :  { %647 = vmatpush1.bf16.msra.mxu0 %v1700_v56  ;;  %674 = vmatprep.mubr.bf16.mxu0 %v1738_v26  ;;  %v1543_v22 = vpack.c.bf16 %v801_v21, %v799_v20 }
 0x113   :  { %648 = vmatprep.subr.bf16.mxu0 %v1705_v57 }
 0x116   :  { %649 = vmatpush1.bf16.msra.mxu0 %v1703_v58 }
 0x117   :  { %650 = vmatprep.subr.bf16.mxu0 %v1708_v59 }
 0x11a   :  { %651 = vmatpush1.bf16.msra.mxu0 %v1706_v60 }
 0x11b   :  { %652 = vmatprep.subr.bf16.mxu0 %v1711_v61 }
 0x11e   :  { %653 = vmatpush1.bf16.msra.mxu0 %v1709_v62 }
 0x11f   :  { %654 = vmatprep.subr.bf16.mxu0 %v1714_v63 }
 0x122   :  { %655 = vmatpush1.bf16.msra.mxu0 %v1712_v0 }
 0x123   :  { %656 = vmatprep.subr.bf16.mxu0 %v1717_v1 }
 0x126   :  { %657 = vmatpush1.bf16.msra.mxu0 %v1715_v2 }
 0x129   :  { %675 = vmatmul.mubr.bf16.vlgmr.msra.gmra.mrb[0].mxu0 %v543_v41  ;;  %v810_v41 = vld [vmem:[%s2430_s3 + $0x1e0] sm:$0xff] }
 0x12a   :  { %684 = vmatprep.mubr.bf16.mxu0 %v1738_v26  ;;  %v788_v26 = vld [vmem:[%s2430_s3 + $0x130] sm:$0xff]  ;;  %v1557_v44 = vpack.c.bf16 %v812_v43, %v810_v41  ;;  %v974_v41 = vld [vmem:[%s2431_s6 + $0x8] sm:$0xff] }
 0x12b   :  { %v1533_v7 = vpack.c.bf16 %v788_v26, %v786_v6  ;;  %v1561_v43 = vpack.c.bf16 %v974_v41, %v973_v40  ;;  %v1000_v40 = vld [vmem:[%s2431_s6 + $0xd8] sm:$0xff]  ;;  %v1370_v41 = vld [vmem:[%s2431_s6 + $0x1d0] sm:$0xff] }
 0x12d   :  { %1534 = vmatpush1.bf16.msra.mxu1 %v1533_v7 }
 0x12e   :  { %1536 = vmatprep.subr.bf16.mxu1 %v1535_v10 }
 0x131   :  { %685 = vmatmul.mubr.bf16.gmra.mrb[4].mxu0 %v544_v38  ;;  %1538 = vmatpush1.bf16.msra.mxu1 %v1537_v13  ;;  %v1553_v38 = vpack.c.bf16 %v808_v37, %v806_v36  ;;  %v990_v36 = vld [vmem:[%s2431_s6 + $0x88] sm:$0xff]  ;;  %v1360_v37 = vld [vmem:[%s2431_s6 + $0x180] sm:$0xff] }
 0x132   :  { %1540 = vmatprep.subr.bf16.mxu1 %v1539_v16 }
 0x135   :  { %1542 = vmatpush1.bf16.msra.mxu1 %v1541_v19 }
 0x136   :  { %1544 = vmatprep.subr.bf16.mxu1 %v1543_v22 }
 0x139   :  { %1546 = vmatpush1.bf16.msra.mxu1 %v1545_v25 }
 0x13a   :  { %1548 = vmatprep.subr.bf16.mxu1 %v1547_v29 }
 0x13d   :  { %1550 = vmatpush1.bf16.msra.mxu1 %v1549_v32 }
 0x13e   :  { %1552 = vmatprep.subr.bf16.mxu1 %v1551_v35  ;;  %v989_v35 = vld [vmem:[%s2431_s6 + $0x80] sm:$0xff] }
 0x141   :  { %1554 = vmatpush1.bf16.msra.mxu1 %v1553_v38  ;;  %v1559_v38 = vpack.c.bf16 %v990_v36, %v989_v35  ;;  %v1352_v36 = vld [vmem:[%s2431_s6 + $0x140] sm:$0xff] }
 0x142   :  { %1556 = vmatprep.subr.bf16.mxu1 %v1555_v42  ;;  %v1591_v42 = vpack.c.bf16 %v1361_v39, %v1360_v37  ;;  %v1353_v37 = vld [vmem:[%s2431_s6 + $0x148] sm:$0xff]  ;;  %v999_v39 = vld [vmem:[%s2431_s6 + $0xd0] sm:$0xff] }
 0x144   :  { %1592 = vmatprep.subr.bf16.mxu0 %v1591_v42  ;;  %v1579_v42 = vpack.c.bf16 %v1000_v40, %v999_v39 }
 0x145   :  { %1558 = vmatpush1.bf16.msra.mxu1 %v1557_v44  ;;  %v1344_v44 = vld [vmem:[%s2431_s6 + $0x100] sm:$0xff] }
 0x146   :  { %1560 = vmatprep.subr.bf16.mxu1 %v1559_v38  ;;  %v1609_v38 = vpack.c.bf16 %v1353_v37, %v1352_v36 }
 0x1fc   :  { %v2169_v45 = vpop.f32.mrb[0].mxu0 }
 0x1fd   :  { %v2171_v46 = vpop.f32.mrb[1].mxu0  ;;  %v721_v48 = vmul.f32 %v2169_v45, %v2169_v45 }
 0x1fe   :  { %v2173_v47 = vpop.f32.mrb[2].mxu0  ;;  %v722_v52 = vmul.f32 %v2171_v46, %v2171_v46 }
 0x1ff   :  { %v703_v49 = vadd.f32 %v2173_v47, %v2169_v45  ;;  %v723_v50 = vmul.f32 %v2173_v47, %v2173_v47  ;;  %v2181_v51 = vpop.f32.mrb[3].mxu0 }
 0x200   :  { %v712_v53 = vadd.f32 %v2181_v51, %v2171_v46  ;;  %v724_v54 = vmul.f32 %v2181_v51, %v2181_v51 }
 0x201   :  { %v729_v55 = vadd.f32 %v723_v50, %v721_v48  ;;  %v1345_v48 = vld [vmem:[%s2431_s6 + $0x108] sm:$0xff]  ;;  %v991_v50 = vld [vmem:[%s2431_s6 + $0x90] sm:$0xff] }
 0x202   :  { %v738_v56 = vadd.f32 %v724_v54, %v722_v52  ;;  %v992_v52 = vld [vmem:[%s2431_s6 + $0x98] sm:$0xff] }
 0x203   :  { %v1563_v54 = vpack.c.bf16 %v992_v52, %v991_v50  ;;  %v1354_v52 = vld [vmem:[%s2431_s6 + $0x150] sm:$0xff] }
 0x204   :  { %v2189_v57 = vpop.f32.mrb[4].mxu0 }
 0x205   :  { %v704_v58 = vadd.f32 %v703_v49, %v2189_v57  ;;  %v725_v59 = vmul.f32 %v2189_v57, %v2189_v57  ;;  %v2194_v60 = vpop.f32.mrb[5].mxu0  ;;  %v1593_v49 = vpack.c.bf16 %v1345_v48, %v1344_v44  ;;  %v983_v44 = vld [vmem:[%s2431_s6 + $0x50] sm:$0xff]  ;;  %v984_v48 = vld [vmem:[%s2431_s6 + $0x58] sm:$0xff] }
 0x206   :  { %v713_v61 = vadd.f32 %v712_v53, %v2194_v60  ;;  %v726_v62 = vmul.f32 %v2194_v60, %v2194_v60  ;;  %v2199_v63 = vpop.f32.mrb[6].mxu0  ;;  %v1362_v53 = vld [vmem:[%s2431_s6 + $0x190] sm:$0xff]  ;;  %v1581_v50 = vpack.c.bf16 %v984_v48, %v983_v44 }
 0x207   :  { %v730_v0 = vadd.f32 %v729_v55, %v725_v59  ;;  %v705_v1 = vadd.f32 %v704_v58, %v2199_v63  ;;  %v727_v2 = vmul.f32 %v2199_v63, %v2199_v63  ;;  %v2204_v3 = vpop.f32.mrb[7].mxu0  ;;  %1594 = vmatpush3.bf16.msra.mxu0 %v1593_v49  ;;  %v1363_v55 = vld [vmem:[%s2431_s6 + $0x198] sm:$0xff] }
 0x208   :  { %v739_v4 = vadd.f32 %v738_v56, %v726_v62  ;;  %v714_v5 = vadd.f32 %v713_v61, %v2204_v3  ;;  %v728_v6 = vmul.f32 %v2204_v3, %v2204_v3  ;;  %v975_v56 = vld [vmem:[%s2431_s6 + $0x10] sm:$0xff]  ;;  %v976_v58 = vld [vmem:[%s2431_s6 + $0x18] sm:$0xff]  ;;  %v1595_v59 = vpack.c.bf16 %v1363_v55, %v1362_v53  ;;  %v1001_v55 = vld [vmem:[%s2431_s6 + $0xe0] sm:$0xff] }
 0x209   :  { %v706_v26 = vrot.slane %v705_v1, 4  ;;  %v731_v7 = vadd.f32 %v730_v0, %v727_v2  ;;  %v1565_v61 = vpack.c.bf16 %v976_v58, %v975_v56  ;;  %v1346_v62 = vld [vmem:[%s2431_s6 + $0x110] sm:$0xff]  ;;  %v1347_v0 = vld [vmem:[%s2431_s6 + $0x118] sm:$0xff]  ;;  %v993_v2 = vld [vmem:[%s2431_s6 + $0xa0] sm:$0xff] }
 0x20a   :  { %v715_v8 = vrot.slane %v714_v5, 4  ;;  %v740_v9 = vadd.f32 %v739_v4, %v728_v6  ;;  %1596 = vmatprep.subr.bf16.mxu0 %v1595_v59  ;;  %v994_v4 = vld [vmem:[%s2431_s6 + $0xa8] sm:$0xff]  ;;  %v1355_v53 = vld [vmem:[%s2431_s6 + $0x158] sm:$0xff]  ;;  %v1372_v58 = vld [vmem:[%s2431_s6 + $0x1e0] sm:$0xff] }
 0x20b   :  { %v707_v10 = vadd.f32 %v706_v26, %v705_v1  ;;  %v732_v11 = vrot.slane %v731_v7, 4  ;;  %v1597_v1 = vpack.c.bf16 %v1347_v0, %v1346_v62  ;;  %v1567_v6 = vpack.c.bf16 %v994_v4, %v993_v2  ;;  %v1365_v26 = vld [vmem:[%s2431_s6 + $0x1a8] sm:$0xff]  ;;  %v985_v62 = vld [vmem:[%s2431_s6 + $0x60] sm:$0xff] }
 0x20c   :  { %v716_v12 = vadd.f32 %v715_v8, %v714_v5  ;;  %v741_v13 = vrot.slane %v740_v9, 4  ;;  %v1364_v5 = vld [vmem:[%s2431_s6 + $0x1a0] sm:$0xff]  ;;  %v978_v8 = vld [vmem:[%s2431_s6 + $0x28] sm:$0xff] }
 0x20d   :  { %v708_v14 = vrot.slane %v707_v10, 2  ;;  %v733_v15 = vadd.f32 %v732_v11, %v731_v7  ;;  %1598 = vmatpush3.bf16.msra.mxu0 %v1597_v1  ;;  %v977_v7 = vld [vmem:[%s2431_s6 + $0x20] sm:$0xff]  ;;  %v1002_v56 = vld [vmem:[%s2431_s6 + $0xe8] sm:$0xff] }
 0x20e   :  { %v717_v16 = vrot.slane %v716_v12, 2  ;;  %v742_v17 = vadd.f32 %v741_v13, %v740_v9  ;;  %v1599_v9 = vpack.c.bf16 %v1365_v26, %v1364_v5  ;;  %v1348_v11 = vld [vmem:[%s2431_s6 + $0x120] sm:$0xff]  ;;  %v1583_v59 = vpack.c.bf16 %v1002_v56, %v1001_v55  ;;  %v986_v0 = vld [vmem:[%s2431_s6 + $0x68] sm:$0xff] }
 0x20f   :  { %v709_v18 = vadd.f32 %v708_v14, %v707_v10  ;;  %v734_v19 = vrot.slane %v733_v15, 2  ;;  %v1569_v10 = vpack.c.bf16 %v978_v8, %v977_v7  ;;  %v995_v14 = vld [vmem:[%s2431_s6 + $0xb0] sm:$0xff]  ;;  %v1585_v2 = vpack.c.bf16 %v986_v0, %v985_v62  ;;  %v1356_v4 = vld [vmem:[%s2431_s6 + $0x160] sm:$0xff]  ;;  %v1357_v5 = vld [vmem:[%s2431_s6 + $0x168] sm:$0xff] }
 0x210   :  { %v718_v20 = vadd.f32 %v717_v16, %v716_v12  ;;  %v743_v21 = vrot.slane %v742_v17, 2  ;;  %v1349_v12 = vld [vmem:[%s2431_s6 + $0x128] sm:$0xff]  ;;  %1600 = vmatprep.subr.bf16.mxu0 %v1599_v9  ;;  %v1366_v16 = vld [vmem:[%s2431_s6 + $0x1b0] sm:$0xff]  ;;  %v1617_v26 = vpack.c.bf16 %v1357_v5, %v1356_v4  ;;  %v1004_v7 = vld [vmem:[%s2431_s6 + $0xf8] sm:$0xff] }
 0x211   :  { %v710_v22 = vrot.slane %v709_v18, 1  ;;  %v735_v23 = vadd.f32 %v734_v19, %v733_v15  ;;  %v1601_v13 = vpack.c.bf16 %v1349_v12, %v1348_v11  ;;  %v996_v15 = vld [vmem:[%s2431_s6 + $0xb8] sm:$0xff]  ;;  %v979_v19 = vld [vmem:[%s2431_s6 + $0x30] sm:$0xff] }
 0x212   :  { %v719_v24 = vrot.slane %v718_v20, 1  ;;  %v744_v25 = vadd.f32 %v743_v21, %v742_v17  ;;  %v1571_v17 = vpack.c.bf16 %v996_v15, %v995_v14  ;;  %v1374_v8 = vld [vmem:[%s2431_s6 + $0x1f0] sm:$0xff]  ;;  %v1375_v9 = vld [vmem:[%s2431_s6 + $0x1f8] sm:$0xff] }
 0x213   :  { %v736_v27 = vrot.slane %v735_v23, 1  ;;  %v711_v29 = vadd.f32 %v710_v22, %v709_v18  ;;  %1602 = vmatpush3.bf16.msra.mxu0 %v1601_v13  ;;  %v1367_v18 = vld [vmem:[%s2431_s6 + $0x1b8] sm:$0xff]  ;;  %v1619_v11 = vpack.c.bf16 %v1375_v9, %v1374_v8  ;;  %v987_v12 = vld [vmem:[%s2431_s6 + $0x70] sm:$0xff] }
 0x214   :  { %v745_v28 = vrot.slane %v744_v25, 1  ;;  %v720_v31 = vadd.f32 %v719_v24, %v718_v20  ;;  %v980_v20 = vld [vmem:[%s2431_s6 + $0x38] sm:$0xff]  ;;  %v1603_v21 = vpack.c.bf16 %v1367_v18, %v1366_v16  ;;  %v1358_v14 = vld [vmem:[%s2431_s6 + $0x170] sm:$0xff]  ;;  %v897_v18 = vlaneseq }
 0x215   :  { %v737_v30 = vadd.f32 %v736_v27, %v735_v23  ;;  %v1573_v22 = vpack.c.bf16 %v980_v20, %v979_v19  ;;  %v1350_v23 = vld [vmem:[%s2431_s6 + $0x130] sm:$0xff]  ;;  %v1351_v24 = vld [vmem:[%s2431_s6 + $0x138] sm:$0xff]  ;;  %v997_v27 = vld [vmem:[%s2431_s6 + $0xc0] sm:$0xff] }
 0x216   :  { %v746_v32 = vadd.f32 %v745_v28, %v744_v25  ;;  %v1605_v25 = vpack.c.bf16 %v1351_v24, %v1350_v23  ;;  %1604 = vmatprep.subr.bf16.mxu0 %v1603_v21  ;;  %v998_v28 = vld [vmem:[%s2431_s6 + $0xc8] sm:$0xff]  ;;  %v988_v13 = vld [vmem:[%s2431_s6 + $0x78] sm:$0xff]  ;;  %v898_v19 = vshrl.u32 %v897_v18, 7 }
 0x217   :  { %v748_v33 = vsel %vm747_vm1, %v711_v29, %v737_v30  ;;  %v1368_v29 = vld [vmem:[%s2431_s6 + $0x1c0] sm:$0xff]  ;;  %v1575_v30 = vpack.c.bf16 %v998_v28, %v997_v27  ;;  %v1589_v15 = vpack.c.bf16 %v988_v13, %v987_v12  ;;  %v1359_v16 = vld [vmem:[%s2431_s6 + $0x178] sm:$0xff] }
 0x218   :  { %v749_v34 = vsel %vm747_vm1, %v720_v31, %v746_v32  ;;  %1606 = vmatpush3.bf16.msra.mxu0 %v1605_v25  ;;  %v1369_v31 = vld [vmem:[%s2431_s6 + $0x1c8] sm:$0xff]  ;;  %v981_v32 = vld [vmem:[%s2431_s6 + $0x40] sm:$0xff]  ;;  %v899_v20 = vsub.s32 0, %v898_v19 }
 0x219   :  { %878 = vmatprep.mubr.f32.mxu1 %v749_v34  ;;  %v1607_v34 = vpack.c.bf16 %v1369_v31, %v1368_v29 }
 0x21a   :  { %879 = vmatmul.mubr.f32.vlgmr.msra.gmra.mrb[12].mxu1 %v748_v33  ;;  %v982_v33 = vld [vmem:[%s2431_s6 + $0x48] sm:$0xff] }
 0x21b   :  { %1562 = vmatpush3.bf16.msra.mxu1 %v1561_v43  ;;  %v1577_v35 = vpack.c.bf16 %v982_v33, %v981_v32  ;;  %1608 = vmatprep.subr.bf16.mxu0 %v1607_v34  ;;  %v1371_v43 = vld [vmem:[%s2431_s6 + $0x1d8] sm:$0xff] }
 0x21c   :  { %1564 = vmatprep.subr.bf16.mxu1 %v1563_v54  ;;  %1610 = vmatpush3.bf16.msra.mxu0 %v1609_v38  ;;  %v1611_v49 = vpack.c.bf16 %v1371_v43, %v1370_v41  ;;  %v1613_v54 = vpack.c.bf16 %v1355_v53, %v1354_v52 }
 0x21e   :  { %1612 = vmatprep.subr.bf16.mxu0 %v1611_v49 }
 0x21f   :  { %1566 = vmatpush3.bf16.msra.mxu1 %v1565_v61  ;;  %v1373_v61 = vld [vmem:[%s2431_s6 + $0x1e8] sm:$0xff] }
 0x220   :  { %1568 = vmatprep.subr.bf16.mxu1 %v1567_v6  ;;  %1614 = vmatpush3.bf16.msra.mxu0 %v1613_v54  ;;  %v1615_v1 = vpack.c.bf16 %v1373_v61, %v1372_v58  ;;  %v1003_v6 = vld [vmem:[%s2431_s6 + $0xf0] sm:$0xff] }
 0x222   :  { %1616 = vmatprep.subr.bf16.mxu0 %v1615_v1 }
 0x223   :  { %1570 = vmatpush3.bf16.msra.mxu1 %v1569_v10  ;;  %v1587_v10 = vpack.c.bf16 %v1004_v7, %v1003_v6 }
 0x224   :  { %1572 = vmatprep.subr.bf16.mxu1 %v1571_v17  ;;  %1618 = vmatpush3.bf16.msra.mxu0 %v1617_v26  ;;  %v1621_v17 = vpack.c.bf16 %v1359_v16, %v1358_v14 }
 0x225   :  { %1620 = vmatprep.subr.bf16.mxu0 %v1619_v11 }
 0x227   :  { %1574 = vmatpush3.bf16.msra.mxu1 %v1573_v22 }
 0x228   :  { %1576 = vmatprep.subr.bf16.mxu1 %v1575_v30  ;;  %1622 = vmatpush3.bf16.msra.mxu0 %v1621_v17 }
 0x22b   :  { %1578 = vmatpush3.bf16.msra.mxu1 %v1577_v35 }
 0x22c   :  { %1580 = vmatprep.subr.bf16.mxu1 %v1579_v42 }
 0x22f   :  { %1582 = vmatpush3.bf16.msra.mxu1 %v1581_v50 }
 0x230   :  { %1584 = vmatprep.subr.bf16.mxu1 %v1583_v59 }
 0x233   :  { %1586 = vmatpush3.bf16.msra.mxu1 %v1585_v2 }
 0x234   :  { %1588 = vmatprep.subr.bf16.mxu1 %v1587_v10 }
 0x237   :  { %1590 = vmatpush3.bf16.msra.mxu1 %v1589_v15 }
 0x2ed   :  { %v880_v21 = vpop.f32.mrb[12].mxu1 }
 0x2ee   :  { %v885_v22 = vmul.f32 0.001953125, %v880_v21  ;;  %v882_v23 = vpop.f32.mrb[13].mxu1 }
 0x2ef   :  { %v886_v24 = vmul.f32 0.001953125, %v882_v23 }
 0x2f0   :  { %v887_v25 = vmul.f32 %v885_v22, %v885_v22  ;;  %v900_v27 = vrot.slane %v885_v22, %v899_v20 }
 0x2f1   :  { %v888_v28 = vmul.f32 %v886_v24, %v886_v24  ;;  %v904_v29 = vrot.slane %v886_v24, %v899_v20 }
 0x2f2   :  { %v891_v30 = vrot.slane %v887_v25, 7  ;;  %v905_v31 = vsub.f32 %v2169_v45, %v900_v27  ;;  %v907_v32 = vsub.f32 %v2173_v47, %v900_v27  ;;  %v909_v33 = vsub.f32 %v2189_v57, %v900_v27  ;;  %v933_v47 = vld [vmem:[%s2432_s4] sm:$0x3] }
 0x2f3   :  { %v892_v34 = vrot.slane %v888_v28, 7  ;;  %v906_v35 = vsub.f32 %v2171_v46, %v904_v29  ;;  %v908_v36 = vsub.f32 %v2181_v51, %v904_v29  ;;  %v910_v37 = vsub.f32 %v2194_v60, %v904_v29  ;;  %v953_v46 = vld [vmem:[%s2433_s5] sm:$0x3] }
 0x2f4   :  { %v895_v38 = vsub.f32 %v885_v22, %v891_v30  ;;  %v912_v39 = vsub.f32 %v2204_v3, %v904_v29  ;;  %v911_v40 = vsub.f32 %v2199_v63, %v900_v27  ;;  %v919_v45 = vsub.s32 1, %v898_v19 }
 0x2f5   :  { %v896_v41 = vsub.f32 %v886_v24, %v892_v34  ;;  %v938_v3 = vrot.slane %v933_v47, %v899_v20  ;;  %v958_v59 = vrot.slane %v953_v46, %v899_v20 }
 0x2f6   :  { %v913_v42 = vadd.f32 1e-05, %v895_v38  ;;  %v942_v63 = vrot.slane %v933_v47, %v919_v45  ;;  %v962_v48 = vrot.slane %v953_v46, %v919_v45 }
 0x2f7   :  { %v914_v43 = vadd.f32 1e-05, %v896_v41 }
 0x2f8   :  { %1718 = vrsqrt.f32 %v913_v42 }
 0x2f9   :  { %1720 = vrsqrt.f32 %v914_v43 }
 0x302   :  { %v1719_v51 = vpop.eup %1718 }
 0x303   :  { %v1721_v57 = vpop.eup %1720  ;;  %v920_v60 = vrot.slane %v1719_v51, %v919_v45 }
 0x304   :  { %v924_v44 = vrot.slane %v1721_v57, %v919_v45 }
 0x305   :  { %v925_v49 = vmul.f32 %v920_v60, %v905_v31  ;;  %v927_v50 = vmul.f32 %v920_v60, %v907_v32  ;;  %v929_v52 = vmul.f32 %v920_v60, %v909_v33  ;;  %v931_v53 = vmul.f32 %v920_v60, %v911_v40 }
 0x306   :  { %v926_v54 = vmul.f32 %v924_v44, %v906_v35  ;;  %v928_v55 = vmul.f32 %v924_v44, %v908_v36  ;;  %v930_v56 = vmul.f32 %v924_v44, %v910_v37  ;;  %v932_v58 = vmul.f32 %v924_v44, %v912_v39 }
 0x307   :  { %v945_v61 = vmul.f32 %v938_v3, %v925_v49  ;;  %v947_v4 = vmul.f32 %v938_v3, %v927_v50  ;;  %v949_v7 = vmul.f32 %v938_v3, %v929_v52  ;;  %v951_v11 = vmul.f32 %v938_v3, %v931_v53 }
 0x308   :  { %v946_v62 = vmul.f32 %v942_v63, %v926_v54  ;;  %v948_v0 = vmul.f32 %v942_v63, %v928_v55  ;;  %v950_v6 = vmul.f32 %v942_v63, %v930_v56  ;;  %v952_v9 = vmul.f32 %v942_v63, %v932_v58 }
 0x309   :  { %v965_v2 = vadd.f32 %v958_v59, %v945_v61  ;;  %v967_v26 = vadd.f32 %v958_v59, %v947_v4  ;;  %v969_v10 = vadd.f32 %v958_v59, %v949_v7  ;;  %v971_v13 = vadd.f32 %v958_v59, %v951_v11 }
 0x30a   :  { %v966_v1 = vadd.f32 %v962_v48, %v946_v62  ;;  %v968_v5 = vadd.f32 %v962_v48, %v948_v0  ;;  %v970_v8 = vadd.f32 %v962_v48, %v950_v6  ;;  %v972_v12 = vadd.f32 %v962_v48, %v952_v9 }
 0x30c   :  { %1069 = vmatprep.mubr.f32.mxu1 %v966_v1  ;;  %1187 = vmatprep.mubr.f32.mxu0 %v966_v1 }
 0x30d   :  { %1070 = vmatmul.mubr.f32.vlgmr.msra.gmra.mrb[14].mxu1 %v965_v2  ;;  %1188 = vmatmul.mubr.f32.vlgmr.msra.gmra.mrb[8].mxu0 %v965_v2 }
 0x30e   :  { %1074 = vmatprep.mubr.f32.mxu1 %v968_v5  ;;  %1192 = vmatprep.mubr.f32.mxu0 %v968_v5 }
 0x311   :  { %1075 = vmatmul.mubr.f32.gmra.mrb[16].mxu1 %v967_v26  ;;  %1193 = vmatmul.mubr.f32.gmra.mrb[10].mxu0 %v967_v26 }
 0x312   :  { %1079 = vmatprep.mubr.f32.mxu1 %v970_v8  ;;  %1197 = vmatprep.mubr.f32.mxu0 %v970_v8 }
 0x315   :  { %1080 = vmatmul.mubr.f32.gmra.mrb[18].mxu1 %v969_v10  ;;  %1198 = vmatmul.mubr.f32.gmra.mrb[12].mxu0 %v969_v10 }
 0x316   :  { %1084 = vmatprep.mubr.f32.mxu1 %v972_v12  ;;  %1202 = vmatprep.mubr.f32.mxu0 %v972_v12 }
 0x319   :  { %1085 = vmatmul.mubr.f32.gmra.mrb[20].mxu1 %v971_v13  ;;  %1203 = vmatmul.mubr.f32.gmra.mrb[14].mxu0 %v971_v13 }
 0x3e0   :  { %v1421_v14 = vpop.f32.mrb[14].mxu1  ;;  %v1465_v15 = vpop.f32.mrb[8].mxu0 }
 0x3e1   :  { %v1422_v16 = vpop.f32.mrb[15].mxu1  ;;  %v1466_v17 = vpop.f32.mrb[9].mxu0 }
 0x3e2   :  { %v1423_v18 = vadd.f32 %v1422_v16, %v1421_v14  ;;  %v1467_v19 = vadd.f32 %v1466_v17, %v1465_v15 }
 0x3e4   :  { %v1376_v20 = vmul.f32 -1.442695, %v1467_v19  ;;  %v1424_v21 = vpop.f32.mrb[16].mxu1  ;;  %v1468_v22 = vpop.f32.mrb[10].mxu0 }
 0x3e5   :  { %v1425_v23 = vpop.f32.mrb[17].mxu1  ;;  %v1469_v24 = vpop.f32.mrb[11].mxu0 }
 0x3e6   :  { %1722 = vpow2.f32 %v1376_v20  ;;  %v1426_v25 = vadd.f32 %v1425_v23, %v1424_v21  ;;  %v1470_v27 = vadd.f32 %v1469_v24, %v1468_v22 }
 0x3e8   :  { %v1377_v28 = vmul.f32 -1.442695, %v1470_v27  ;;  %v1427_v29 = vpop.f32.mrb[18].mxu1  ;;  %v1471_v30 = vpop.f32.mrb[12].mxu0 }
 0x3e9   :  { %v1428_v31 = vpop.f32.mrb[19].mxu1  ;;  %v1472_v32 = vpop.f32.mrb[13].mxu0 }
 0x3ea   :  { %1724 = vpow2.f32 %v1377_v28  ;;  %v1429_v33 = vadd.f32 %v1428_v31, %v1427_v29  ;;  %v1473_v34 = vadd.f32 %v1472_v32, %v1471_v30 }
 0x3ec   :  { %v1378_v35 = vmul.f32 -1.442695, %v1473_v34  ;;  %v1430_v36 = vpop.f32.mrb[20].mxu1  ;;  %v1474_v37 = vpop.f32.mrb[14].mxu0 }
 0x3ed   :  { %v1431_v38 = vpop.f32.mrb[21].mxu1  ;;  %v1475_v39 = vpop.f32.mrb[15].mxu0 }
 0x3ee   :  { %1726 = vpow2.f32 %v1378_v35  ;;  %v1432_v40 = vadd.f32 %v1431_v38, %v1430_v36  ;;  %v1476_v41 = vadd.f32 %v1475_v39, %v1474_v37 }
 0x3f0   :  { %v1723_v42 = vpop.eup %1722  ;;  %v1379_v43 = vmul.f32 -1.442695, %v1476_v41 }
 0x3f1   :  { %v1220_v45 = vadd.f32 1.0, %v1723_v42 }
 0x3f2   :  { %1728 = vpow2.f32 %v1379_v43 }
 0x3f3   :  { %1730 = vrcp.f32 %v1220_v45 }
 0x3f4   :  { %v1725_v47 = vpop.eup %1724 }
 0x3f5   :  { %v1221_v46 = vadd.f32 1.0, %v1725_v47 }
 0x3f7   :  { %1732 = vrcp.f32 %v1221_v46 }
 0x3f8   :  { %v1727_v51 = vpop.eup %1726 }
 0x3f9   :  { %v1222_v57 = vadd.f32 1.0, %v1727_v51 }
 0x3fb   :  { %1734 = vrcp.f32 %v1222_v57 }
 0x3fc   :  { %v1729_v60 = vpop.eup %1728 }
 0x3fd   :  { %v1731_v3 = vpop.eup %1730  ;;  %v1223_v44 = vadd.f32 1.0, %v1729_v60 }
 0x3fe   :  { %v1232_v63 = vmul.f32 %v1731_v3, %v1423_v18 }
 0x3ff   :  { %1736 = vrcp.f32 %v1223_v44 }
 0x400   :  { %1236 = vst [vmem:[%s2434_s7] sm:$0xff] %v1232_v63 }
 0x401   :  { %v1733_v48 = vpop.eup %1732 }
 0x402   :  { %v1233_v49 = vmul.f32 %v1733_v48, %v1426_v25 }
 0x404   :  { %1237 = vst [vmem:[%s2434_s7 + $0x8] sm:$0xff] %v1233_v49 }
 0x405   :  { %v1735_v50 = vpop.eup %1734 }
 0x406   :  { %v1234_v52 = vmul.f32 %v1735_v50, %v1429_v33 }
 0x408   :  { %1238 = vst [vmem:[%s2434_s7 + $0x10] sm:$0xff] %v1234_v52 }
 0x409   :  { %v1737_v53 = vpop.eup %1736 }
 0x40a   :  { %v1235_v54 = vmul.f32 %v1737_v53, %v1432_v40 }
 0x40c   :  { %1239 = vst [vmem:[%s2434_s7 + $0x18] sm:$0xff] %v1235_v54 }

</bundles_post_ra>
